<compile_context>
chip_gen: v6e
topology: v6e:2x2x1
jax: 0.10.0
libtpu: 0.0.40
codegen_flags: <defaults>
</compile_context>

<pallas_src>
import functools

import jax
import jax.numpy as jnp
from jax.experimental import pallas as pl
from jax.experimental.pallas import tpu as pltpu

EPS = 1e-5
NEG_SLOPE = 0.2
KSIZE = 3
LANE = 128
SUBLANE = 8


def _round_up(x, m):
    return (x + m - 1) // m * m


def _pick_tile_h(H, W, cin_p, cout, budget_bytes=12 << 20):
    """Largest divisor of H whose flattened (tile_h*W) output block is lane-dense
    (multiple of 128 -> unmasked stores) and whose per-step working set fits the
    VMEM budget.  tile_h == H is always legal (block == full array dim)."""
    legal = [th for th in range(1, H + 1)
             if H % th == 0 and ((th * W) % LANE == 0 or th == H)]

    def need(th):
        L = th * W
        return 4 * (KSIZE * KSIZE * cin_p * L            # im2col scratch
                    + cout * L                             # conv result
                    + 2 * _round_up(cout, SUBLANE) * _round_up(L, LANE))  # out blk x2

    fitting = [th for th in legal if need(th) <= budget_bytes]
    return max(fitting) if fitting else min(legal)


def _conv3x3_tile(x_ref, w_ref, patches_ref, *, tile_h, w_out):
    """3x3 stride-1 conv for one row tile.

    x_ref:       (Cin_p, Hp, Wp)        zero-padded NCHW slab for one sample
    w_ref:       (Cout, 9*Cin_p)        im2col weight matrix, cols = (kh, kw, cin)
    patches_ref: (9*Cin_p, tile_h*w_out) VMEM scratch for the im2col patches
    returns      (Cout, tile_h*w_out) f32
    """
    cin_p = x_ref.shape[0]
    L = tile_h * w_out
    row0 = pl.multiple_of(pl.program_id(1) * tile_h, tile_h)
    win = x_ref[:, pl.ds(row0, tile_h + 2), :]            # (Cin_p, tile_h+2, Wp)

    # Build the transposed im2col patch matrix in VMEM scratch: sublane-aligned
    # static-offset stores (Cin_p is a multiple of 8), one relayout per tap.
    for kh in range(KSIZE):
        for kw in range(KSIZE):
            k = kh * KSIZE + kw
            patches_ref[k * cin_p:(k + 1) * cin_p, :] = (
                win[:, kh:kh + tile_h, kw:kw + w_out].reshape(cin_p, L))

    # Single MXU contraction with K = 9*Cin_p (instead of 9 K=Cin dots).
    return jnp.dot(w_ref[...], patches_ref[...],
                   preferred_element_type=jnp.float32)


def conv_stats_kernel(x_ref, w_ref, stats_ref, patches_ref, *, tile_h, w_out):
    """Pass 1: conv tile -> per-tile per-channel [sum, centered M2] (no z to HBM)."""
    y = _conv3x3_tile(x_ref, w_ref, patches_ref, tile_h=tile_h, w_out=w_out)
    L = tile_h * w_out
    s = jnp.sum(y, axis=1, keepdims=True)                 # (Cout, 1)
    d = y - s * (1.0 / L)                                 # center on tile mean
    stats_ref[:, 0:1] = s
    stats_ref[:, 1:2] = jnp.sum(d * d, axis=1, keepdims=True)


def conv_bn_act_kernel(x_ref, w_ref, scale_ref, shift_ref, o_ref, patches_ref,
                       *, tile_h, w_out):
    """Pass 2: recompute conv tile, apply folded BN affine + LeakyReLU(0.2)."""
    y = _conv3x3_tile(x_ref, w_ref, patches_ref, tile_h=tile_h, w_out=w_out)
    a = y * scale_ref[...] + shift_ref[...]               # (Cout,1) broadcasts
    o_ref[...] = jnp.where(a >= 0.0, a, NEG_SLOPE * a)


def conv_block(x_nchw, w_oihw, b_conv, gamma, beta):
    """x_nchw: (N, Cin, H, W) f32 -> (N, Cout, H, W) f32."""
    # Per-channel conv bias is exactly cancelled by training-mode BN mean
    # subtraction; restoring it is required if this block is reused without BN.
    del b_conv
    N, Cin, H, W = x_nchw.shape
    Cout = w_oihw.shape[0]
    Cin_p = _round_up(Cin, SUBLANE)

    tile_h = _pick_tile_h(H, W, Cin_p, Cout)
    n_h = H // tile_h
    L = tile_h * W
    Hp, Wp = H + 2, W + 2

    # Layout glue kept to a single zero-pad of the (small) input: 1-px spatial
    # halo + channel pad to a sublane multiple.  No NCHW<->NHWC transposes.
    # TODO(synk): handle the halo in-kernel (pl.when edge masking) / keep NHWC
    # end-to-end when embedding in the full InversionNet to drop this pad too.
    x_pad = jnp.pad(x_nchw, ((0, 0), (0, Cin_p - Cin), (1, 1), (1, 1)))

    # im2col weight matrix (Cout, 9*Cin_p); column order (kh, kw, cin).
    w_mat = jnp.pad(jnp.transpose(w_oihw, (0, 2, 3, 1)),
                    ((0, 0), (0, 0), (0, 0), (0, Cin_p - Cin)))
    w_mat = w_mat.reshape(Cout, KSIZE * KSIZE * Cin_p)

    grid = (N, n_h)
    # Per-sample slab: block index only depends on n -> the DMA is elided while
    # iterating over h tiles.
    # TODO(synk): switch to halo-tiled row blocks (manual DMA) for very large
    # images so slab VMEM stays bounded; single-buffer the invariant weight
    # block (pipeline_mode=pl.Buffered(1)) once validated on all generations.
    x_spec = pl.BlockSpec((None, Cin_p, Hp, Wp), lambda n, h: (n, 0, 0, 0))
    w_spec = pl.BlockSpec((Cout, KSIZE * KSIZE * Cin_p), lambda n, h: (0, 0))
    patches_scratch = pltpu.VMEM((KSIZE * KSIZE * Cin_p, L), jnp.float32)
    cparams = pltpu.CompilerParams(
        dimension_semantics=("parallel", "parallel"),   # megacore shards N first
        vmem_limit_bytes=32 * 1024 * 1024)              # safe on v5e/v6e/v7x

    # ---- Pass 1: tiled conv -> per-tile per-channel [sum, centered M2] ----
    kernel1 = functools.partial(conv_stats_kernel, tile_h=tile_h, w_out=W)
    stats = pl.pallas_call(
        kernel1,
        grid=grid,
        out_shape=jax.ShapeDtypeStruct((N, n_h, Cout, 2), jnp.float32),
        in_specs=[x_spec, w_spec],
        out_specs=pl.BlockSpec((None, None, Cout, 2), lambda n, h: (n, h, 0, 0)),
        scratch_shapes=[patches_scratch],
        compiler_params=cparams,
    )(x_pad, w_mat)

    # ---- Tiny cross-tile (Chan) combine + BN affine folding, in XLA ----
    cnt = jnp.float32(N * H * W)
    tile_sum = stats[..., 0]                              # (N, n_h, Cout)
    tile_m2 = stats[..., 1]
    mu = jnp.sum(tile_sum, axis=(0, 1)) / cnt             # (Cout,)
    tile_mean = tile_sum / jnp.float32(L)
    m2 = (jnp.sum(tile_m2, axis=(0, 1))
          + jnp.float32(L) * jnp.sum((tile_mean - mu) ** 2, axis=(0, 1)))
    var = m2 / cnt                                        # biased batch variance
    scale = gamma * jax.lax.rsqrt(var + EPS)
    shift = beta - mu * scale

    # ---- Pass 2: recompute conv, apply folded scale/shift + LeakyReLU ----
    # TODO(synk): optional bf16 x/w operands (f32 accumulation) for ~3x MXU
    # throughput; requires relaxing the f32 reference tolerance.
    kernel2 = functools.partial(conv_bn_act_kernel, tile_h=tile_h, w_out=W)
    out_flat = pl.pallas_call(
        kernel2,
        grid=grid,
        out_shape=jax.ShapeDtypeStruct((N, Cout, H * W), jnp.float32),
        in_specs=[x_spec, w_spec,
                  pl.BlockSpec((Cout, 1), lambda n, h: (0, 0)),
                  pl.BlockSpec((Cout, 1), lambda n, h: (0, 0))],
        out_specs=pl.BlockSpec((None, Cout, L), lambda n, h: (n, 0, h)),
        scratch_shapes=[patches_scratch],
        compiler_params=cparams,
    )(x_pad, w_mat, scale.reshape(Cout, 1), shift.reshape(Cout, 1))

    return out_flat.reshape(N, Cout, H, W)                # free: no transpose


def reference(x_nchw, w_oihw, b_conv, gamma, beta):
    """Pure-JAX reference mirroring the PyTorch forward (training-mode BN)."""
    z = jax.lax.conv_general_dilated(
        x_nchw, w_oihw, window_strides=(1, 1), padding=((1, 1), (1, 1)),
        dimension_numbers=("NCHW", "OIHW", "NCHW"),
        precision=jax.lax.Precision.HIGHEST)
    z = z + b_conv[None, :, None, None]
    mu = jnp.mean(z, axis=(0, 2, 3), keepdims=True)
    var = jnp.mean((z - mu) ** 2, axis=(0, 2, 3), keepdims=True)
    y = (z - mu) * jax.lax.rsqrt(var + EPS)
    y = y * gamma[None, :, None, None] + beta[None, :, None, None]
    return jnp.where(y >= 0.0, y, NEG_SLOPE * y)


if __name__ == "__main__":
    N, Cin, Cout, H, W = 2, 4, 8, 16, 16

    key = jax.random.PRNGKey(0)
    kx, kw, kb, kg, kbe = jax.random.split(key, 5)
    x = jax.random.normal(kx, (N, Cin, H, W), jnp.float32)
    w = jax.random.normal(kw, (Cout, Cin, KSIZE, KSIZE), jnp.float32) * 0.1
    b_conv = jax.random.normal(kb, (Cout,), jnp.float32) * 0.1
    gamma = 1.0 + 0.1 * jax.random.normal(kg, (Cout,), jnp.float32)
    beta = 0.1 * jax.random.normal(kbe, (Cout,), jnp.float32)

    out = jax.jit(conv_block)(x, w, b_conv, gamma, beta)
    out = jax.block_until_ready(out)

    ref = reference(x, w, b_conv, gamma, beta)
    assert out.shape == (N, Cout, H, W)
    # Tolerance covers MXU f32 (bf16 multi-pass) emulation vs XLA HIGHEST conv.
    assert jnp.allclose(out, ref, atol=1e-3, rtol=1e-3), "mismatch vs reference"

    print("KERNEL_OK")
</pallas_src>

<mosaic_0001>
module attributes {stable_mosaic.version = 11 : i64} {
  func.func @conv_stats_kernel(%arg0: i32, %arg1: i32, %arg2: memref<1x8x18x18xf32, #tpu.memory_space<vmem>>, %arg3: memref<8x72xf32, #tpu.memory_space<vmem>>, %arg4: memref<1x1x8x2xf32, #tpu.memory_space<vmem>>, %arg5: memref<72x256xf32, #tpu.memory_space<vmem>>) attributes {dimension_semantics = [#tpu.dimension_semantics<parallel>, #tpu.dimension_semantics<parallel>], iteration_bounds = array<i64: 2, 1>, scalar_prefetch = 0 : i64, scratch_operands = 1 : i64, tpu.core_type = #tpu.core_type<tc>, window_params = [{transform_indices = @transform_0, window_bounds = array<i64: 1, 8, 18, 18>}, {pipeline_mode = #tpu.pipeline_mode<synchronous>, transform_indices = @transform_1, window_bounds = array<i64: 8, 72>}, {transform_indices = @transform_2, window_bounds = array<i64: 1, 1, 8, 2>}]} {
    %c16_i32 = arith.constant 16 : i32
    %0 = arith.muli %arg1, %c16_i32 : i32
    %1 = tpu.assume_multiple %0, 16 : i32
    %c0 = arith.constant 0 : index
    %c0_0 = arith.constant 0 : index
    %2 = arith.index_cast %1 : i32 to index
    %c0_1 = arith.constant 0 : index
    %3 = vector.load %arg2[%c0, %c0_0, %2, %c0_1] : memref<1x8x18x18xf32, #tpu.memory_space<vmem>>, vector<1x8x18x18xf32>
    %4 = vector.shape_cast %3 : vector<1x8x18x18xf32> to vector<8x18x18xf32>
    %5 = vector.extract_strided_slice %4 {offsets = [0, 0, 0], sizes = [8, 16, 16], strides = [1, 1, 1]} : vector<8x18x18xf32> to vector<8x16x16xf32>
    %6 = vector.shape_cast %5 : vector<8x16x16xf32> to vector<8x256xf32>
    %c0_2 = arith.constant 0 : index
    %c0_3 = arith.constant 0 : index
    %7 = vector.load %arg5[%c0_2, %c0_3] : memref<72x256xf32, #tpu.memory_space<vmem>>, vector<8x256xf32>
    tpu.vector_store %arg5[%c0_2, %c0_3], %6 {strides = array<i32>} : memref<72x256xf32, #tpu.memory_space<vmem>>, vector<8x256xf32>,
    %8 = vector.extract_strided_slice %4 {offsets = [0, 0, 1], sizes = [8, 16, 16], strides = [1, 1, 1]} : vector<8x18x18xf32> to vector<8x16x16xf32>
    %9 = vector.shape_cast %8 : vector<8x16x16xf32> to vector<8x256xf32>
    %c8 = arith.constant 8 : index
    %c0_4 = arith.constant 0 : index
    %10 = vector.load %arg5[%c8, %c0_4] : memref<72x256xf32, #tpu.memory_space<vmem>>, vector<8x256xf32>
    tpu.vector_store %arg5[%c8, %c0_4], %9 {strides = array<i32>} : memref<72x256xf32, #tpu.memory_space<vmem>>, vector<8x256xf32>,
    %11 = vector.extract_strided_slice %4 {offsets = [0, 0, 2], sizes = [8, 16, 16], strides = [1, 1, 1]} : vector<8x18x18xf32> to vector<8x16x16xf32>
    %12 = vector.shape_cast %11 : vector<8x16x16xf32> to vector<8x256xf32>
    %c16 = arith.constant 16 : index
    %c0_5 = arith.constant 0 : index
    %13 = vector.load %arg5[%c16, %c0_5] : memref<72x256xf32, #tpu.memory_space<vmem>>, vector<8x256xf32>
    tpu.vector_store %arg5[%c16, %c0_5], %12 {strides = array<i32>} : memref<72x256xf32, #tpu.memory_space<vmem>>, vector<8x256xf32>,
    %14 = vector.extract_strided_slice %4 {offsets = [0, 1, 0], sizes = [8, 16, 16], strides = [1, 1, 1]} : vector<8x18x18xf32> to vector<8x16x16xf32>
    %15 = vector.shape_cast %14 : vector<8x16x16xf32> to vector<8x256xf32>
    %c24 = arith.constant 24 : index
    %c0_6 = arith.constant 0 : index
    %16 = vector.load %arg5[%c24, %c0_6] : memref<72x256xf32, #tpu.memory_space<vmem>>, vector<8x256xf32>
    tpu.vector_store %arg5[%c24, %c0_6], %15 {strides = array<i32>} : memref<72x256xf32, #tpu.memory_space<vmem>>, vector<8x256xf32>,
    %17 = vector.extract_strided_slice %4 {offsets = [0, 1, 1], sizes = [8, 16, 16], strides = [1, 1, 1]} : vector<8x18x18xf32> to vector<8x16x16xf32>
    %18 = vector.shape_cast %17 : vector<8x16x16xf32> to vector<8x256xf32>
    %c32 = arith.constant 32 : index
    %c0_7 = arith.constant 0 : index
    %19 = vector.load %arg5[%c32, %c0_7] : memref<72x256xf32, #tpu.memory_space<vmem>>, vector<8x256xf32>
    tpu.vector_store %arg5[%c32, %c0_7], %18 {strides = array<i32>} : memref<72x256xf32, #tpu.memory_space<vmem>>, vector<8x256xf32>,
    %20 = vector.extract_strided_slice %4 {offsets = [0, 1, 2], sizes = [8, 16, 16], strides = [1, 1, 1]} : vector<8x18x18xf32> to vector<8x16x16xf32>
    %21 = vector.shape_cast %20 : vector<8x16x16xf32> to vector<8x256xf32>
    %c40 = arith.constant 40 : index
    %c0_8 = arith.constant 0 : index
    %22 = vector.load %arg5[%c40, %c0_8] : memref<72x256xf32, #tpu.memory_space<vmem>>, vector<8x256xf32>
    tpu.vector_store %arg5[%c40, %c0_8], %21 {strides = array<i32>} : memref<72x256xf32, #tpu.memory_space<vmem>>, vector<8x256xf32>,
    %23 = vector.extract_strided_slice %4 {offsets = [0, 2, 0], sizes = [8, 16, 16], strides = [1, 1, 1]} : vector<8x18x18xf32> to vector<8x16x16xf32>
    %24 = vector.shape_cast %23 : vector<8x16x16xf32> to vector<8x256xf32>
    %c48 = arith.constant 48 : index
    %c0_9 = arith.constant 0 : index
    %25 = vector.load %arg5[%c48, %c0_9] : memref<72x256xf32, #tpu.memory_space<vmem>>, vector<8x256xf32>
    tpu.vector_store %arg5[%c48, %c0_9], %24 {strides = array<i32>} : memref<72x256xf32, #tpu.memory_space<vmem>>, vector<8x256xf32>,
    %26 = vector.extract_strided_slice %4 {offsets = [0, 2, 1], sizes = [8, 16, 16], strides = [1, 1, 1]} : vector<8x18x18xf32> to vector<8x16x16xf32>
    %27 = vector.shape_cast %26 : vector<8x16x16xf32> to vector<8x256xf32>
    %c56 = arith.constant 56 : index
    %c0_10 = arith.constant 0 : index
    %28 = vector.load %arg5[%c56, %c0_10] : memref<72x256xf32, #tpu.memory_space<vmem>>, vector<8x256xf32>
    tpu.vector_store %arg5[%c56, %c0_10], %27 {strides = array<i32>} : memref<72x256xf32, #tpu.memory_space<vmem>>, vector<8x256xf32>,
    %29 = vector.extract_strided_slice %4 {offsets = [0, 2, 2], sizes = [8, 16, 16], strides = [1, 1, 1]} : vector<8x18x18xf32> to vector<8x16x16xf32>
    %30 = vector.shape_cast %29 : vector<8x16x16xf32> to vector<8x256xf32>
    %c64 = arith.constant 64 : index
    %c0_11 = arith.constant 0 : index
    %31 = vector.load %arg5[%c64, %c0_11] : memref<72x256xf32, #tpu.memory_space<vmem>>, vector<8x256xf32>
    tpu.vector_store %arg5[%c64, %c0_11], %30 {strides = array<i32>} : memref<72x256xf32, #tpu.memory_space<vmem>>, vector<8x256xf32>,
    %c0_12 = arith.constant 0 : index
    %c0_13 = arith.constant 0 : index
    %32 = vector.load %arg3[%c0_12, %c0_13] : memref<8x72xf32, #tpu.memory_space<vmem>>, vector<8x72xf32>
    %c0_14 = arith.constant 0 : index
    %c0_15 = arith.constant 0 : index
    %33 = vector.load %arg5[%c0_14, %c0_15] : memref<72x256xf32, #tpu.memory_space<vmem>>, vector<72x256xf32>
    %cst = arith.constant dense<0.000000e+00> : vector<8x256xf32>
    %34 = tpu.matmul %32, %33, %cst {dimension_numbers = #tpu.dot_dimension_numbers<[1], [0], [0], [1], [0, 0, 1, 1], [], []>} : vector<8x72xf32>, vector<72x256xf32>, vector<8x256xf32> -> vector<8x256xf32>
    %cst_16 = arith.constant dense<0.000000e+00> : vector<8xf32>
    %35 = vector.multi_reduction <add>, %34, %cst_16 [1] : vector<8x256xf32> to vector<8xf32>
    %36 = vector.shape_cast %35 : vector<8xf32> to vector<8x1xf32>
    %cst_17 = arith.constant 3.906250e-03 : f32
    %37 = vector.broadcast %cst_17 : f32 to vector<8x1xf32>
    %38 = arith.mulf %36, %37 : vector<8x1xf32>
    %39 = vector.broadcast %38 : vector<8x1xf32> to vector<8x256xf32>
    %40 = arith.subf %34, %39 : vector<8x256xf32>
    %c0_18 = arith.constant 0 : index
    %c0_19 = arith.constant 0 : index
    %c0_20 = arith.constant 0 : index
    %c0_21 = arith.constant 0 : index
    %41 = vector.load %arg4[%c0_18, %c0_19, %c0_20, %c0_21] : memref<1x1x8x2xf32, #tpu.memory_space<vmem>>, vector<1x1x8x1xf32>
    %42 = vector.shape_cast %41 : vector<1x1x8x1xf32> to vector<8x1xf32>
    %43 = vector.shape_cast %36 : vector<8x1xf32> to vector<1x1x8x1xf32>
    tpu.vector_store %arg4[%c0_18, %c0_19, %c0_20, %c0_21], %43 {strides = array<i32>} : memref<1x1x8x2xf32, #tpu.memory_space<vmem>>, vector<1x1x8x1xf32>,
    %44 = arith.mulf %40, %40 : vector<8x256xf32>
    %cst_22 = arith.constant dense<0.000000e+00> : vector<8xf32>
    %45 = vector.multi_reduction <add>, %44, %cst_22 [1] : vector<8x256xf32> to vector<8xf32>
    %46 = vector.shape_cast %45 : vector<8xf32> to vector<8x1xf32>
    %c0_23 = arith.constant 0 : index
    %c0_24 = arith.constant 0 : index
    %c0_25 = arith.constant 0 : index
    %c1 = arith.constant 1 : index
    %47 = vector.load %arg4[%c0_23, %c0_24, %c0_25, %c1] : memref<1x1x8x2xf32, #tpu.memory_space<vmem>>, vector<1x1x8x1xf32>
    %48 = vector.shape_cast %47 : vector<1x1x8x1xf32> to vector<8x1xf32>
    %49 = vector.shape_cast %46 : vector<8x1xf32> to vector<1x1x8x1xf32>
    tpu.vector_store %arg4[%c0_23, %c0_24, %c0_25, %c1], %49 {strides = array<i32>} : memref<1x1x8x2xf32, #tpu.memory_space<vmem>>, vector<1x1x8x1xf32>,
    return
  }
  func.func @transform_0(%arg0: i32, %arg1: i32) -> (i32, i32, i32, i32) {
    %c0_i32 = arith.constant 0 : i32
    %c0_i32_0 = arith.constant 0 : i32
    %c0_i32_1 = arith.constant 0 : i32
    %c0_i32_2 = arith.constant 0 : i32
    return %arg0, %c0_i32, %c0_i32_0, %c0_i32_1 : i32, i32, i32, i32
  }
  func.func @transform_1(%arg0: i32, %arg1: i32) -> (i32, i32) {
    %c0_i32 = arith.constant 0 : i32
    %c0_i32_0 = arith.constant 0 : i32
    %c0_i32_1 = arith.constant 0 : i32
    return %c0_i32, %c0_i32_0 : i32, i32
  }
  func.func @transform_2(%arg0: i32, %arg1: i32) -> (i32, i32, i32, i32) {
    %c0_i32 = arith.constant 0 : i32
    %c0_i32_0 = arith.constant 0 : i32
    %c0_i32_1 = arith.constant 0 : i32
    return %arg0, %arg1, %c0_i32, %c0_i32_0 : i32, i32, i32, i32
  }
}

module attributes {stable_mosaic.version = 11 : i64} {
  func.func @conv_bn_act_kernel(%arg0: i32, %arg1: i32, %arg2: memref<1x8x18x18xf32, #tpu.memory_space<vmem>>, %arg3: memref<8x72xf32, #tpu.memory_space<vmem>>, %arg4: memref<8x1xf32, #tpu.memory_space<vmem>>, %arg5: memref<8x1xf32, #tpu.memory_space<vmem>>, %arg6: memref<1x8x256xf32, #tpu.memory_space<vmem>>, %arg7: memref<72x256xf32, #tpu.memory_space<vmem>>) attributes {dimension_semantics = [#tpu.dimension_semantics<parallel>, #tpu.dimension_semantics<parallel>], iteration_bounds = array<i64: 2, 1>, scalar_prefetch = 0 : i64, scratch_operands = 1 : i64, tpu.core_type = #tpu.core_type<tc>, window_params = [{transform_indices = @transform_0, window_bounds = array<i64: 1, 8, 18, 18>}, {pipeline_mode = #tpu.pipeline_mode<synchronous>, transform_indices = @transform_1, window_bounds = array<i64: 8, 72>}, {pipeline_mode = #tpu.pipeline_mode<synchronous>, transform_indices = @transform_2, window_bounds = array<i64: 8, 1>}, {pipeline_mode = #tpu.pipeline_mode<synchronous>, transform_indices = @transform_3, window_bounds = array<i64: 8, 1>}, {transform_indices = @transform_4, window_bounds = array<i64: 1, 8, 256>}]} {
    %c16_i32 = arith.constant 16 : i32
    %0 = arith.muli %arg1, %c16_i32 : i32
    %1 = tpu.assume_multiple %0, 16 : i32
    %c0 = arith.constant 0 : index
    %c0_0 = arith.constant 0 : index
    %2 = arith.index_cast %1 : i32 to index
    %c0_1 = arith.constant 0 : index
    %3 = vector.load %arg2[%c0, %c0_0, %2, %c0_1] : memref<1x8x18x18xf32, #tpu.memory_space<vmem>>, vector<1x8x18x18xf32>
    %4 = vector.shape_cast %3 : vector<1x8x18x18xf32> to vector<8x18x18xf32>
    %5 = vector.extract_strided_slice %4 {offsets = [0, 0, 0], sizes = [8, 16, 16], strides = [1, 1, 1]} : vector<8x18x18xf32> to vector<8x16x16xf32>
    %6 = vector.shape_cast %5 : vector<8x16x16xf32> to vector<8x256xf32>
    %c0_2 = arith.constant 0 : index
    %c0_3 = arith.constant 0 : index
    %7 = vector.load %arg7[%c0_2, %c0_3] : memref<72x256xf32, #tpu.memory_space<vmem>>, vector<8x256xf32>
    tpu.vector_store %arg7[%c0_2, %c0_3], %6 {strides = array<i32>} : memref<72x256xf32, #tpu.memory_space<vmem>>, vector<8x256xf32>,
    %8 = vector.extract_strided_slice %4 {offsets = [0, 0, 1], sizes = [8, 16, 16], strides = [1, 1, 1]} : vector<8x18x18xf32> to vector<8x16x16xf32>
    %9 = vector.shape_cast %8 : vector<8x16x16xf32> to vector<8x256xf32>
    %c8 = arith.constant 8 : index
    %c0_4 = arith.constant 0 : index
    %10 = vector.load %arg7[%c8, %c0_4] : memref<72x256xf32, #tpu.memory_space<vmem>>, vector<8x256xf32>
    tpu.vector_store %arg7[%c8, %c0_4], %9 {strides = array<i32>} : memref<72x256xf32, #tpu.memory_space<vmem>>, vector<8x256xf32>,
    %11 = vector.extract_strided_slice %4 {offsets = [0, 0, 2], sizes = [8, 16, 16], strides = [1, 1, 1]} : vector<8x18x18xf32> to vector<8x16x16xf32>
    %12 = vector.shape_cast %11 : vector<8x16x16xf32> to vector<8x256xf32>
    %c16 = arith.constant 16 : index
    %c0_5 = arith.constant 0 : index
    %13 = vector.load %arg7[%c16, %c0_5] : memref<72x256xf32, #tpu.memory_space<vmem>>, vector<8x256xf32>
    tpu.vector_store %arg7[%c16, %c0_5], %12 {strides = array<i32>} : memref<72x256xf32, #tpu.memory_space<vmem>>, vector<8x256xf32>,
    %14 = vector.extract_strided_slice %4 {offsets = [0, 1, 0], sizes = [8, 16, 16], strides = [1, 1, 1]} : vector<8x18x18xf32> to vector<8x16x16xf32>
    %15 = vector.shape_cast %14 : vector<8x16x16xf32> to vector<8x256xf32>
    %c24 = arith.constant 24 : index
    %c0_6 = arith.constant 0 : index
    %16 = vector.load %arg7[%c24, %c0_6] : memref<72x256xf32, #tpu.memory_space<vmem>>, vector<8x256xf32>
    tpu.vector_store %arg7[%c24, %c0_6], %15 {strides = array<i32>} : memref<72x256xf32, #tpu.memory_space<vmem>>, vector<8x256xf32>,
    %17 = vector.extract_strided_slice %4 {offsets = [0, 1, 1], sizes = [8, 16, 16], strides = [1, 1, 1]} : vector<8x18x18xf32> to vector<8x16x16xf32>
    %18 = vector.shape_cast %17 : vector<8x16x16xf32> to vector<8x256xf32>
    %c32 = arith.constant 32 : index
    %c0_7 = arith.constant 0 : index
    %19 = vector.load %arg7[%c32, %c0_7] : memref<72x256xf32, #tpu.memory_space<vmem>>, vector<8x256xf32>
    tpu.vector_store %arg7[%c32, %c0_7], %18 {strides = array<i32>} : memref<72x256xf32, #tpu.memory_space<vmem>>, vector<8x256xf32>,
    %20 = vector.extract_strided_slice %4 {offsets = [0, 1, 2], sizes = [8, 16, 16], strides = [1, 1, 1]} : vector<8x18x18xf32> to vector<8x16x16xf32>
    %21 = vector.shape_cast %20 : vector<8x16x16xf32> to vector<8x256xf32>
    %c40 = arith.constant 40 : index
    %c0_8 = arith.constant 0 : index
    %22 = vector.load %arg7[%c40, %c0_8] : memref<72x256xf32, #tpu.memory_space<vmem>>, vector<8x256xf32>
    tpu.vector_store %arg7[%c40, %c0_8], %21 {strides = array<i32>} : memref<72x256xf32, #tpu.memory_space<vmem>>, vector<8x256xf32>,
    %23 = vector.extract_strided_slice %4 {offsets = [0, 2, 0], sizes = [8, 16, 16], strides = [1, 1, 1]} : vector<8x18x18xf32> to vector<8x16x16xf32>
    %24 = vector.shape_cast %23 : vector<8x16x16xf32> to vector<8x256xf32>
    %c48 = arith.constant 48 : index
    %c0_9 = arith.constant 0 : index
    %25 = vector.load %arg7[%c48, %c0_9] : memref<72x256xf32, #tpu.memory_space<vmem>>, vector<8x256xf32>
    tpu.vector_store %arg7[%c48, %c0_9], %24 {strides = array<i32>} : memref<72x256xf32, #tpu.memory_space<vmem>>, vector<8x256xf32>,
    %26 = vector.extract_strided_slice %4 {offsets = [0, 2, 1], sizes = [8, 16, 16], strides = [1, 1, 1]} : vector<8x18x18xf32> to vector<8x16x16xf32>
    %27 = vector.shape_cast %26 : vector<8x16x16xf32> to vector<8x256xf32>
    %c56 = arith.constant 56 : index
    %c0_10 = arith.constant 0 : index
    %28 = vector.load %arg7[%c56, %c0_10] : memref<72x256xf32, #tpu.memory_space<vmem>>, vector<8x256xf32>
    tpu.vector_store %arg7[%c56, %c0_10], %27 {strides = array<i32>} : memref<72x256xf32, #tpu.memory_space<vmem>>, vector<8x256xf32>,
    %29 = vector.extract_strided_slice %4 {offsets = [0, 2, 2], sizes = [8, 16, 16], strides = [1, 1, 1]} : vector<8x18x18xf32> to vector<8x16x16xf32>
    %30 = vector.shape_cast %29 : vector<8x16x16xf32> to vector<8x256xf32>
    %c64 = arith.constant 64 : index
    %c0_11 = arith.constant 0 : index
    %31 = vector.load %arg7[%c64, %c0_11] : memref<72x256xf32, #tpu.memory_space<vmem>>, vector<8x256xf32>
    tpu.vector_store %arg7[%c64, %c0_11], %30 {strides = array<i32>} : memref<72x256xf32, #tpu.memory_space<vmem>>, vector<8x256xf32>,
    %c0_12 = arith.constant 0 : index
    %c0_13 = arith.constant 0 : index
    %32 = vector.load %arg3[%c0_12, %c0_13] : memref<8x72xf32, #tpu.memory_space<vmem>>, vector<8x72xf32>
    %c0_14 = arith.constant 0 : index
    %c0_15 = arith.constant 0 : index
    %33 = vector.load %arg7[%c0_14, %c0_15] : memref<72x256xf32, #tpu.memory_space<vmem>>, vector<72x256xf32>
    %cst = arith.constant dense<0.000000e+00> : vector<8x256xf32>
    %34 = tpu.matmul %32, %33, %cst {dimension_numbers = #tpu.dot_dimension_numbers<[1], [0], [0], [1], [0, 0, 1, 1], [], []>} : vector<8x72xf32>, vector<72x256xf32>, vector<8x256xf32> -> vector<8x256xf32>
    %c0_16 = arith.constant 0 : index
    %c0_17 = arith.constant 0 : index
    %35 = vector.load %arg4[%c0_16, %c0_17] : memref<8x1xf32, #tpu.memory_space<vmem>>, vector<8x1xf32>
    %36 = vector.broadcast %35 : vector<8x1xf32> to vector<8x256xf32>
    %37 = arith.mulf %34, %36 : vector<8x256xf32>
    %c0_18 = arith.constant 0 : index
    %c0_19 = arith.constant 0 : index
    %38 = vector.load %arg5[%c0_18, %c0_19] : memref<8x1xf32, #tpu.memory_space<vmem>>, vector<8x1xf32>
    %39 = vector.broadcast %38 : vector<8x1xf32> to vector<8x256xf32>
    %40 = arith.addf %37, %39 : vector<8x256xf32>
    %cst_20 = arith.constant 0.000000e+00 : f32
    %41 = vector.broadcast %cst_20 : f32 to vector<8x256xf32>
    %42 = arith.cmpf oge, %40, %41 : vector<8x256xf32>
    %cst_21 = arith.constant 2.000000e-01 : f32
    %43 = vector.broadcast %cst_21 : f32 to vector<8x256xf32>
    %44 = arith.mulf %43, %40 : vector<8x256xf32>
    %45 = arith.select %42, %40, %44 : vector<8x256xi1>, vector<8x256xf32>
    %c0_22 = arith.constant 0 : index
    %c0_23 = arith.constant 0 : index
    %c0_24 = arith.constant 0 : index
    %46 = vector.load %arg6[%c0_22, %c0_23, %c0_24] : memref<1x8x256xf32, #tpu.memory_space<vmem>>, vector<1x8x256xf32>
    %47 = vector.shape_cast %46 : vector<1x8x256xf32> to vector<8x256xf32>
    %48 = vector.shape_cast %45 : vector<8x256xf32> to vector<1x8x256xf32>
    tpu.vector_store %arg6[%c0_22, %c0_23, %c0_24], %48 {strides = array<i32>} : memref<1x8x256xf32, #tpu.memory_space<vmem>>, vector<1x8x256xf32>,
    return
  }
  func.func @transform_0(%arg0: i32, %arg1: i32) -> (i32, i32, i32, i32) {
    %c0_i32 = arith.constant 0 : i32
    %c0_i32_0 = arith.constant 0 : i32
    %c0_i32_1 = arith.constant 0 : i32
    %c0_i32_2 = arith.constant 0 : i32
    return %arg0, %c0_i32, %c0_i32_0, %c0_i32_1 : i32, i32, i32, i32
  }
  func.func @transform_1(%arg0: i32, %arg1: i32) -> (i32, i32) {
    %c0_i32 = arith.constant 0 : i32
    %c0_i32_0 = arith.constant 0 : i32
    %c0_i32_1 = arith.constant 0 : i32
    return %c0_i32, %c0_i32_0 : i32, i32
  }
  func.func @transform_2(%arg0: i32, %arg1: i32) -> (i32, i32) {
    %c0_i32 = arith.constant 0 : i32
    %c0_i32_0 = arith.constant 0 : i32
    %c0_i32_1 = arith.constant 0 : i32
    return %c0_i32, %c0_i32_0 : i32, i32
  }
  func.func @transform_3(%arg0: i32, %arg1: i32) -> (i32, i32) {
    %c0_i32 = arith.constant 0 : i32
    %c0_i32_0 = arith.constant 0 : i32
    %c0_i32_1 = arith.constant 0 : i32
    return %c0_i32, %c0_i32_0 : i32, i32
  }
  func.func @transform_4(%arg0: i32, %arg1: i32) -> (i32, i32, i32) {
    %c0_i32 = arith.constant 0 : i32
    %c0_i32_0 = arith.constant 0 : i32
    return %arg0, %c0_i32, %arg1 : i32, i32, i32
  }
}

</mosaic_0001>

<bundles_post_ra>
// kernel: conv_block.3
= control target key start
LH: loop header
LB: loop body
LE: loop exit
PB: predicated region body
PF: predicated region fallthrough
CT: control target
= control target key end

     0   :  { %s4107_s15 = smov 0   ;;  %s4109_s16 = smov 0   ;;  %s6552_s0 = inlined_call_operand.vmem [shape: f32[2,8,18,18], index: 0, kind: input, shape index: {}]   ;;  %s6553_s1 = inlined_call_operand.vmem [shape: f32[8,72], index: 1, kind: input, shape index: {}]   ;;  %s6554_s2 = inlined_call_operand.vmem [shape: f32[8,1], index: 2, kind: input, shape index: {}]   ;;  %s6555_s3 = inlined_call_operand.vmem [shape: f32[8,1], index: 3, kind: input, shape index: {}]   ;;  %s6556_s4 = inlined_call_operand.vmem [shape: f32[2,8,256], index: 4, kind: output, shape index: {}]  }
   0x1   :  { %s4111_s17 = smov 0  }
   0x2 LB: > { %s26_s18 = sadd.s32 1, %s4063_s16  ;;  %p3981_p0 = scmp.ge.s32.totalorder %s4067_s17, 1  ;;  %s4067_s17 = sphi %s4111_s17, %s14_s17   ;;  %s4063_s16 = sphi %s4109_s16, %s7037_s16   ;;  %s4059_s15 = sphi %s4107_s15, %s7036_s15  }
   0x3   : > { %p28_p1 = scmp.ge.s32.totalorder %s26_s18, 2  ;;  %p176_p2 = scmp.lt.s32.totalorder %s4067_s17, 3 }
   0x5   : > { %s7039_s18 = smov (%p28_p1, %s26_s18), 0  ;;  %p177_p3 = pnand %p3981_p0, %p176_p2 }
   0x7   : > { %180 = sbr.rel (%p177_p3) target bundleno = 895 (0x37f), region = 36 }
   0xc   : > { %p206_p4 = scmp.lt.s32.totalorder %s4059_s15, 1  ;;  %v252_v0 = vlaneseq  ;;  %v4069_v1 = vmov 1983009808   ;;  %v4070_v3 = vmov 1934713408   ;;  %s4071_s23 = smov 48  }
   0xd   : > { %v250_v2 = vunpack.c.l.s4 %v4069_v1  ;;  %v314_v4 = vunpack.c.l.s4 %v4070_v3  ;;  %s4072_s24 = smov 16   ;;  %s4073_s25 = smov 64   ;;  %vm2591_vm0 = vcmask 1045504   ;;  %vm1406_vm1 = vcmask 1046528  }
   0xe   : > { %s7041_s15 = smov (!%p206_p4, %s4059_s15), 1  ;;  %v253_v5 = vshrl.u32 %v252_v0, 7  ;;  %s4074_s26 = smov 32   ;;  %vm575_vm2 = vcmask 130048   ;;  %vm577_vm3 = vcmask 261120   ;;  %vm579_vm4 = vcmask 392192  }
   0xf   : > { %v251_v6 = vunpack.c.0.s8 %v250_v2  ;;  %s3989_s19 = smul.u32 192, %s7041_s15  ;;  %v315_v7 = vunpack.c.0.s8 %v314_v4  ;;  %s4075_s27 = smov 96   ;;  %vm581_vm5 = vcmask 523264   ;;  %vm583_vm6 = vcmask 654336  }
  0x10   : > { %s4076_s28 = smov 80   ;;  %s4077_s29 = smov 112   ;;  %vm585_vm7 = vcmask 785408   ;;  %vm587_vm8 = vcmask 916480   ;;  %vm3795_vm9 = vcmask 588800  }
  0x11   : > { %s4131_s22 = scalar_lea.vmem %s6552_s0, %s3989_s19  ;;  %v4133_v8 = vsub.s32 %v251_v6, %v253_v5  ;;  %v4165_v20 = vsub.s32 %v315_v7, %v253_v5  ;;  %s4078_s30 = smov 127  }
  0x12   : > { %v4136_v9 = vld [vmem:[%s4131_s22] sm:$0xff]  ;;  %v4139_v10 = vld [vmem:[%s4131_s22 + $0x18] sm:$0xff]  ;;  %v4142_v11 = vld [vmem:[%s4131_s22 + $0x30] sm:$0xff]  ;;  %s4079_s5 = smov 126   ;;  %s3988_s12 = sshll.u32 %s7041_s15, 4 }
  0x13   : > { %6705 = vst [vmem:[#allocation3_spill] sm:$0xff] %v4136_v9  ;;  %6706 = vst [vmem:[#allocation4_spill] sm:$0xff] %v4139_v10  ;;  %v4145_v12 = vld [vmem:[%s4131_s22 + $0x48] sm:$0xff]  ;;  %v4148_v13 = vld [vmem:[%s4131_s22 + $0x60] sm:$0xff]  ;;  %v247_v15 = vcombine.low %v4136_v9, %v4142_v11  ;;  %v248_v16 = vcombine.high %v4136_v9, %v4142_v11  ;;  %s219_s19 = scalar_lea.vmem %s6556_s4, %s3988_s12 }
  0x14   : > { %6707 = vst [vmem:[#allocation5_spill] sm:$0xff] %v4142_v11  ;;  %6708 = vst [vmem:[#allocation6_spill] sm:$0xff] %v4145_v12  ;;  %v4151_v14 = vld [vmem:[%s4131_s22 + $0x78] sm:$0xff]  ;;  %v4158_v17 = vld [vmem:[%s4131_s22 + $0x90] sm:$0xff]  ;;  %v263_v19 = vcombine.low %v4139_v10, %v4145_v12  ;;  %v264_v21 = vcombine.high %v4139_v10, %v4145_v12 }
  0x15   : > { %6709 = vst [vmem:[#allocation7_spill] sm:$0xff] %v4148_v13  ;;  %6710 = vst [vmem:[#allocation8_spill] sm:$0xff] %v4151_v14  ;;  %v4161_v18 = vld [vmem:[%s4131_s22 + $0xa8] sm:$0xff]  ;;  %v255_v23 = vrot.slane %v247_v15, %v4133_v8  ;;  %v279_v24 = vcombine.low %v4148_v13, %v4158_v17  ;;  %v262_v26 = vrot.slane %v248_v16, %v4133_v8  ;;  %v4179_v27 = vld [vmem:[%s4131_s22 + $0x20] sm:$0xff] }
  0x16   : > { %6711 = vst [vmem:[#allocation9_spill] sm:$0xff] %v4158_v17  ;;  %6712 = vst [vmem:[#allocation10_spill] sm:$0xff] %v4161_v18  ;;  %v4170_v22 = vld [vmem:[%s4131_s22 + $0x8] sm:$0xff]  ;;  %v295_v25 = vcombine.low %v4151_v14, %v4161_v18  ;;  %v4182_v28 = vld [vmem:[%s4131_s22 + $0x38] sm:$0xff]  ;;  %v271_v30 = vrot.slane %v263_v19, %v4133_v8  ;;  %v278_v31 = vrot.slane %v264_v21, %v4133_v8 }
  0x17   : > { %v4185_v29 = vld [vmem:[%s4131_s22 + $0x50] sm:$0xff]  ;;  %v280_v32 = vcombine.high %v4148_v13, %v4158_v17  ;;  %v296_v33 = vcombine.high %v4151_v14, %v4161_v18  ;;  %v287_v34 = vrot.slane %v279_v24, %v4133_v8  ;;  %v383_v36 = vcombine.low %v4170_v22, %v4182_v28  ;;  %v4212_v54 = vld [vmem:[%s4131_s22 + $0x68] sm:$0xff]  ;;  %v4215_v55 = vld [vmem:[%s4131_s22 + $0x98] sm:$0xff] }
  0x18   : > { %v303_v35 = vrot.slane %v295_v25, %v4133_v8  ;;  %v399_v37 = vcombine.low %v4179_v27, %v4185_v29  ;;  %v312_v38 = vcombine.high %v255_v23, %v271_v30  ;;  %v311_v39 = vcombine.low %v255_v23, %v271_v30  ;;  %6715 = vst [vmem:[#allocation13_spill] sm:$0xff] %v4215_v55  ;;  %v4220_v58 = vld [vmem:[%s4131_s22 + $0x80] sm:$0xff]  ;;  %v4223_v59 = vld [vmem:[%s4131_s22 + $0xb0] sm:$0xff] }
  0x19   : > { %v294_v40 = vrot.slane %v280_v32, %v4133_v8  ;;  %v310_v41 = vrot.slane %v296_v33, %v4133_v8  ;;  %v327_v44 = vcombine.low %v262_v26, %v278_v31  ;;  %v328_v45 = vcombine.high %v262_v26, %v278_v31 }
  0x1a   : > { %v344_v42 = vcombine.high %v287_v34, %v303_v35  ;;  %v343_v43 = vcombine.low %v287_v34, %v303_v35  ;;  %v326_v46 = vrot.slane %v312_v38, %v4165_v20  ;;  %v4203_v47 = vrot.slane %v311_v39, %v4165_v20 }
  0x1b   : > { %v359_v48 = vcombine.low %v294_v40, %v310_v41  ;;  %v360_v49 = vcombine.high %v294_v40, %v310_v41  ;;  %v335_v52 = vrot.slane %v327_v44, %v4165_v20  ;;  %v342_v53 = vrot.slane %v328_v45, %v4165_v20 }
  0x1c   : > { %6713 = vst [vmem:[#allocation11_spill] sm:$0xff] %v4203_v47  ;;  %v358_v50 = vrot.slane %v344_v42, %v4165_v20  ;;  %v4207_v51 = vrot.slane %v343_v43, %v4165_v20  ;;  %v391_v60 = vrot.slane %v383_v36, %v4133_v8  ;;  %v407_v61 = vrot.slane %v399_v37, %v4133_v8 }
  0x1d   : > { %v367_v56 = vrot.slane %v359_v48, %v4165_v20  ;;  %v374_v57 = vrot.slane %v360_v49, %v4165_v20  ;;  %v415_v2 = vcombine.low %v4212_v54, %v4215_v55  ;;  %v431_v4 = vcombine.low %v4220_v58, %v4223_v59 }
  0x1e   : > { %6714 = vst [vmem:[#allocation12_spill] sm:$0xff] %v4207_v51  ;;  %v378_v62 = vcombine.high %v326_v46, %v358_v50  ;;  %v376_v63 = vcombine.high %v4203_v47, %v4207_v51  ;;  %v377_v1 = vcombine.low %v326_v46, %v358_v50  ;;  %v447_v5 = vcombine.low %v391_v60, %v407_v61 }
  0x1f   : > { %v379_v3 = vcombine.low %v335_v52, %v367_v56  ;;  %v381_v6 = vcombine.low %v342_v53, %v374_v57  ;;  %v423_v7 = vrot.slane %v415_v2, %v4133_v8  ;;  %v384_v15 = vcombine.high %v4170_v22, %v4182_v28 }
  0x20   : > { %528 = vrot.lane.b32.xlu1 %v378_v62, %s4071_s23  ;;  %520 = vrot.lane.b32.xlu0 %v376_v63, %s4072_s24  ;;  %v400_v16 = vcombine.high %v4179_v27, %v4185_v29  ;;  %v380_v19 = vcombine.high %v335_v52, %v367_v56  ;;  %v439_v21 = vrot.slane %v431_v4, %v4133_v8  ;;  %v4316_v62 = vld [vmem:[%s4131_s22 + $0x28] sm:$0x3]  ;;  %v4319_v63 = vld [vmem:[%s4131_s22 + $0x10] sm:$0x3] }
  0x21   : > { %v416_v23 = vcombine.high %v4212_v54, %v4215_v55  ;;  %v432_v24 = vcombine.high %v4220_v58, %v4223_v59  ;;  %v4248_v25 = vrot.slane %v447_v5, %v4165_v20  ;;  %v448_v26 = vcombine.high %v391_v60, %v407_v61  ;;  %v4330_v5 = vld [vmem:[%s4131_s22 + $0x58] sm:$0x3] }
  0x22   : > { %v398_v30 = vrot.slane %v384_v15, %v4133_v8  ;;  %v414_v31 = vrot.slane %v400_v16, %v4133_v8  ;;  %v479_v32 = vcombine.low %v423_v7, %v439_v21  ;;  %v480_v33 = vcombine.high %v423_v7, %v439_v21  ;;  %v4344_v16 = vld [vmem:[%s4131_s22 + $0x88] sm:$0x3] }
  0x23   : > { %6716 = vst [vmem:[#allocation14_spill] sm:$0xff] %v4248_v25  ;;  %v430_v34 = vrot.slane %v416_v23, %v4133_v8  ;;  %v446_v35 = vrot.slane %v432_v24, %v4133_v8  ;;  %v382_v37 = vcombine.high %v342_v53, %v374_v57  ;;  %v462_v38 = vrot.slane %v448_v26, %v4165_v20  ;;  %v4353_v26 = vld [vmem:[%s4131_s22 + $0x70] sm:$0x3] }
  0x24   : > { %532 = vrot.lane.b32.xlu1 %v379_v3, %s4073_s25  ;;  %524 = vrot.lane.b32.xlu0 %v377_v1, %s4074_s26  ;;  %v4257_v36 = vrot.slane %v479_v32, %v4165_v20  ;;  %v463_v39 = vcombine.low %v398_v30, %v414_v31  ;;  %v494_v41 = vrot.slane %v480_v33, %v4165_v20  ;;  %v2598_v1 = vrot.slane %v4179_v27, 2 }
  0x25   : > { %v495_v42 = vcombine.low %v430_v34, %v446_v35  ;;  %v464_v45 = vcombine.high %v398_v30, %v414_v31  ;;  %v496_v46 = vcombine.high %v430_v34, %v446_v35  ;;  %v2600_v2 = vrot.slane %v4316_v62, 2 }
  0x26   : > { %6717 = vst [vmem:[#allocation15_spill] sm:$0xff] %v4257_v36  ;;  %v512_v40 = vcombine.high %v4248_v25, %v4257_v36  ;;  %v471_v44 = vrot.slane %v463_v39, %v4165_v20  ;;  %v514_v48 = vcombine.high %v462_v38, %v494_v41  ;;  %v513_v49 = vcombine.low %v462_v38, %v494_v41  ;;  %v4373_v38 = vld [vmem:[%s4131_s22 + $0xa0] sm:$0x3] }
  0x27   : > { %v503_v50 = vrot.slane %v495_v42, %v4165_v20  ;;  %v478_v52 = vrot.slane %v464_v45, %v4165_v20  ;;  %v510_v57 = vrot.slane %v496_v46, %v4165_v20  ;;  %v2593_v3 = vrot.slane %v4170_v22, 2  ;;  %6720 = vst [vmem:[#allocation18_spill] sm:$0xff] %v4373_v38 }
  0x28   : > { %540 = vrot.lane.b32.xlu1 %v381_v6, %s4075_s27  ;;  %536 = vrot.lane.b32.xlu0 %v380_v19, %s4076_s28  ;;  %v2595_v4 = vrot.slane %v4319_v63, 2  ;;  %v4333_v6 = vld [vmem:[%s4131_s22 + $0x40] sm:$0x3]  ;;  %v4340_v7 = vsel %vm2591_vm0, %v2598_v1, %v2600_v2  ;;  %v2608_v15 = vrot.slane %v4185_v29, 2  ;;  %v2610_v21 = vrot.slane %v4330_v5, 2 }
  0x29   : > { %v516_v53 = vcombine.high %v471_v44, %v503_v50  ;;  %v515_v56 = vcombine.low %v471_v44, %v503_v50  ;;  %v518_v60 = vcombine.high %v478_v52, %v510_v57  ;;  %v517_v61 = vcombine.low %v478_v52, %v510_v57  ;;  %6718 = vst [vmem:[#allocation16_spill] sm:$0xff] %v4340_v7 }
  0x2a   : > { %v4347_v19 = vsel %vm2591_vm0, %v2593_v3, %v2595_v4  ;;  %v2603_v23 = vrot.slane %v4182_v28, 2  ;;  %v2605_v24 = vrot.slane %v4333_v6, 2  ;;  %v2618_v30 = vrot.slane %v4220_v58, 2 }
  0x2b   : > { %6719 = vst [vmem:[#allocation17_spill] sm:$0xff] %v4347_v19  ;;  %v2620_v31 = vrot.slane %v4344_v16, 2  ;;  %v2613_v32 = vrot.slane %v4212_v54, 2  ;;  %v2615_v33 = vrot.slane %v4353_v26, 2  ;;  %v4364_v34 = vsel %vm2591_vm0, %v2608_v15, %v2610_v21 }
  0x2c   : > { %548 = vrot.lane.b32.xlu1 %v512_v40, %s4072_s24  ;;  %544 = vrot.lane.b32.xlu0 %v382_v37, %s4077_s29  ;;  %v4367_v35 = vsel %vm2591_vm0, %v2603_v23, %v2605_v24  ;;  %v4370_v37 = vld [vmem:[%s4131_s22 + $0xb8] sm:$0x3]  ;;  %v2628_v41 = vrot.slane %v4223_v59, 2  ;;  %v2623_v44 = vrot.slane %v4215_v55, 2  ;;  %v2625_v45 = vrot.slane %v4373_v38, 2 }
  0x2d   : > { %v4380_v39 = vsel %vm2591_vm0, %v2618_v30, %v2620_v31  ;;  %v4383_v40 = vsel %vm2591_vm0, %v2613_v32, %v2615_v33  ;;  %v2630_v42 = vrot.slane %v4370_v37, 2  ;;  %v2592_v50 = vrot.slane %v4136_v9, 2 }
  0x2e   : > { %6721 = vst [vmem:[#allocation19_spill] sm:$0xff] %v4383_v40  ;;  %v2602_v57 = vrot.slane %v4142_v11, 2  ;;  %v2612_v2 = vrot.slane %v4148_v13, 2  ;;  %v2622_v21 = vrot.slane %v4158_v17, 2 }
  0x2f   : > { %v4394_v46 = vsel %vm2591_vm0, %v2628_v41, %v2630_v42 }
  0x30   : > { %556 = vrot.lane.b32.xlu1 %v514_v48, %s4071_s23  ;;  %552 = vrot.lane.b32.xlu0 %v513_v49, %s4074_s26  ;;  %v4397_v48 = vsel %vm2591_vm0, %v2623_v44, %v2625_v45  ;;  %v2597_v49 = vrot.slane %v4139_v10, 2  ;;  %v4433_v4 = vsel %vm2591_vm0, %v2612_v2, %v2613_v32  ;;  %v4445_v24 = vsel %vm2591_vm0, %v2622_v21, %v2623_v44 }
  0x31   : > { %6722 = vst [vmem:[#allocation20_spill] sm:$0xff] %v4397_v48  ;;  %6728 = vst [vmem:[#allocation26_spill] sm:$0xff] %v4433_v4 }
  0x32   : > { %v4406_v52 = vsel %vm2591_vm0, %v2597_v49, %v2598_v1  ;;  %v2617_v1 = vrot.slane %v4151_v14, 2  ;;  %6730 = vst [vmem:[#allocation28_spill] sm:$0xff] %v4445_v24 }
  0x33   : > { %6723 = vst [vmem:[#allocation21_spill] sm:$0xff] %v4406_v52 }
  0x34   : > { %564 = vrot.lane.b32.xlu1 %v516_v53, %s4076_s28  ;;  %560 = vrot.lane.b32.xlu0 %v515_v56, %s4073_s25  ;;  %v4409_v53 = vsel %vm2591_vm0, %v2592_v50, %v2593_v3  ;;  %v2607_v56 = vrot.slane %v4145_v12, 2  ;;  %v4430_v3 = vsel %vm2591_vm0, %v2617_v1, %v2618_v30 }
  0x35   : > { %6724 = vst [vmem:[#allocation22_spill] sm:$0xff] %v4409_v53  ;;  %6727 = vst [vmem:[#allocation25_spill] sm:$0xff] %v4430_v3 }
  0x38   : > { %572 = vrot.lane.b32.xlu1 %v518_v60, %s4077_s29  ;;  %568 = vrot.lane.b32.xlu0 %v517_v61, %s4075_s27  ;;  %v4418_v60 = vsel %vm2591_vm0, %v2607_v56, %v2608_v15  ;;  %v4421_v61 = vsel %vm2591_vm0, %v2602_v57, %v2603_v23  ;;  %v2627_v15 = vrot.slane %v4161_v18, 2 }
  0x39   : > { %6725 = vst [vmem:[#allocation23_spill] sm:$0xff] %v4418_v60  ;;  %6726 = vst [vmem:[#allocation24_spill] sm:$0xff] %v4421_v61 }
  0x3a   : > { %v4442_v23 = vsel %vm2591_vm0, %v2627_v15, %v2628_v41 }
  0x3b   : > { %6729 = vst [vmem:[#allocation27_spill] sm:$0xff] %v4442_v23 }
  0x3c   : > { %616 = vrot.lane.b32.xlu1 %v4170_v22, %s4078_s30  ;;  %614 = vrot.lane.b32.xlu0 %v4136_v9, %s4078_s30 }
  0x40   : > { %620 = vrot.lane.b32.xlu1 %v4179_v27, %s4078_s30  ;;  %618 = vrot.lane.b32.xlu0 %v4139_v10, %s4078_s30 }
  0x44   : > { %624 = vrot.lane.b32.xlu1 %v4182_v28, %s4078_s30  ;;  %622 = vrot.lane.b32.xlu0 %v4142_v11, %s4078_s30 }
  0x48   : > { %628 = vrot.lane.b32.xlu1 %v4185_v29, %s4078_s30  ;;  %626 = vrot.lane.b32.xlu0 %v4145_v12, %s4078_s30 }
  0x4c   : > { %632 = vrot.lane.b32.xlu1 %v4212_v54, %s4078_s30  ;;  %630 = vrot.lane.b32.xlu0 %v4148_v13, %s4078_s30 }
  0x50   : > { %636 = vrot.lane.b32.xlu1 %v4220_v58, %s4078_s30  ;;  %634 = vrot.lane.b32.xlu0 %v4151_v14, %s4078_s30 }
  0x54   : > { %640 = vrot.lane.b32.xlu1 %v4215_v55, %s4078_s30  ;;  %638 = vrot.lane.b32.xlu0 %v4158_v17, %s4078_s30 }
  0x58   : > { %644 = vrot.lane.b32.xlu1 %v4223_v59, %s4078_s30  ;;  %642 = vrot.lane.b32.xlu0 %v4161_v18, %s4078_s30 }
  0x5c   : > { %1008 = vrot.lane.b32.xlu1 %v4170_v22, %s4079_s5  ;;  %1006 = vrot.lane.b32.xlu0 %v4136_v9, %s4079_s5 }
  0x60   : > { %1012 = vrot.lane.b32.xlu1 %v4179_v27, %s4079_s5  ;;  %1010 = vrot.lane.b32.xlu0 %v4139_v10, %s4079_s5 }
  0x64   : > { %1016 = vrot.lane.b32.xlu1 %v4182_v28, %s4079_s5  ;;  %1014 = vrot.lane.b32.xlu0 %v4142_v11, %s4079_s5 }
  0x68   : > { %3390 = vrot.lane.b32.xlu1 %v4340_v7, %s4079_s5  ;;  %3386 = vrot.lane.b32.xlu0 %v4347_v19, %s4079_s5 }
  0x6c   : > { %3398 = vrot.lane.b32.xlu1 %v4364_v34, %s4079_s5  ;;  %3394 = vrot.lane.b32.xlu0 %v4367_v35, %s4079_s5 }
  0x70   : > { %3406 = vrot.lane.b32.xlu1 %v4380_v39, %s4079_s5  ;;  %3402 = vrot.lane.b32.xlu0 %v4383_v40, %s4079_s5 }
  0x74   : > { %3414 = vrot.lane.b32.xlu1 %v4394_v46, %s4079_s5  ;;  %3410 = vrot.lane.b32.xlu0 %v4397_v48, %s4079_s5 }
  0x78   : > { %3388 = vrot.lane.b32.xlu1 %v4406_v52, %s4079_s5  ;;  %3384 = vrot.lane.b32.xlu0 %v4409_v53, %s4079_s5 }
  0x7c   : > { %3396 = vrot.lane.b32.xlu1 %v4418_v60, %s4079_s5  ;;  %3392 = vrot.lane.b32.xlu0 %v4421_v61, %s4079_s5 }
  0x80   : > { %3404 = vrot.lane.b32.xlu1 %v4430_v3, %s4079_s5  ;;  %3400 = vrot.lane.b32.xlu0 %v4433_v4, %s4079_s5 }
  0x84   : > { %3412 = vrot.lane.b32.xlu1 %v4442_v23, %s4079_s5  ;;  %3408 = vrot.lane.b32.xlu0 %v4445_v24, %s4079_s5 }
  0x88   : > { %2998 = vrot.lane.b32.xlu1 %v4340_v7, %s4078_s30  ;;  %2994 = vrot.lane.b32.xlu0 %v4347_v19, %s4078_s30 }
  0x92   : > { %v4455_v30 = vpop.permute.xlu1 %528  ;;  %v4457_v31 = vpop.permute.xlu0 %520 }
  0x93   : > { %6731 = vst [vmem:[#allocation29_spill] sm:$0xff] %v4455_v30  ;;  %6732 = vst [vmem:[#allocation30_spill] sm:$0xff] %v4457_v31 }
  0x96   : > { %v4459_v32 = vpop.permute.xlu1 %532  ;;  %v4461_v33 = vpop.permute.xlu0 %524 }
  0x97   : > { %6733 = vst [vmem:[#allocation31_spill] sm:$0xff] %v4459_v32  ;;  %6734 = vst [vmem:[#allocation32_spill] sm:$0xff] %v4461_v33 }
  0x9a   : > { %v4463_v41 = vpop.permute.xlu1 %540  ;;  %v4465_v42 = vpop.permute.xlu0 %536 }
  0x9b   : > { %6735 = vst [vmem:[#allocation33_spill] sm:$0xff] %v4463_v41  ;;  %6736 = vst [vmem:[#allocation34_spill] sm:$0xff] %v4465_v42 }
  0x9e   : > { %v4467_v44 = vpop.permute.xlu1 %548  ;;  %v4469_v45 = vpop.permute.xlu0 %544 }
  0x9f   : > { %6737 = vst [vmem:[#allocation35_spill] sm:$0xff] %v4467_v44  ;;  %6738 = vst [vmem:[#allocation36_spill] sm:$0xff] %v4469_v45 }
  0xa2   : > { %v4471_v49 = vpop.permute.xlu1 %556  ;;  %v4473_v50 = vpop.permute.xlu0 %552 }
  0xa3   : > { %6739 = vst [vmem:[#allocation37_spill] sm:$0xff] %v4471_v49  ;;  %6740 = vst [vmem:[#allocation38_spill] sm:$0xff] %v4473_v50 }
  0xa6   : > { %v4475_v56 = vpop.permute.xlu1 %564  ;;  %v4477_v57 = vpop.permute.xlu0 %560 }
  0xa7   : > { %6741 = vst [vmem:[#allocation39_spill] sm:$0xff] %v4475_v56  ;;  %6742 = vst [vmem:[#allocation40_spill] sm:$0xff] %v4477_v57 }
  0xaa   : > { %v4479_v1 = vpop.permute.xlu1 %572  ;;  %v4481_v2 = vpop.permute.xlu0 %568 }
  0xab   : > { %6743 = vst [vmem:[#allocation41_spill] sm:$0xff] %v4479_v1  ;;  %6744 = vst [vmem:[#allocation42_spill] sm:$0xff] %v4481_v2 }
  0xae   : > { %v4483_v15 = vpop.permute.xlu1 %616  ;;  %v615_v21 = vpop.permute.xlu0 %614 }
  0xb2   : > { %v4485_v43 = vpop.permute.xlu1 %620  ;;  %v619_v0 = vpop.permute.xlu0 %618 }
  0xb6   : > { %v4487_v41 = vpop.permute.xlu1 %624  ;;  %v623_v45 = vpop.permute.xlu0 %622 }
  0xb7   : > { %v798_v36 = vcombine.low %v4483_v15, %v4487_v41  ;;  %v662_v25 = vcombine.low %v615_v21, %v623_v45  ;;  %v663_v18 = vcombine.high %v615_v21, %v623_v45 }
  0xb9   : > { %v4506_v12 = vrot.slane %v798_v36, %v4133_v8  ;;  %v670_v9 = vrot.slane %v662_v25, %v4133_v8 }
  0xba   : > { %v4489_v42 = vpop.permute.xlu1 %628  ;;  %v627_v32 = vpop.permute.xlu0 %626 }
  0xbb   : > { %v678_v50 = vcombine.low %v619_v0, %v627_v32  ;;  %v814_v44 = vcombine.low %v4485_v43, %v4489_v42  ;;  %v679_v51 = vcombine.high %v619_v0, %v627_v32 }
  0xbd   : > { %v686_v47 = vrot.slane %v678_v50, %v4133_v8  ;;  %v4510_v10 = vrot.slane %v814_v44, %v4133_v8 }
  0xbe   : > { %v4491_v49 = vpop.permute.xlu1 %632  ;;  %v631_v56 = vpop.permute.xlu0 %630 }
  0xbf   : > { %v726_v50 = vcombine.low %v670_v9, %v686_v47  ;;  %v727_v36 = vcombine.high %v670_v9, %v686_v47 }
  0xc1   : > { %v741_v47 = vrot.slane %v727_v36, %v4165_v20 }
  0xc2   : > { %v4493_v57 = vpop.permute.xlu1 %636  ;;  %v635_v1 = vpop.permute.xlu0 %634 }
  0xc6   : > { %v4495_v2 = vpop.permute.xlu1 %640  ;;  %v639_v30 = vpop.permute.xlu0 %638 }
  0xc7   : > { %v830_v33 = vcombine.low %v4491_v49, %v4495_v2  ;;  %v694_v31 = vcombine.low %v631_v56, %v639_v30  ;;  %v695_v19 = vcombine.high %v631_v56, %v639_v30  ;;  %v693_v30 = vrot.slane %v679_v51, %v4133_v8 }
  0xc9   : > { %v4513_v0 = vrot.slane %v830_v33, %v4133_v8  ;;  %v702_v56 = vrot.slane %v694_v31, %v4133_v8  ;;  %v709_v25 = vrot.slane %v695_v19, %v4133_v8  ;;  %v677_v33 = vrot.slane %v663_v18, %v4133_v8 }
  0xca   : > { %v645_v7 = vpop.permute.xlu1 %644  ;;  %v643_v17 = vpop.permute.xlu0 %642  ;;  %v4535_v31 = vrot.slane %v726_v50, %v4165_v20 }
  0xcb   : > { %v846_v13 = vcombine.low %v4493_v57, %v645_v7  ;;  %v710_v14 = vcombine.low %v635_v1, %v643_v17  ;;  %v711_v11 = vcombine.high %v635_v1, %v643_v17  ;;  %v742_v9 = vcombine.low %v677_v33, %v693_v30 }
  0xcc   : > { %6747 = vst [vmem:[#allocation45_spill] sm:$0xff] %v4535_v31 }
  0xcd   : > { %v4517_v32 = vrot.slane %v846_v13, %v4133_v8  ;;  %v718_v45 = vrot.slane %v710_v14, %v4133_v8  ;;  %v725_v17 = vrot.slane %v711_v11, %v4133_v8  ;;  %v862_v11 = vcombine.low %v4506_v12, %v4510_v10 }
  0xce   : > { %v4523_v44 = vpop.permute.xlu1 %1008  ;;  %v4525_v1 = vpop.permute.xlu0 %1006  ;;  %v750_v50 = vrot.slane %v742_v9, %v4165_v20  ;;  %v799_v9 = vcombine.high %v4483_v15, %v4487_v41 }
  0xcf   : > { %6745 = vst [vmem:[#allocation43_spill] sm:$0xff] %v4523_v44  ;;  %6746 = vst [vmem:[#allocation44_spill] sm:$0xff] %v4525_v1  ;;  %v894_v13 = vcombine.low %v4513_v0, %v4517_v32  ;;  %v758_v51 = vcombine.low %v702_v56, %v718_v45  ;;  %v759_v21 = vcombine.high %v702_v56, %v718_v45 }
  0xd0   : > { %v774_v14 = vcombine.low %v709_v25, %v725_v17  ;;  %v775_v45 = vcombine.high %v709_v25, %v725_v17  ;;  %v895_v41 = vcombine.high %v4513_v0, %v4517_v32 }
  0xd1   : > { %v773_v19 = vrot.slane %v759_v21, %v4165_v20  ;;  %v4538_v1 = vrot.slane %v758_v51, %v4165_v20  ;;  %v4548_v36 = vrot.slane %v894_v13, %v4165_v20  ;;  %v743_v21 = vcombine.high %v677_v33, %v693_v30 }
  0xd2   : > { %v4540_v18 = vpop.permute.xlu1 %1012  ;;  %v4542_v44 = vpop.permute.xlu0 %1010  ;;  %v782_v55 = vrot.slane %v774_v14, %v4165_v20  ;;  %v4554_v51 = vrot.slane %v862_v11, %v4165_v20  ;;  %v831_v13 = vcombine.high %v4491_v49, %v4495_v2  ;;  %v847_v30 = vcombine.high %v4493_v57, %v645_v7 }
  0xd3   : > { %6748 = vst [vmem:[#allocation46_spill] sm:$0xff] %v4538_v1  ;;  %6749 = vst [vmem:[#allocation47_spill] sm:$0xff] %v4540_v18  ;;  %v792_v56 = vcombine.low %v741_v47, %v773_v19  ;;  %v791_v38 = vcombine.high %v4535_v31, %v4538_v1  ;;  %v757_v49 = vrot.slane %v743_v21, %v4165_v20 }
  0xd4   : > { %6750 = vst [vmem:[#allocation48_spill] sm:$0xff] %v4542_v44  ;;  %6751 = vst [vmem:[#allocation49_spill] sm:$0xff] %v4548_v36  ;;  %v794_v33 = vcombine.low %v750_v50, %v782_v55  ;;  %v815_v44 = vcombine.high %v4485_v43, %v4489_v42  ;;  %v845_v2 = vrot.slane %v831_v13, %v4133_v8 }
  0xd5   : > { %939 = vrot.lane.b32.xlu1 %v792_v56, %s4074_s26  ;;  %935 = vrot.lane.b32.xlu0 %v791_v38, %s4072_s24  ;;  %6752 = vst [vmem:[#allocation50_spill] sm:$0xff] %v4554_v51  ;;  %v793_v56 = vcombine.high %v741_v47, %v773_v19  ;;  %v789_v38 = vrot.slane %v775_v45, %v4165_v20 }
  0xd6   : > { %v4556_v17 = vpop.permute.xlu1 %1016  ;;  %v4558_v25 = vpop.permute.xlu0 %1014  ;;  %v861_v47 = vrot.slane %v847_v30, %v4133_v8  ;;  %v795_v19 = vcombine.high %v750_v50, %v782_v55  ;;  %v813_v43 = vrot.slane %v799_v9, %v4133_v8  ;;  %v829_v42 = vrot.slane %v815_v44, %v4133_v8 }
  0xd7   : > { %6753 = vst [vmem:[#allocation51_spill] sm:$0xff] %v4556_v17  ;;  %6754 = vst [vmem:[#allocation52_spill] sm:$0xff] %v4558_v25  ;;  %v796_v15 = vcombine.low %v757_v49, %v789_v38  ;;  %v863_v45 = vcombine.high %v4506_v12, %v4510_v10  ;;  %v927_v0 = vcombine.high %v4554_v51, %v4548_v36  ;;  %v1423_v17 = vrot.slane %v4185_v29, 1 }
  0xd8   : > { %v910_v30 = vcombine.low %v845_v2, %v861_v47  ;;  %v797_v55 = vcombine.high %v757_v49, %v789_v38  ;;  %v909_v32 = vrot.slane %v895_v41, %v4165_v20  ;;  %v878_v50 = vcombine.low %v813_v43, %v829_v42 }
  0xd9   : > { %947 = vrot.lane.b32.xlu1 %v794_v33, %s4073_s25  ;;  %943 = vrot.lane.b32.xlu0 %v793_v56, %s4071_s23  ;;  %v877_v10 = vrot.slane %v863_v45, %v4165_v20  ;;  %v911_v33 = vcombine.high %v845_v2, %v861_v47  ;;  %v879_v41 = vcombine.high %v813_v43, %v829_v42 }
  0xda   : > { %v4575_v7 = vpop.permute.xlu1 %3390  ;;  %v4577_v57 = vpop.permute.xlu0 %3386  ;;  %v918_v56 = vrot.slane %v910_v30, %v4165_v20 }
  0xdb   : > { %v929_v9 = vcombine.high %v877_v10, %v909_v32  ;;  %v925_v47 = vrot.slane %v911_v33, %v4165_v20  ;;  %v893_v33 = vrot.slane %v879_v41, %v4165_v20 }
  0xdd   : > { %955 = vrot.lane.b32.xlu1 %v796_v15, %s4075_s27  ;;  %951 = vrot.lane.b32.xlu0 %v795_v19, %s4076_s28  ;;  %v928_v15 = vcombine.low %v877_v10, %v909_v32  ;;  %v886_v19 = vrot.slane %v878_v50, %v4165_v20 }
  0xde   : > { %v4589_v21 = vpop.permute.xlu1 %3398  ;;  %v4591_v13 = vpop.permute.xlu0 %3394 }
  0xdf   : > { %v3584_v38 = vcombine.low %v4575_v7, %v4589_v21  ;;  %v3568_v49 = vcombine.low %v4577_v57, %v4591_v13  ;;  %v930_v43 = vcombine.low %v886_v19, %v918_v56 }
  0xe1   : > { %963 = vrot.lane.b32.xlu1 %v927_v0, %s4072_s24  ;;  %959 = vrot.lane.b32.xlu0 %v797_v55, %s4077_s29  ;;  %v931_v55 = vcombine.high %v886_v19, %v918_v56  ;;  %v4621_v42 = vrot.slane %v3584_v38, %v4133_v8  ;;  %v4624_v32 = vrot.slane %v3568_v49, %v4133_v8 }
  0xe2   : > { %v4599_v12 = vpop.permute.xlu1 %3406  ;;  %v4601_v44 = vpop.permute.xlu0 %3402  ;;  %v932_v38 = vcombine.low %v893_v33, %v925_v47 }
  0xe3   : > { %v3632_v49 = vcombine.low %v4624_v32, %v4621_v42 }
  0xe5   : > { %971 = vrot.lane.b32.xlu1 %v929_v9, %s4071_s23  ;;  %967 = vrot.lane.b32.xlu0 %v928_v15, %s4074_s26  ;;  %v933_v15 = vcombine.high %v893_v33, %v925_v47 }
  0xe6   : > { %v4611_v45 = vpop.permute.xlu1 %3414  ;;  %v4613_v2 = vpop.permute.xlu0 %3410 }
  0xe7   : > { %v3616_v30 = vcombine.low %v4599_v12, %v4611_v45  ;;  %v3600_v0 = vcombine.low %v4601_v44, %v4613_v2 }
  0xe9   : > { %v4627_v50 = vrot.slane %v3616_v30, %v4133_v8  ;;  %v4630_v10 = vrot.slane %v3600_v0, %v4133_v8  ;;  %979 = vrot.lane.b32.xlu1 %v931_v55, %s4076_s28  ;;  %975 = vrot.lane.b32.xlu0 %v930_v43, %s4073_s25  ;;  %v4654_v55 = vrot.slane %v3632_v49, %v4165_v20 }
  0xea   : > { %v4635_v9 = vpop.permute.xlu1 %3388  ;;  %v4637_v56 = vpop.permute.xlu0 %3384 }
  0xeb   : > { %6755 = vst [vmem:[#allocation53_spill] sm:$0xff] %v4635_v9  ;;  %6756 = vst [vmem:[#allocation54_spill] sm:$0xff] %v4637_v56  ;;  %v3664_v19 = vcombine.low %v4630_v10, %v4627_v50 }
  0xec   : > { %6759 = vst [vmem:[#allocation57_spill] sm:$0xff] %v4654_v55 }
  0xed   : > { %987 = vrot.lane.b32.xlu1 %v933_v15, %s4077_s29  ;;  %983 = vrot.lane.b32.xlu0 %v932_v38, %s4075_s27  ;;  %v4657_v43 = vrot.slane %v3664_v19, %v4165_v20 }
  0xee   : > { %v4645_v30 = vpop.permute.xlu1 %3396  ;;  %v4647_v0 = vpop.permute.xlu0 %3392 }
  0xef   : > { %6757 = vst [vmem:[#allocation55_spill] sm:$0xff] %v4645_v30  ;;  %6758 = vst [vmem:[#allocation56_spill] sm:$0xff] %v4647_v0  ;;  %v3448_v41 = vcombine.low %v4635_v9, %v4645_v30  ;;  %v3432_v47 = vcombine.low %v4637_v56, %v4647_v0 }
  0xf0   : > { %6760 = vst [vmem:[#allocation58_spill] sm:$0xff] %v4657_v43 }
  0xf1   : > { %3006 = vrot.lane.b32.xlu1 %v4364_v34, %s4078_s30  ;;  %3002 = vrot.lane.b32.xlu0 %v4367_v35, %s4078_s30  ;;  %v4668_v38 = vrot.slane %v3448_v41, %v4133_v8  ;;  %v4671_v11 = vrot.slane %v3432_v47, %v4133_v8 }
  0xf2   : > { %v4663_v33 = vpop.permute.xlu1 %3404  ;;  %v4665_v15 = vpop.permute.xlu0 %3400 }
  0xf3   : > { %6761 = vst [vmem:[#allocation59_spill] sm:$0xff] %v4663_v33  ;;  %6762 = vst [vmem:[#allocation60_spill] sm:$0xff] %v4665_v15  ;;  %v3496_v36 = vcombine.low %v4671_v11, %v4668_v38 }
  0xf5   : > { %3014 = vrot.lane.b32.xlu1 %v4380_v39, %s4078_s30  ;;  %3010 = vrot.lane.b32.xlu0 %v4383_v40, %s4078_s30  ;;  %v4702_v31 = vrot.slane %v3496_v36, %v4165_v20  ;;  %v1415_v36 = vrot.slane %v4316_v62, 1  ;;  %v1425_v62 = vrot.slane %v4330_v5, 1  ;;  %v1430_v5 = vrot.slane %v4353_v26, 1 }
  0xf6   : > { %v4679_v19 = vpop.permute.xlu1 %3412  ;;  %v4681_v14 = vpop.permute.xlu0 %3408 }
  0xf7   : > { %6763 = vst [vmem:[#allocation61_spill] sm:$0xff] %v4679_v19  ;;  %6764 = vst [vmem:[#allocation62_spill] sm:$0xff] %v4681_v14  ;;  %v3480_v41 = vcombine.low %v4663_v33, %v4679_v19  ;;  %v3464_v47 = vcombine.low %v4665_v15, %v4681_v14  ;;  %v6774_v15 = vld [vmem:[#allocation18_spill] sm:$0xff]  ;;  %v6778_v19 = vld [vmem:[#allocation3_spill] sm:$0xff] }
  0xf8   : > { %6765 = vst [vmem:[#allocation63_spill] sm:$0xff] %v4702_v31  ;;  %v1440_v26 = vrot.slane %v6774_v15, 1 }
  0xf9   : > { %v4690_v49 = vrot.slane %v3480_v41, %v4133_v8  ;;  %v4693_v51 = vrot.slane %v3464_v47, %v4133_v8  ;;  %3022 = vrot.lane.b32.xlu1 %v4394_v46, %s4078_s30  ;;  %3018 = vrot.lane.b32.xlu0 %v4397_v48, %s4078_s30  ;;  %v1408_v47 = vrot.slane %v4170_v22, 1  ;;  %v1410_v41 = vrot.slane %v4319_v63, 1 }
  0xfa   : > { %v1418_v22 = vrot.slane %v4182_v28, 1  ;;  %v1420_v63 = vrot.slane %v4333_v6, 1  ;;  %v1428_v28 = vrot.slane %v4212_v54, 1 }
  0xfb   : > { %v3528_v1 = vcombine.low %v4693_v51, %v4690_v49 }
  0xfd   : > { %v4705_v25 = vrot.slane %v3528_v1, %v4165_v20  ;;  %2996 = vrot.lane.b32.xlu1 %v4406_v52, %s4078_s30  ;;  %2992 = vrot.lane.b32.xlu0 %v4409_v53, %s4078_s30  ;;  %v1413_v1 = vrot.slane %v4179_v27, 1  ;;  %v4734_v27 = vsel %vm1406_vm1, %v1408_v47, %v1410_v41  ;;  %v4749_v41 = vsel %vm1406_vm1, %v1418_v22, %v1420_v63 }
  0xfe   : > { %6768 = vst [vmem:[#allocation66_spill] sm:$0xff] %v4734_v27  ;;  %6770 = vst [vmem:[#allocation68_spill] sm:$0xff] %v4749_v41  ;;  %v1445_v63 = vrot.slane %v4370_v37, 1  ;;  %v1407_v37 = vrot.slane %v6778_v19, 1 }
  0xff   : > { %6766 = vst [vmem:[#allocation64_spill] sm:$0xff] %v4705_v25  ;;  %v4730_v18 = vsel %vm1406_vm1, %v1413_v1, %v1415_v36  ;;  %v1433_v36 = vrot.slane %v4220_v58, 1 }
 0x100   : > { %6767 = vst [vmem:[#allocation65_spill] sm:$0xff] %v4730_v18  ;;  %v4787_v56 = vsel %vm1406_vm1, %v1407_v37, %v1408_v47  ;;  %v6786_v47 = vld [vmem:[#allocation7_spill] sm:$0xff] }
 0x101   : > { %3004 = vrot.lane.b32.xlu1 %v4418_v60, %s4078_s30  ;;  %3000 = vrot.lane.b32.xlu0 %v4421_v61, %s4078_s30  ;;  %6780 = vst [vmem:[#allocation3_spill] sm:$0xff] %v4787_v56  ;;  %v1427_v37 = vrot.slane %v6786_v47, 1 }
 0x103   : > { %v4811_v30 = vsel %vm1406_vm1, %v1427_v37, %v1428_v28 }
 0x104   : > { %6788 = vst [vmem:[#allocation7_spill] sm:$0xff] %v4811_v30 }
 0x105   : > { %3012 = vrot.lane.b32.xlu1 %v4430_v3, %s4078_s30  ;;  %3008 = vrot.lane.b32.xlu0 %v4433_v4, %s4078_s30  ;;  %v1435_v4 = vrot.slane %v4344_v16, 1  ;;  %v1443_v16 = vrot.slane %v4223_v59, 1  ;;  %v6773_v3 = vld [vmem:[#allocation13_spill] sm:$0xff] }
 0x107   : > { %v4758_v6 = vsel %vm1406_vm1, %v1433_v36, %v1435_v4  ;;  %v4772_v4 = vsel %vm1406_vm1, %v1443_v16, %v1445_v63  ;;  %v6781_v63 = vld [vmem:[#allocation6_spill] sm:$0xff] }
 0x108   : > { %6771 = vst [vmem:[#allocation69_spill] sm:$0xff] %v4758_v6  ;;  %6775 = vst [vmem:[#allocation13_spill] sm:$0xff] %v4772_v4  ;;  %v1422_v0 = vrot.slane %v6781_v63, 1 }
 0x109   : > { %3020 = vrot.lane.b32.xlu1 %v4442_v23, %s4078_s30  ;;  %3016 = vrot.lane.b32.xlu0 %v4445_v24, %s4078_s30  ;;  %v4746_v24 = vsel %vm1406_vm1, %v1423_v17, %v1425_v62  ;;  %v4762_v62 = vsel %vm1406_vm1, %v1428_v28, %v1430_v5  ;;  %v1438_v23 = vrot.slane %v6773_v3, 1  ;;  %v6777_v5 = vld [vmem:[#allocation4_spill] sm:$0xff] }
 0x10a   : > { %6769 = vst [vmem:[#allocation67_spill] sm:$0xff] %v4746_v24  ;;  %6772 = vst [vmem:[#allocation70_spill] sm:$0xff] %v4762_v62  ;;  %v1412_v33 = vrot.slane %v6777_v5, 1  ;;  %v4796_v19 = vsel %vm1406_vm1, %v1422_v0, %v1423_v17  ;;  %v6789_v17 = vld [vmem:[#allocation10_spill] sm:$0xff] }
 0x10b   : > { %v4775_v14 = vsel %vm1406_vm1, %v1438_v23, %v1440_v26  ;;  %v6782_v26 = vld [vmem:[#allocation5_spill] sm:$0xff]  ;;  %6783 = vst [vmem:[#allocation6_spill] sm:$0xff] %v4796_v19  ;;  %v1442_v0 = vrot.slane %v6789_v17, 1 }
 0x10c   : > { %6776 = vst [vmem:[#allocation18_spill] sm:$0xff] %v4775_v14  ;;  %v4784_v15 = vsel %vm1406_vm1, %v1412_v33, %v1413_v1  ;;  %v1417_v9 = vrot.slane %v6782_v26, 1  ;;  %v6785_v33 = vld [vmem:[#allocation8_spill] sm:$0xff] }
 0x10d   : > { %2205 = vrot.lane.b32.xlu1 %v4730_v18, %s4079_s5  ;;  %2201 = vrot.lane.b32.xlu0 %v4734_v27, %s4079_s5  ;;  %6779 = vst [vmem:[#allocation4_spill] sm:$0xff] %v4784_v15  ;;  %v1432_v1 = vrot.slane %v6785_v33, 1  ;;  %v4820_v40 = vsel %vm1406_vm1, %v1442_v0, %v1443_v16 }
 0x10e   : > { %v4799_v5 = vsel %vm1406_vm1, %v1417_v9, %v1418_v22  ;;  %v6790_v9 = vld [vmem:[#allocation9_spill] sm:$0xff]  ;;  %6791 = vst [vmem:[#allocation10_spill] sm:$0xff] %v4820_v40 }
 0x10f   : > { %6784 = vst [vmem:[#allocation5_spill] sm:$0xff] %v4799_v5  ;;  %v4808_v26 = vsel %vm1406_vm1, %v1432_v1, %v1433_v36  ;;  %v1437_v22 = vrot.slane %v6790_v9, 1  ;;  %v4855_v36 = vpop.permute.xlu0 %2994 }
 0x110   : > { %6787 = vst [vmem:[#allocation8_spill] sm:$0xff] %v4808_v26 }
 0x111   : > { %2213 = vrot.lane.b32.xlu1 %v4746_v24, %s4079_s5  ;;  %2209 = vrot.lane.b32.xlu0 %v4749_v41, %s4079_s5  ;;  %v4823_v48 = vsel %vm1406_vm1, %v1437_v22, %v1438_v23  ;;  %v4853_v23 = vpop.permute.xlu1 %2998 }
 0x112   : > { %6792 = vst [vmem:[#allocation9_spill] sm:$0xff] %v4823_v48 }
 0x115   : > { %2221 = vrot.lane.b32.xlu1 %v4758_v6, %s4079_s5  ;;  %2217 = vrot.lane.b32.xlu0 %v4762_v62, %s4079_s5 }
 0x119   : > { %2229 = vrot.lane.b32.xlu1 %v4772_v4, %s4079_s5  ;;  %2225 = vrot.lane.b32.xlu0 %v4775_v14, %s4079_s5 }
 0x11d   : > { %2203 = vrot.lane.b32.xlu1 %v4784_v15, %s4079_s5  ;;  %2199 = vrot.lane.b32.xlu0 %v4787_v56, %s4079_s5 }
 0x121   : > { %2211 = vrot.lane.b32.xlu1 %v4796_v19, %s4079_s5  ;;  %2207 = vrot.lane.b32.xlu0 %v4799_v5, %s4079_s5 }
 0x125   : > { %2219 = vrot.lane.b32.xlu1 %v4808_v26, %s4079_s5  ;;  %2215 = vrot.lane.b32.xlu0 %v4811_v30, %s4079_s5 }
 0x129   : > { %2227 = vrot.lane.b32.xlu1 %v4820_v40, %s4079_s5  ;;  %2223 = vrot.lane.b32.xlu0 %v4823_v48, %s4079_s5 }
 0x12d   : > { %1813 = vrot.lane.b32.xlu1 %v4730_v18, %s4078_s30  ;;  %1809 = vrot.lane.b32.xlu0 %v4734_v27, %s4078_s30  ;;  %v6821_v27 = vld [vmem:[#allocation62_spill] sm:$0xff] }
 0x131   : > { %1821 = vrot.lane.b32.xlu1 %v4746_v24, %s4078_s30  ;;  %1817 = vrot.lane.b32.xlu0 %v4749_v41, %s4078_s30  ;;  %v6822_v41 = vld [vmem:[#allocation60_spill] sm:$0xff] }
 0x132   : > { %v3465_v18 = vcombine.high %v6822_v41, %v6821_v27  ;;  %v6825_v24 = vld [vmem:[#allocation28_spill] sm:$0xff] }
 0x135   : > { %1829 = vrot.lane.b32.xlu1 %v4758_v6, %s4078_s30  ;;  %1825 = vrot.lane.b32.xlu0 %v4762_v62, %s4078_s30  ;;  %v6818_v62 = vld [vmem:[#allocation54_spill] sm:$0xff]  ;;  %v6820_v6 = vld [vmem:[#allocation59_spill] sm:$0xff] }
 0x139   : > { %1837 = vrot.lane.b32.xlu1 %v4772_v4, %s4078_s30  ;;  %1833 = vrot.lane.b32.xlu0 %v4775_v14, %s4078_s30 }
 0x13d   : > { %1811 = vrot.lane.b32.xlu1 %v4784_v15, %s4078_s30  ;;  %1807 = vrot.lane.b32.xlu0 %v4787_v56, %s4078_s30 }
 0x141   : > { %1819 = vrot.lane.b32.xlu1 %v4796_v19, %s4078_s30  ;;  %1815 = vrot.lane.b32.xlu0 %v4799_v5, %s4078_s30  ;;  %v6816_v5 = vld [vmem:[#allocation53_spill] sm:$0xff]  ;;  %v6817_v19 = vld [vmem:[#allocation56_spill] sm:$0xff] }
 0x142   : > { %v3433_v14 = vcombine.high %v6818_v62, %v6817_v19  ;;  %v6824_v62 = vld [vmem:[#allocation25_spill] sm:$0xff] }
 0x145   : > { %1827 = vrot.lane.b32.xlu1 %v4808_v26, %s4078_s30  ;;  %1823 = vrot.lane.b32.xlu0 %v4811_v30, %s4078_s30  ;;  %v6813_v26 = vld [vmem:[#allocation20_spill] sm:$0xff] }
 0x147   : > { %v4861_v28 = vpop.permute.xlu1 %939  ;;  %v4863_v16 = vpop.permute.xlu0 %935 }
 0x148   : > { %6793 = vst [vmem:[#allocation71_spill] sm:$0xff] %v4861_v28  ;;  %6794 = vst [vmem:[#allocation72_spill] sm:$0xff] %v4863_v16 }
 0x149   : > { %1835 = vrot.lane.b32.xlu1 %v4820_v40, %s4078_s30  ;;  %1831 = vrot.lane.b32.xlu0 %v4823_v48, %s4078_s30  ;;  %v6814_v40 = vld [vmem:[#allocation19_spill] sm:$0xff] }
 0x14a   : > { %v2816_v56 = vcombine.low %v6814_v40, %v6813_v26 }
 0x14b   : > { %v4869_v1 = vpop.permute.xlu1 %947  ;;  %v4871_v37 = vpop.permute.xlu0 %943 }
 0x14c   : > { %6795 = vst [vmem:[#allocation73_spill] sm:$0xff] %v4869_v1  ;;  %6796 = vst [vmem:[#allocation74_spill] sm:$0xff] %v4871_v37 }
 0x14d   : > { %1024 = vrot.lane.b32.xlu1 %v4212_v54, %s4079_s5  ;;  %1020 = vrot.lane.b32.xlu0 %v4185_v29, %s4079_s5 }
 0x14f   : > { %v4877_v0 = vpop.permute.xlu1 %955  ;;  %v4879_v22 = vpop.permute.xlu0 %951 }
 0x150   : > { %6797 = vst [vmem:[#allocation75_spill] sm:$0xff] %v4877_v0  ;;  %6798 = vst [vmem:[#allocation76_spill] sm:$0xff] %v4879_v22 }
 0x151   : > { %1032 = vrot.lane.b32.xlu1 %v6773_v3, %s4079_s5  ;;  %1028 = vrot.lane.b32.xlu0 %v4220_v58, %s4079_s5  ;;  %v3633_v58 = vcombine.high %v4624_v32, %v4621_v42  ;;  %v3665_v3 = vcombine.high %v4630_v10, %v4627_v50  ;;  %v3497_v42 = vcombine.high %v4671_v11, %v4668_v38 }
 0x152   : > { %v3529_v32 = vcombine.high %v4693_v51, %v4690_v49 }
 0x153   : > { %v4885_v28 = vpop.permute.xlu1 %963  ;;  %v4887_v1 = vpop.permute.xlu0 %959  ;;  %v4940_v38 = vrot.slane %v3497_v42, %v4165_v20 }
 0x154   : > { %6799 = vst [vmem:[#allocation77_spill] sm:$0xff] %v4885_v28  ;;  %6800 = vst [vmem:[#allocation78_spill] sm:$0xff] %v4887_v1  ;;  %v4943_v49 = vrot.slane %v3529_v32, %v4165_v20  ;;  %v3601_v28 = vcombine.high %v4601_v44, %v4613_v2 }
 0x155   : > { %1018 = vrot.lane.b32.xlu1 %v6781_v63, %s4079_s5  ;;  %1036 = vrot.lane.b32.xlu0 %v4223_v59, %s4079_s5  ;;  %v4914_v59 = vrot.slane %v3633_v58, %v4165_v20 }
 0x156   : > { %v3562_v0 = vcombine.low %v4940_v38, %v4943_v49 }
 0x157   : > { %v4893_v29 = vpop.permute.xlu1 %971  ;;  %v4895_v54 = vpop.permute.xlu0 %967 }
 0x158   : > { %6801 = vst [vmem:[#allocation79_spill] sm:$0xff] %v4893_v29  ;;  %6802 = vst [vmem:[#allocation80_spill] sm:$0xff] %v4895_v54  ;;  %v3617_v54 = vcombine.high %v4599_v12, %v4611_v45 }
 0x159   : > { %1026 = vrot.lane.b32.xlu1 %v6785_v33, %s4079_s5  ;;  %1022 = vrot.lane.b32.xlu0 %v6786_v47, %s4079_s5  ;;  %v4917_v33 = vrot.slane %v3665_v3, %v4165_v20  ;;  %v3697_v47 = vcombine.high %v4654_v55, %v4657_v43 }
 0x15a   : > { %v5002_v2 = vrot.slane %v3617_v54, %v4133_v8  ;;  %v2664_v54 = vcombine.low %v4406_v52, %v4418_v60 }
 0x15b   : > { %v4905_v63 = vpop.permute.xlu1 %979  ;;  %v4907_v1 = vpop.permute.xlu0 %975  ;;  %v3698_v51 = vcombine.low %v4914_v59, %v4917_v33  ;;  %v3699_v48 = vcombine.high %v4914_v59, %v4917_v33 }
 0x15c   : > { %6803 = vst [vmem:[#allocation81_spill] sm:$0xff] %v4905_v63  ;;  %6804 = vst [vmem:[#allocation82_spill] sm:$0xff] %v4907_v1  ;;  %v3585_v63 = vcombine.high %v4575_v7, %v4589_v21  ;;  %v6808_v7 = vld [vmem:[#allocation16_spill] sm:$0xff] }
 0x15d   : > { %1034 = vrot.lane.b32.xlu1 %v6789_v17, %s4079_s5  ;;  %1030 = vrot.lane.b32.xlu0 %v6790_v9, %s4079_s5  ;;  %v3561_v17 = vcombine.high %v4702_v31, %v4705_v25  ;;  %v2800_v21 = vcombine.low %v6808_v7, %v4364_v34  ;;  %v5005_v31 = vrot.slane %v3601_v28, %v4133_v8 }
 0x15e   : > { %v2648_v28 = vcombine.low %v4409_v53, %v4421_v61 }
 0x15f   : > { %v4923_v50 = vpop.permute.xlu1 %987  ;;  %v4925_v10 = vpop.permute.xlu0 %983 }
 0x160   : > { %6805 = vst [vmem:[#allocation83_spill] sm:$0xff] %v4923_v50  ;;  %6806 = vst [vmem:[#allocation84_spill] sm:$0xff] %v4925_v10 }
 0x161   : > { %3733 = vrot.lane.b32.xlu0 %v3697_v47, %s4072_s24  ;;  %3705 = vrot.lane.b32.xlu1 %v3561_v17, %s4072_s24 }
 0x163   : > { %v4933_v9 = vpop.permute.xlu1 %3006  ;;  %v4935_v11 = vpop.permute.xlu0 %3002 }
 0x164   : > { %v3192_v58 = vcombine.low %v4853_v23, %v4933_v9  ;;  %v3176_v3 = vcombine.low %v4855_v36, %v4935_v11 }
 0x165   : > { %3737 = vrot.lane.b32.xlu0 %v3698_v51, %s4074_s26 }
 0x166   : > { %v3200_v42 = vrot.slane %v3192_v58, %v4133_v8  ;;  %v3184_v32 = vrot.slane %v3176_v3, %v4133_v8 }
 0x167   : > { %v4950_v47 = vpop.permute.xlu1 %3014  ;;  %v4952_v17 = vpop.permute.xlu0 %3010 }
 0x168   : > { %v3240_v1 = vcombine.low %v3184_v32, %v3200_v42  ;;  %v3241_v55 = vcombine.high %v3184_v32, %v3200_v42  ;;  %v3680_v42 = vcombine.low %v5005_v31, %v5002_v2  ;;  %v6815_v32 = vld [vmem:[#allocation55_spill] sm:$0xff] }
 0x169   : > { %3709 = vrot.lane.b32.xlu0 %v3562_v0, %s4074_s26  ;;  %v3569_v0 = vcombine.high %v4577_v57, %v4591_v13  ;;  %v6809_v57 = vld [vmem:[#allocation17_spill] sm:$0xff]  ;;  %v3449_v15 = vcombine.high %v6816_v5, %v6815_v32  ;;  %v5055_v5 = vrot.slane %v2648_v28, %v4133_v8  ;;  %v6823_v32 = vld [vmem:[#allocation27_spill] sm:$0xff] }
 0x16a   : > { %v2784_v13 = vcombine.low %v6809_v57, %v4367_v35  ;;  %v4999_v44 = vrot.slane %v3240_v1, %v4165_v20  ;;  %v2832_v1 = vcombine.low %v4380_v39, %v4394_v46  ;;  %v2696_v19 = vcombine.low %v6824_v62, %v6823_v32 }
 0x16b   : > { %v4959_v51 = vpop.permute.xlu1 %3022  ;;  %v4961_v50 = vpop.permute.xlu0 %3018  ;;  %v5075_v28 = vrot.slane %v3449_v15, %v4133_v8 }
 0x16c   : > { %v3224_v10 = vcombine.low %v4950_v47, %v4959_v51  ;;  %v3208_v22 = vcombine.low %v4952_v17, %v4961_v50  ;;  %6812 = vst [vmem:[#allocation86_spill] sm:$0xff] %v4999_v44  ;;  %v5104_v32 = vrot.slane %v2832_v1, %v4133_v8 }
 0x16d   : > { %6827 = vst [vmem:[#allocation20_spill] sm:$0xff] %v5075_v28 }
 0x16e   : > { %v3232_v58 = vrot.slane %v3224_v10, %v4133_v8  ;;  %v3216_v3 = vrot.slane %v3208_v22, %v4133_v8  ;;  %v4986_v22 = vrot.slane %v3585_v63, %v4133_v8  ;;  %v4989_v10 = vrot.slane %v3569_v0, %v4133_v8 }
 0x16f   : > { %v4973_v29 = vpop.permute.xlu1 %2996  ;;  %v4975_v37 = vpop.permute.xlu0 %2992  ;;  %v5008_v63 = vrot.slane %v2800_v21, %v4133_v8  ;;  %v5011_v0 = vrot.slane %v2784_v13, %v4133_v8 }
 0x170   : > { %6807 = vst [vmem:[#allocation85_spill] sm:$0xff] %v4975_v37  ;;  %v3272_v16 = vcombine.low %v3216_v3, %v3232_v58  ;;  %v3648_v21 = vcombine.low %v4989_v10, %v4986_v22 }
 0x172   : > { %v4992_v25 = vrot.slane %v3272_v16, %v4165_v20  ;;  %v3273_v16 = vcombine.high %v3216_v3, %v3232_v58 }
 0x173   : > { %v4994_v12 = vpop.permute.xlu1 %3004  ;;  %v4996_v45 = vpop.permute.xlu0 %3000 }
 0x174   : > { %6810 = vst [vmem:[#allocation16_spill] sm:$0xff] %v4992_v25  ;;  %6811 = vst [vmem:[#allocation17_spill] sm:$0xff] %v4996_v45  ;;  %v3305_v43 = vcombine.high %v4999_v44, %v4992_v25  ;;  %v3056_v13 = vcombine.low %v4973_v29, %v4994_v12  ;;  %v3040_v58 = vcombine.low %v4975_v37, %v4996_v45 }
 0x175   : > { %v5049_v25 = vrot.slane %v3273_v16, %v4165_v20  ;;  %v5052_v44 = vrot.slane %v2664_v54, %v4133_v8  ;;  %v5069_v16 = vrot.slane %v3241_v55, %v4165_v20  ;;  %v5072_v54 = vrot.slane %v3648_v21, %v4165_v20 }
 0x176   : > { %3341 = vrot.lane.b32.xlu1 %v3305_v43, %s4072_s24  ;;  %v6819_v43 = vld [vmem:[#allocation61_spill] sm:$0xff]  ;;  %v3064_v27 = vrot.slane %v3056_v13, %v4133_v8  ;;  %v3048_v41 = vrot.slane %v3040_v58, %v4133_v8  ;;  %v5091_v21 = vrot.slane %v3465_v18, %v4133_v8 }
 0x177   : > { %v5028_v3 = vpop.permute.xlu1 %3012  ;;  %v5030_v30 = vpop.permute.xlu0 %3008  ;;  %v3481_v4 = vcombine.high %v6820_v6, %v6819_v43  ;;  %v6826_v6 = vld [vmem:[#allocation26_spill] sm:$0xff]  ;;  %v3306_v15 = vcombine.low %v5069_v16, %v5049_v25 }
 0x178   : > { %v2680_v43 = vcombine.low %v6826_v6, %v6825_v24  ;;  %v5085_v6 = vrot.slane %v3433_v14, %v4133_v8  ;;  %6830 = vst [vmem:[#allocation53_spill] sm:$0xff] %v5091_v21  ;;  %v5096_v24 = vrot.slane %v2696_v19, %v4133_v8  ;;  %v3104_v18 = vcombine.low %v3048_v41, %v3064_v27 }
 0x179   : > { %v5088_v55 = vrot.slane %v3481_v4, %v4133_v8  ;;  %v5107_v4 = vrot.slane %v2816_v56, %v4133_v8  ;;  %v3105_v53 = vcombine.high %v3048_v41, %v3064_v27  ;;  %v2712_v41 = vcombine.low %v5055_v5, %v5052_v44 }
 0x17a   : > { %3741 = vrot.lane.b32.xlu1 %v3699_v48, %s4071_s23  ;;  %v5082_v48 = vrot.slane %v3680_v42, %v4165_v20  ;;  %6828 = vst [vmem:[#allocation19_spill] sm:$0xff] %v5085_v6  ;;  %6831 = vst [vmem:[#allocation56_spill] sm:$0xff] %v5096_v24  ;;  %v5099_v62 = vrot.slane %v2680_v43, %v4133_v8 }
 0x17b   : > { %v5064_v59 = vpop.permute.xlu1 %3020  ;;  %v5066_v33 = vpop.permute.xlu0 %3016  ;;  %6829 = vst [vmem:[#allocation55_spill] sm:$0xff] %v5088_v55  ;;  %v3544_v1 = vcombine.low %v5091_v21, %v5088_v55  ;;  %v3119_v60 = vrot.slane %v3105_v53, %v4165_v20  ;;  %v2880_v21 = vcombine.low %v5107_v4, %v5104_v32  ;;  %v5153_v53 = vrot.slane %v2712_v41, %v4165_v20 }
 0x17c   : > { %v3088_v13 = vcombine.low %v5028_v3, %v5064_v59  ;;  %v3072_v58 = vcombine.low %v5030_v30, %v5066_v33  ;;  %6832 = vst [vmem:[#allocation54_spill] sm:$0xff] %v5099_v62  ;;  %v3700_v56 = vcombine.low %v5072_v54, %v5082_v48 }
 0x17d   : > { %6835 = vst [vmem:[#allocation62_spill] sm:$0xff] %v5153_v53 }
 0x17e   : > { %v3096_v42 = vrot.slane %v3088_v13, %v4133_v8  ;;  %v3080_v14 = vrot.slane %v3072_v58, %v4133_v8  ;;  %3345 = vrot.lane.b32.xlu1 %v3306_v15, %s4074_s26  ;;  %v3512_v13 = vcombine.low %v5085_v6, %v5075_v28  ;;  %v2744_v15 = vcombine.low %v5099_v62, %v5096_v24 }
 0x17f   : > { %v5110_v61 = vpop.permute.xlu1 %2205  ;;  %v5112_v19 = vpop.permute.xlu0 %2201  ;;  %v5150_v28 = vrot.slane %v3544_v1, %v4165_v20  ;;  %v5168_v1 = vrot.slane %v2880_v21, %v4165_v20 }
 0x180   : > { %v3136_v43 = vcombine.low %v3080_v14, %v3096_v42  ;;  %v3137_v52 = vcombine.high %v3080_v14, %v3096_v42  ;;  %v5147_v6 = vrot.slane %v3512_v13, %v4165_v20 }
 0x181   : > { %6838 = vst [vmem:[#allocation88_spill] sm:$0xff] %v5168_v1 }
 0x182   : > { %v5121_v58 = vrot.slane %v3137_v52, %v4165_v20  ;;  %v5124_v27 = vrot.slane %v3136_v43, %v4165_v20  ;;  %3745 = vrot.lane.b32.xlu1 %v3700_v56, %s4073_s25  ;;  %v5137_v52 = vrot.slane %v3104_v18, %v4165_v20  ;;  %v2848_v43 = vcombine.low %v5011_v0, %v5008_v63 }
 0x183   : > { %v5131_v42 = vpop.permute.xlu1 %2213  ;;  %v5133_v14 = vpop.permute.xlu0 %2209  ;;  %v5156_v18 = vrot.slane %v2744_v15, %v4165_v20  ;;  %v3564_v41 = vcombine.low %v5147_v6, %v5150_v28  ;;  %v3563_v15 = vcombine.high %v4940_v38, %v4943_v49  ;;  %v3225_v49 = vcombine.high %v4950_v47, %v4959_v51 }
 0x184   : > { %6833 = vst [vmem:[#allocation61_spill] sm:$0xff] %v5124_v27  ;;  %6834 = vst [vmem:[#allocation59_spill] sm:$0xff] %v5137_v52  ;;  %v3170_v55 = vcombine.low %v3119_v60, %v5121_v58  ;;  %v3169_v56 = vcombine.high %v5137_v52, %v5124_v27  ;;  %v5165_v13 = vrot.slane %v2848_v43, %v4165_v20  ;;  %v6866_v52 = vld [vmem:[#allocation24_spill] sm:$0xff] }
 0x185   : > { %6836 = vst [vmem:[#allocation60_spill] sm:$0xff] %v5156_v18  ;;  %v2399_v37 = vcombine.low %v5110_v61, %v5131_v42  ;;  %v2383_v43 = vcombine.low %v5112_v19, %v5133_v14 }
 0x186   : > { %3317 = vrot.lane.b32.xlu1 %v3170_v55, %s4074_s26  ;;  %3313 = vrot.lane.b32.xlu0 %v3169_v56, %s4072_s24  ;;  %6837 = vst [vmem:[#allocation87_spill] sm:$0xff] %v5165_v13  ;;  %v2777_v56 = vcombine.high %v5153_v53, %v5156_v18  ;;  %v2913_v38 = vcombine.high %v5165_v13, %v5168_v1 }
 0x187   : > { %v5160_v62 = vpop.permute.xlu1 %2221  ;;  %v5162_v24 = vpop.permute.xlu0 %2217  ;;  %v3209_v55 = vcombine.high %v4952_v17, %v4961_v50  ;;  %v3193_v18 = vcombine.high %v4853_v23, %v4933_v9  ;;  %v2881_v50 = vcombine.high %v5107_v4, %v5104_v32  ;;  %v3177_v17 = vcombine.high %v4855_v36, %v4935_v11 }
 0x188   : > { %v5213_v51 = vrot.slane %v2399_v37, %v4133_v8  ;;  %v5227_v32 = vrot.slane %v3225_v49, %v4133_v8  ;;  %v2785_v37 = vcombine.high %v6809_v57, %v4367_v35  ;;  %v3171_v4 = vcombine.high %v3119_v60, %v5121_v58 }
 0x189   : > { %v5230_v36 = vrot.slane %v3209_v55, %v4133_v8  ;;  %v5246_v35 = vrot.slane %v3193_v18, %v4133_v8  ;;  %v5249_v57 = vrot.slane %v3177_v17, %v4133_v8  ;;  %v2713_v17 = vcombine.high %v5055_v5, %v5052_v44  ;;  %v6848_v44 = vld [vmem:[#allocation56_spill] sm:$0xff]  ;;  %v6849_v5 = vld [vmem:[#allocation54_spill] sm:$0xff] }
 0x18a   : > { %3717 = vrot.lane.b32.xlu1 %v3564_v41, %s4073_s25  ;;  %3713 = vrot.lane.b32.xlu0 %v3563_v15, %s4071_s23  ;;  %v2849_v15 = vcombine.high %v5011_v0, %v5008_v63  ;;  %v5216_v63 = vrot.slane %v2383_v43, %v4133_v8  ;;  %v2801_v0 = vcombine.high %v6808_v7, %v4364_v34 }
 0x18b   : > { %v5184_v21 = vpop.permute.xlu1 %2229  ;;  %v5186_v45 = vpop.permute.xlu0 %2225  ;;  %v2833_v34 = vcombine.high %v4380_v39, %v4394_v46  ;;  %v2817_v7 = vcombine.high %v6814_v40, %v6813_v26  ;;  %v3288_v46 = vcombine.low %v5230_v36, %v5227_v32  ;;  %v3701_v26 = vcombine.high %v5072_v54, %v5082_v48 }
 0x18c   : > { %v2431_v53 = vcombine.low %v5160_v62, %v5184_v21  ;;  %v2415_v41 = vcombine.low %v5162_v24, %v5186_v45  ;;  %v2863_v55 = vrot.slane %v2849_v15, %v4165_v20  ;;  %v2447_v60 = vcombine.low %v5216_v63, %v5213_v51 }
 0x18d   : > { %v5269_v58 = vrot.slane %v2801_v0, %v4133_v8  ;;  %v5272_v18 = vrot.slane %v2785_v37, %v4133_v8  ;;  %v5275_v43 = vrot.slane %v2833_v34, %v4133_v8  ;;  %v3681_v15 = vcombine.high %v5005_v31, %v5002_v2  ;;  %v6847_v2 = vld [vmem:[#allocation85_spill] sm:$0xff] }
 0x18e   : > { %v5203_v13 = vrot.slane %v2431_v53, %v4133_v8  ;;  %v5206_v47 = vrot.slane %v2415_v41, %v4133_v8  ;;  %2921 = vrot.lane.b32.xlu1 %v2777_v56, %s4072_s24  ;;  %2949 = vrot.lane.b32.xlu0 %v2913_v38, %s4072_s24  ;;  %v3307_v53 = vcombine.high %v5069_v16, %v5049_v25 }
 0x18f   : > { %v5220_v23 = vpop.permute.xlu1 %2203  ;;  %v5222_v9 = vpop.permute.xlu0 %2199  ;;  %v2895_v56 = vrot.slane %v2881_v50, %v4165_v20  ;;  %v3565_v25 = vcombine.high %v5147_v6, %v5150_v28  ;;  %v5278_v38 = vrot.slane %v2817_v7, %v4133_v8  ;;  %v3256_v6 = vcombine.low %v5249_v57, %v5246_v35 }
 0x190   : > { %6839 = vst [vmem:[#allocation89_spill] sm:$0xff] %v5220_v23  ;;  %6840 = vst [vmem:[#allocation90_spill] sm:$0xff] %v5222_v9  ;;  %v2479_v11 = vcombine.low %v5206_v47, %v5203_v13  ;;  %v5289_v49 = vrot.slane %v2447_v60, %v4165_v20  ;;  %v3649_v41 = vcombine.high %v4989_v10, %v4986_v22  ;;  %v6846_v10 = vld [vmem:[#allocation17_spill] sm:$0xff] }
 0x191   : > { %v2914_v48 = vcombine.low %v2863_v55, %v2895_v56  ;;  %v3296_v50 = vrot.slane %v3288_v46, %v4165_v20  ;;  %v3089_v0 = vcombine.high %v5028_v3, %v5064_v59  ;;  %v3073_v37 = vcombine.high %v5030_v30, %v5066_v33 }
 0x192   : > { %3321 = vrot.lane.b32.xlu1 %v3171_v4, %s4071_s23  ;;  %3349 = vrot.lane.b32.xlu0 %v3307_v53, %s4071_s23  ;;  %v5266_v16 = vrot.slane %v2479_v11, %v4165_v20  ;;  %6845 = vst [vmem:[#allocation95_spill] sm:$0xff] %v5289_v49  ;;  %v3057_v31 = vcombine.high %v4973_v29, %v4994_v12 }
 0x193   : > { %v5255_v39 = vpop.permute.xlu1 %2211  ;;  %v5257_v40 = vpop.permute.xlu0 %2207  ;;  %v3041_v4 = vcombine.high %v6847_v2, %v6846_v10  ;;  %v2915_v53 = vcombine.high %v2863_v55, %v2895_v56  ;;  %v2745_v34 = vcombine.high %v6849_v5, %v6848_v44  ;;  %v3264_v12 = vrot.slane %v3256_v6, %v4165_v20 }
 0x194   : > { %6841 = vst [vmem:[#allocation91_spill] sm:$0xff] %v5255_v39  ;;  %6842 = vst [vmem:[#allocation92_spill] sm:$0xff] %v5257_v40  ;;  %v2512_v11 = vcombine.high %v5289_v49, %v5266_v16  ;;  %v2263_v3 = vcombine.low %v5220_v23, %v5255_v39  ;;  %v2247_v30 = vcombine.low %v5222_v9, %v5257_v40  ;;  %v6874_v9 = vld [vmem:[#allocation67_spill] sm:$0xff]  ;;  %v6875_v40 = vld [vmem:[#allocation65_spill] sm:$0xff] }
 0x195   : > { %6843 = vst [vmem:[#allocation93_spill] sm:$0xff] %v5266_v16  ;;  %v3663_v55 = vrot.slane %v3649_v41, %v4165_v20  ;;  %v3695_v56 = vrot.slane %v3681_v15, %v4165_v20  ;;  %v5330_v60 = vrot.slane %v3089_v0, %v4133_v8  ;;  %v5333_v46 = vrot.slane %v3073_v37, %v4133_v8  ;;  %v6878_v39 = vld [vmem:[#allocation66_spill] sm:$0xff] }
 0x196   : > { %3721 = vrot.lane.b32.xlu1 %v3565_v25, %s4076_s28  ;;  %3749 = vrot.lane.b32.xlu0 %v3701_v26, %s4076_s28  ;;  %v3308_v25 = vcombine.low %v3264_v12, %v3296_v50  ;;  %v5336_v26 = vrot.slane %v2713_v17, %v4165_v20  ;;  %v5339_v6 = vrot.slane %v3057_v31, %v4133_v8 }
 0x197   : > { %v5284_v54 = vpop.permute.xlu1 %2219  ;;  %v5286_v28 = vpop.permute.xlu0 %2215  ;;  %v5351_v0 = vrot.slane %v2263_v3, %v4133_v8  ;;  %v5354_v37 = vrot.slane %v2247_v30, %v4133_v8  ;;  %v5363_v31 = vrot.slane %v2745_v34, %v4165_v20  ;;  %v3702_v10 = vcombine.low %v3663_v55, %v3695_v56 }
 0x198   : > { %6844 = vst [vmem:[#allocation94_spill] sm:$0xff] %v5286_v28  ;;  %v3152_v2 = vcombine.low %v5333_v46, %v5330_v60  ;;  %v3309_v5 = vcombine.high %v3264_v12, %v3296_v50  ;;  %v2448_v3 = vcombine.high %v5216_v63, %v5213_v51  ;;  %v2864_v34 = vcombine.low %v5272_v18, %v5269_v58  ;;  %v6854_v63 = vld [vmem:[#allocation20_spill] sm:$0xff]  ;;  %v6855_v50 = vld [vmem:[#allocation19_spill] sm:$0xff] }
 0x199   : > { %v2896_v30 = vcombine.low %v5278_v38, %v5275_v43  ;;  %v2778_v51 = vcombine.low %v5336_v26, %v5363_v31  ;;  %v3513_v12 = vcombine.high %v6855_v50, %v6854_v63  ;;  %v3703_v1 = vcombine.high %v3663_v55, %v3695_v56 }
 0x19a   : > { %2953 = vrot.lane.b32.xlu0 %v2914_v48, %s4074_s26  ;;  %2548 = vrot.lane.b32.xlu1 %v2512_v11, %s4072_s24  ;;  %v5342_v48 = vrot.slane %v3041_v4, %v4133_v8  ;;  %v2480_v4 = vcombine.high %v5206_v47, %v5203_v13  ;;  %v5394_v16 = vrot.slane %v3152_v2, %v4165_v20 }
 0x19b   : > { %v5318_v59 = vpop.permute.xlu1 %2227  ;;  %v5320_v29 = vpop.permute.xlu0 %2223  ;;  %v5406_v27 = vrot.slane %v2448_v3, %v4165_v20  ;;  %v5409_v63 = vrot.slane %v2864_v34, %v4165_v20  ;;  %v5412_v55 = vrot.slane %v2896_v30, %v4165_v20  ;;  %v5428_v3 = vrot.slane %v3513_v12, %v4165_v20 }
 0x19c   : > { %v2295_v33 = vcombine.low %v5284_v54, %v5318_v59  ;;  %v2279_v7 = vcombine.low %v5286_v28, %v5320_v29  ;;  %v3289_v30 = vcombine.high %v5230_v36, %v5227_v32  ;;  %v3257_v12 = vcombine.high %v5249_v57, %v5246_v35  ;;  %v6864_v57 = vld [vmem:[#allocation23_spill] sm:$0xff] }
 0x19d   : > { %v1615_v23 = vcombine.low %v6875_v40, %v6874_v9  ;;  %v6883_v40 = vld [vmem:[#allocation18_spill] sm:$0xff] }
 0x19e   : > { %v5345_v41 = vrot.slane %v2295_v33, %v4133_v8  ;;  %v5348_v15 = vrot.slane %v2279_v7, %v4133_v8  ;;  %3353 = vrot.lane.b32.xlu0 %v3308_v25, %s4073_s25  ;;  %2957 = vrot.lane.b32.xlu1 %v2915_v53, %s4071_s23  ;;  %v3120_v53 = vcombine.low %v5342_v48, %v5339_v6  ;;  %v6856_v7 = vld [vmem:[#allocation55_spill] sm:$0xff]  ;;  %v6857_v25 = vld [vmem:[#allocation53_spill] sm:$0xff]  ;;  %v6884_v9 = vld [vmem:[#allocation70_spill] sm:$0xff] }
 0x19f   : > { %v5358_v17 = vpop.permute.xlu1 %1813  ;;  %v5360_v11 = vpop.permute.xlu0 %1809  ;;  %v2311_v33 = vcombine.low %v5354_v37, %v5351_v0  ;;  %v3545_v22 = vcombine.high %v6857_v25, %v6856_v7 }
 0x1a0   : > { %6850 = vst [vmem:[#allocation17_spill] sm:$0xff] %v5358_v17  ;;  %6851 = vst [vmem:[#allocation85_spill] sm:$0xff] %v5360_v11  ;;  %v2343_v44 = vcombine.low %v5348_v15, %v5345_v41  ;;  %v5403_v49 = vrot.slane %v3120_v53, %v4165_v20 }
 0x1a1   : > { %v5425_v53 = vrot.slane %v2311_v33, %v4165_v20  ;;  %v5431_v34 = vrot.slane %v3545_v22, %v4165_v20  ;;  %v2916_v33 = vcombine.low %v5409_v63, %v5412_v55 }
 0x1a2   : > { %3753 = vrot.lane.b32.xlu0 %v3702_v10, %s4075_s27  ;;  %3357 = vrot.lane.b32.xlu1 %v3309_v5, %s4076_s28  ;;  %v5397_v10 = vrot.slane %v2480_v4, %v4165_v20  ;;  %v5400_v5 = vrot.slane %v2343_v44, %v4165_v20 }
 0x1a3   : > { %v5383_v13 = vpop.permute.xlu1 %1821  ;;  %v5385_v47 = vpop.permute.xlu0 %1817  ;;  %6861 = vst [vmem:[#allocation53_spill] sm:$0xff] %v5425_v53 }
 0x1a4   : > { %6852 = vst [vmem:[#allocation56_spill] sm:$0xff] %v5383_v13  ;;  %6853 = vst [vmem:[#allocation54_spill] sm:$0xff] %v5385_v47  ;;  %v2007_v56 = vcombine.low %v5358_v17, %v5383_v13  ;;  %v1991_v2 = vcombine.low %v5360_v11, %v5385_v47 }
 0x1a5   : > { %6858 = vst [vmem:[#allocation20_spill] sm:$0xff] %v5400_v5 }
 0x1a6   : > { %2925 = vrot.lane.b32.xlu0 %v2778_v51, %s4074_s26  ;;  %3757 = vrot.lane.b32.xlu1 %v3703_v1, %s4077_s29  ;;  %v3172_v51 = vcombine.low %v5403_v49, %v5394_v16  ;;  %v2513_v1 = vcombine.low %v5406_v27, %v5397_v10  ;;  %v5446_v22 = vrot.slane %v2007_v56, %v4133_v8  ;;  %v6865_v56 = vld [vmem:[#allocation21_spill] sm:$0xff] }
 0x1a7   : > { %v5420_v4 = vpop.permute.xlu1 %1829  ;;  %v5422_v44 = vpop.permute.xlu0 %1825  ;;  %v5449_v32 = vrot.slane %v1991_v2, %v4133_v8  ;;  %v2665_v50 = vcombine.high %v6865_v56, %v6864_v57  ;;  %v6867_v2 = vld [vmem:[#allocation22_spill] sm:$0xff] }
 0x1a8   : > { %6859 = vst [vmem:[#allocation19_spill] sm:$0xff] %v5420_v4  ;;  %6860 = vst [vmem:[#allocation55_spill] sm:$0xff] %v5422_v44  ;;  %v2649_v11 = vcombine.high %v6867_v2, %v6866_v52 }
 0x1a9   : > { %v2055_v13 = vcombine.low %v5449_v32, %v5446_v22 }
 0x1aa   : > { %3325 = vrot.lane.b32.xlu0 %v3172_v51, %s4073_s25  ;;  %2552 = vrot.lane.b32.xlu1 %v2513_v1, %s4074_s26  ;;  %v3566_v51 = vcombine.low %v5428_v3, %v5431_v34  ;;  %v5468_v1 = vrot.slane %v3289_v30, %v4165_v20  ;;  %v5485_v30 = vrot.slane %v3257_v12, %v4165_v20  ;;  %v6872_v12 = vld [vmem:[#allocation28_spill] sm:$0xff] }
 0x1ab   : > { %v5453_v36 = vpop.permute.xlu1 %1837  ;;  %v5455_v7 = vpop.permute.xlu0 %1833  ;;  %v5493_v56 = vrot.slane %v2649_v11, %v4133_v8  ;;  %v6877_v11 = vld [vmem:[#allocation68_spill] sm:$0xff] }
 0x1ac   : > { %6862 = vst [vmem:[#allocation96_spill] sm:$0xff] %v5453_v36  ;;  %6863 = vst [vmem:[#allocation97_spill] sm:$0xff] %v5455_v7  ;;  %v2039_v25 = vcombine.low %v5420_v4, %v5453_v36  ;;  %v2023_v35 = vcombine.low %v5422_v44, %v5455_v7  ;;  %v3310_v2 = vcombine.low %v5485_v30, %v5468_v1  ;;  %v6871_v44 = vld [vmem:[#allocation25_spill] sm:$0xff]  ;;  %v6873_v4 = vld [vmem:[#allocation26_spill] sm:$0xff] }
 0x1ad   : > { %v2681_v36 = vcombine.high %v6873_v4, %v6872_v12  ;;  %v1599_v28 = vcombine.low %v6878_v39, %v6877_v11  ;;  %v2779_v4 = vcombine.high %v5336_v26, %v5363_v31  ;;  %v1631_v39 = vcombine.low %v6884_v9, %v6883_v40 }
 0x1ae   : > { %v5471_v47 = vrot.slane %v2039_v25, %v4133_v8  ;;  %v5474_v17 = vrot.slane %v2023_v35, %v4133_v8  ;;  %3725 = vrot.lane.b32.xlu0 %v3566_v51, %s4075_s27  ;;  %2961 = vrot.lane.b32.xlu1 %v2916_v33, %s4073_s25  ;;  %v5490_v35 = vrot.slane %v2665_v50, %v4133_v8  ;;  %v6870_v51 = vld [vmem:[#allocation27_spill] sm:$0xff] }
 0x1af   : > { %v5480_v52 = vpop.permute.xlu1 %1811  ;;  %v5482_v57 = vpop.permute.xlu0 %1807  ;;  %v2376_v33 = vcombine.high %v5425_v53, %v5400_v5  ;;  %v2697_v7 = vcombine.high %v6871_v44, %v6870_v51  ;;  %v5519_v44 = vrot.slane %v2055_v13, %v4165_v20  ;;  %v6881_v51 = vld [vmem:[#allocation13_spill] sm:$0xff]  ;;  %v5531_v11 = vrot.slane %v2681_v36, %v4133_v8 }
 0x1b0   : > { %6868 = vst [vmem:[#allocation23_spill] sm:$0xff] %v5480_v52  ;;  %6869 = vst [vmem:[#allocation21_spill] sm:$0xff] %v5482_v57  ;;  %v2087_v25 = vcombine.low %v5474_v17, %v5471_v47  ;;  %v5534_v26 = vrot.slane %v1615_v23, %v4133_v8  ;;  %v5537_v31 = vrot.slane %v1599_v28, %v4133_v8 }
 0x1b1   : > { %6880 = vst [vmem:[#allocation27_spill] sm:$0xff] %v5519_v44  ;;  %v5551_v23 = vrot.slane %v1631_v39, %v4133_v8  ;;  %v2432_v28 = vcombine.high %v5160_v62, %v5184_v21  ;;  %v3173_v40 = vcombine.high %v5403_v49, %v5394_v16  ;;  %v2400_v39 = vcombine.high %v5110_v61, %v5131_v42 }
 0x1b2   : > { %v5506_v50 = vrot.slane %v2087_v25, %v4165_v20  ;;  %3361 = vrot.lane.b32.xlu1 %v3310_v2, %s4075_s27  ;;  %2520 = vrot.lane.b32.xlu0 %v2376_v33, %s4072_s24  ;;  %v6882_v25 = vld [vmem:[#allocation69_spill] sm:$0xff]  ;;  %v5528_v33 = vrot.slane %v2697_v7, %v4133_v8  ;;  %v2728_v7 = vcombine.low %v5493_v56, %v5490_v35 }
 0x1b3   : > { %v5512_v5 = vpop.permute.xlu1 %1819  ;;  %v5514_v53 = vpop.permute.xlu0 %1815  ;;  %v1647_v12 = vcombine.low %v6882_v25, %v6881_v51  ;;  %v2514_v25 = vcombine.high %v5406_v27, %v5397_v10  ;;  %v2384_v62 = vcombine.high %v5112_v19, %v5133_v14  ;;  %v3567_v61 = vcombine.high %v5428_v3, %v5431_v34 }
 0x1b4   : > { %6876 = vst [vmem:[#allocation24_spill] sm:$0xff] %v5506_v50  ;;  %6879 = vst [vmem:[#allocation22_spill] sm:$0xff] %v5514_v53  ;;  %v2120_v2 = vcombine.high %v5519_v44, %v5506_v50  ;;  %v2917_v19 = vcombine.high %v5409_v63, %v5412_v55  ;;  %v5584_v42 = vrot.slane %v2728_v7, %v4165_v20 }
 0x1b5   : > { %v5548_v36 = vrot.slane %v1647_v12, %v4133_v8  ;;  %v5587_v14 = vrot.slane %v2432_v28, %v4133_v8  ;;  %v5606_v10 = vrot.slane %v2400_v39, %v4133_v8  ;;  %v5609_v63 = vrot.slane %v2384_v62, %v4133_v8  ;;  %v6887_v28 = vld [vmem:[#allocation6_spill] sm:$0xff]  ;;  %v6895_v12 = vld [vmem:[#allocation47_spill] sm:$0xff] }
 0x1b6   : > { %2929 = vrot.lane.b32.xlu0 %v2779_v4, %s4071_s23  ;;  %2156 = vrot.lane.b32.xlu1 %v2120_v2, %s4072_s24  ;;  %v2416_v4 = vcombine.high %v5162_v24, %v5186_v45  ;;  %v2344_v2 = vcombine.high %v5348_v15, %v5345_v41  ;;  %v2312_v24 = vcombine.high %v5354_v37, %v5351_v0 }
 0x1b7   : > { %v5541_v13 = vpop.permute.xlu1 %1827  ;;  %v5543_v9 = vpop.permute.xlu0 %1823  ;;  %v2760_v45 = vcombine.low %v5531_v11, %v5528_v33  ;;  %v2088_v41 = vcombine.high %v5474_v17, %v5471_v47  ;;  %v1871_v15 = vcombine.low %v5480_v52, %v5512_v5  ;;  %v1855_v0 = vcombine.low %v5482_v57, %v5514_v53 }
 0x1b8   : > { %v5603_v37 = vrot.slane %v2344_v2, %v4165_v20  ;;  %v5612_v55 = vrot.slane %v2312_v24, %v4165_v20  ;;  %v2056_v47 = vcombine.high %v5449_v32, %v5446_v22  ;;  %v3153_v22 = vcombine.high %v5333_v46, %v5330_v60 }
 0x1b9   : > { %v5615_v17 = vrot.slane %v2760_v45, %v4165_v20  ;;  %v3311_v39 = vcombine.high %v5485_v30, %v5468_v1  ;;  %v5640_v62 = vrot.slane %v1871_v15, %v4133_v8  ;;  %v5643_v24 = vrot.slane %v1855_v0, %v4133_v8 }
 0x1ba   : > { %3329 = vrot.lane.b32.xlu0 %v3173_v40, %s4076_s28  ;;  %2556 = vrot.lane.b32.xlu1 %v2514_v25, %s4071_s23  ;;  %v5590_v40 = vrot.slane %v2416_v4, %v4133_v8  ;;  %v6888_v4 = vld [vmem:[#allocation4_spill] sm:$0xff]  ;;  %v2377_v45 = vcombine.low %v5612_v55, %v5603_v37  ;;  %v3121_v60 = vcombine.high %v5342_v48, %v5339_v6 }
 0x1bb   : > { %v5575_v27 = vpop.permute.xlu1 %1835  ;;  %v5577_v21 = vpop.permute.xlu0 %1831  ;;  %v1479_v2 = vcombine.low %v6888_v4, %v6887_v28  ;;  %v2780_v46 = vcombine.low %v5584_v42, %v5615_v17  ;;  %v2865_v1 = vcombine.high %v5272_v18, %v5269_v58  ;;  %v2897_v30 = vcombine.high %v5278_v38, %v5275_v43  ;;  %v6891_v58 = vld [vmem:[#allocation51_spill] sm:$0xff]  ;;  %v6893_v38 = vld [vmem:[#allocation5_spill] sm:$0xff] }
 0x1bc   : > { %v1903_v16 = vcombine.low %v5541_v13, %v5575_v27  ;;  %v1887_v49 = vcombine.low %v5543_v9, %v5577_v21  ;;  %v2495_v32 = vcombine.low %v5590_v40, %v5587_v14  ;;  %v6892_v18 = vld [vmem:[#allocation43_spill] sm:$0xff]  ;;  %v5676_v0 = vrot.slane %v3153_v22, %v4165_v20 }
 0x1bd   : > { %v1190_v43 = vcombine.low %v6892_v18, %v6891_v58  ;;  %v5690_v18 = vrot.slane %v3121_v60, %v4165_v20  ;;  %v5693_v22 = vrot.slane %v2865_v1, %v4165_v20  ;;  %v1663_v58 = vcombine.low %v5537_v31, %v5534_v26 }
 0x1be   : > { %v5620_v3 = vrot.slane %v1903_v16, %v4133_v8  ;;  %v5623_v34 = vrot.slane %v1887_v49, %v4133_v8  ;;  %3729 = vrot.lane.b32.xlu0 %v3567_v61, %s4077_s29  ;;  %2965 = vrot.lane.b32.xlu1 %v2917_v19, %s4076_s28  ;;  %v5648_v61 = vrot.slane %v2088_v41, %v4165_v20  ;;  %v6894_v41 = vld [vmem:[#allocation3_spill] sm:$0xff] }
 0x1bf   : > { %v5627_v25 = vpop.permute.xlu1 %1024  ;;  %v5629_v7 = vpop.permute.xlu0 %1020  ;;  %v2463_v19 = vcombine.low %v5609_v63, %v5606_v10  ;;  %v5669_v49 = vrot.slane %v2056_v47, %v4165_v20  ;;  %v1463_v15 = vcombine.low %v6894_v41, %v6893_v38  ;;  %v6901_v38 = vld [vmem:[#allocation9_spill] sm:$0xff]  ;;  %v3174_v28 = vcombine.low %v5690_v18, %v5676_v0 }
 0x1c0   : > { %6885 = vst [vmem:[#allocation25_spill] sm:$0xff] %v5627_v25  ;;  %6886 = vst [vmem:[#allocation28_spill] sm:$0xff] %v5629_v7  ;;  %v1951_v16 = vcombine.low %v5623_v34, %v5620_v3  ;;  %v1206_v50 = vcombine.low %v6895_v12, %v5629_v7 }
 0x1c1   : > { %v2121_v44 = vcombine.low %v5669_v49, %v5648_v61  ;;  %v5707_v60 = vrot.slane %v2463_v19, %v4165_v20 }
 0x1c2   : > { %2524 = vrot.lane.b32.xlu0 %v2377_v45, %s4074_s26  ;;  %3365 = vrot.lane.b32.xlu1 %v3311_v39, %s4077_s29  ;;  %v5679_v45 = vrot.slane %v2495_v32, %v4165_v20  ;;  %v1919_v39 = vcombine.low %v5643_v24, %v5640_v62  ;;  %v5696_v32 = vrot.slane %v2897_v30, %v4165_v20 }
 0x1c3   : > { %v5664_v6 = vpop.permute.xlu1 %1032  ;;  %v5666_v48 = vpop.permute.xlu0 %1028  ;;  %v5710_v1 = vrot.slane %v1951_v16, %v4165_v20  ;;  %v1695_v30 = vcombine.low %v5551_v23, %v5548_v36  ;;  %v5723_v19 = vrot.slane %v1206_v50, %v4133_v8 }
 0x1c4   : > { %6889 = vst [vmem:[#allocation26_spill] sm:$0xff] %v5664_v6  ;;  %6890 = vst [vmem:[#allocation13_spill] sm:$0xff] %v5666_v48  ;;  %v1222_v47 = vcombine.low %v5627_v25, %v5664_v6  ;;  %v6899_v25 = vld [vmem:[#allocation10_spill] sm:$0xff]  ;;  %v6900_v6 = vld [vmem:[#allocation8_spill] sm:$0xff]  ;;  %v2515_v57 = vcombine.low %v5707_v60, %v5679_v45  ;;  %v2918_v50 = vcombine.low %v5693_v22, %v5696_v32 }
 0x1c5   : > { %6898 = vst [vmem:[#allocation100_spill] sm:$0xff] %v5710_v1  ;;  %v1511_v41 = vcombine.low %v6900_v6, %v6899_v25  ;;  %v5731_v6 = vrot.slane %v1919_v39, %v4165_v20  ;;  %v5753_v53 = vrot.slane %v1695_v30, %v4165_v20 }
 0x1c6   : > { %2933 = vrot.lane.b32.xlu0 %v2780_v46, %s4073_s25  ;;  %2160 = vrot.lane.b32.xlu1 %v2121_v44, %s4074_s26  ;;  %v6902_v46 = vld [vmem:[#allocation7_spill] sm:$0xff]  ;;  %v5726_v16 = vrot.slane %v1222_v47, %v4133_v8 }
 0x1c7   : > { %v5702_v12 = vpop.permute.xlu1 %1018  ;;  %v5704_v7 = vpop.permute.xlu0 %1036  ;;  %v1495_v4 = vcombine.low %v6902_v46, %v6901_v38  ;;  %6903 = vst [vmem:[#allocation101_spill] sm:$0xff] %v5731_v6  ;;  %v5734_v46 = vrot.slane %v1190_v43, %v4133_v8  ;;  %v6905_v38 = vld [vmem:[#allocation52_spill] sm:$0xff]  ;;  %v5750_v43 = vrot.slane %v1663_v58, %v4165_v20  ;;  %6910 = vst [vmem:[#allocation106_spill] sm:$0xff] %v5753_v53 }
 0x1c8   : > { %6896 = vst [vmem:[#allocation98_spill] sm:$0xff] %v5702_v12  ;;  %6897 = vst [vmem:[#allocation99_spill] sm:$0xff] %v5704_v7  ;;  %v1238_v44 = vcombine.low %v5666_v48, %v5704_v7  ;;  %v6906_v48 = vld [vmem:[#allocation44_spill] sm:$0xff]  ;;  %v1984_v58 = vcombine.high %v5731_v6, %v5710_v1 }
 0x1c9   : > { %6904 = vst [vmem:[#allocation102_spill] sm:$0xff] %v5734_v46  ;;  %v1054_v7 = vcombine.low %v6906_v48, %v6905_v38  ;;  %6909 = vst [vmem:[#allocation105_spill] sm:$0xff] %v5750_v43  ;;  %v6911_v48 = vld [vmem:[#allocation48_spill] sm:$0xff] }
 0x1ca   : > { %v5739_v25 = vrot.slane %v1238_v44, %v4133_v8  ;;  %3333 = vrot.lane.b32.xlu0 %v3174_v28, %s4075_s27  ;;  %2560 = vrot.lane.b32.xlu1 %v2515_v57, %s4073_s25  ;;  %v1070_v38 = vcombine.low %v6911_v48, %v5702_v12  ;;  %v5760_v28 = vrot.slane %v1479_v2, %v4133_v8 }
 0x1cb   : > { %v5745_v47 = vpop.permute.xlu1 %1026  ;;  %v5747_v39 = vpop.permute.xlu0 %1022  ;;  %v1254_v57 = vcombine.low %v5734_v46, %v5723_v19  ;;  %v5769_v30 = vrot.slane %v1054_v7, %v4133_v8  ;;  %v5772_v44 = vrot.slane %v1463_v15, %v4133_v8  ;;  %v5775_v48 = vrot.slane %v1511_v41, %v4133_v8 }
 0x1cc   : > { %6907 = vst [vmem:[#allocation103_spill] sm:$0xff] %v5745_v47  ;;  %6908 = vst [vmem:[#allocation104_spill] sm:$0xff] %v5747_v39  ;;  %v1286_v52 = vcombine.low %v5726_v16, %v5739_v25  ;;  %v5778_v2 = vrot.slane %v1495_v4, %v4133_v8  ;;  %v2296_v12 = vcombine.high %v5284_v54, %v5318_v59  ;;  %v6913_v4 = vld [vmem:[#allocation94_spill] sm:$0xff] }
 0x1cd   : > { %v1728_v15 = vcombine.high %v5750_v43, %v5753_v53  ;;  %v2280_v6 = vcombine.high %v6913_v4, %v5320_v29  ;;  %v5796_v46 = vrot.slane %v1070_v38, %v4133_v8  ;;  %v5809_v29 = vrot.slane %v1254_v57, %v4165_v20  ;;  %v6914_v38 = vld [vmem:[#allocation91_spill] sm:$0xff]  ;;  %v6915_v4 = vld [vmem:[#allocation89_spill] sm:$0xff]  ;;  %v6916_v53 = vld [vmem:[#allocation92_spill] sm:$0xff] }
 0x1ce   : > { %2969 = vrot.lane.b32.xlu1 %v2918_v50, %s4075_s27  ;;  %2128 = vrot.lane.b32.xlu0 %v1984_v58, %s4072_s24  ;;  %v5791_v41 = vrot.slane %v1286_v52, %v4165_v20  ;;  %v2378_v50 = vcombine.high %v5612_v55, %v5603_v37  ;;  %v2781_v58 = vcombine.high %v5584_v42, %v5615_v17  ;;  %v6918_v57 = vld [vmem:[#allocation96_spill] sm:$0xff] }
 0x1cf   : > { %v5784_v1 = vpop.permute.xlu1 %1034  ;;  %v5786_v7 = vpop.permute.xlu0 %1030  ;;  %v1664_v52 = vcombine.high %v5537_v31, %v5534_v26  ;;  %v2264_v43 = vcombine.high %v6915_v4, %v6914_v38  ;;  %v2919_v26 = vcombine.high %v5693_v22, %v5696_v32  ;;  %v1696_v31 = vcombine.high %v5551_v23, %v5548_v36  ;;  %v6919_v22 = vld [vmem:[#allocation19_spill] sm:$0xff]  ;;  %v6923_v4 = vld [vmem:[#allocation56_spill] sm:$0xff] }
 0x1d0   : > { %6912 = vst [vmem:[#allocation107_spill] sm:$0xff] %v5784_v1  ;;  %v1102_v54 = vcombine.low %v5745_v47, %v5784_v1  ;;  %v1086_v59 = vcombine.low %v5747_v39, %v5786_v7  ;;  %v6917_v47 = vld [vmem:[#allocation90_spill] sm:$0xff]  ;;  %v5833_v55 = vrot.slane %v2280_v6, %v4133_v8  ;;  %v1118_v17 = vcombine.low %v5769_v30, %v5796_v46  ;;  %v6921_v36 = vld [vmem:[#allocation55_spill] sm:$0xff] }
 0x1d1   : > { %v2248_v1 = vcombine.high %v6917_v47, %v6916_v53  ;;  %v5830_v53 = vrot.slane %v2296_v12, %v4133_v8  ;;  %v2040_v32 = vcombine.high %v6919_v22, %v6918_v57  ;;  %v2122_v12 = vcombine.high %v5669_v49, %v5648_v61  ;;  %v6924_v57 = vld [vmem:[#allocation17_spill] sm:$0xff] }
 0x1d2   : > { %v5816_v39 = vrot.slane %v1102_v54, %v4133_v8  ;;  %v5819_v37 = vrot.slane %v1086_v59, %v4133_v8  ;;  %1764 = vrot.lane.b32.xlu1 %v1728_v15, %s4072_s24  ;;  %2528 = vrot.lane.b32.xlu0 %v2378_v50, %s4071_s23  ;;  %v6920_v15 = vld [vmem:[#allocation97_spill] sm:$0xff]  ;;  %v1952_v54 = vcombine.high %v5623_v34, %v5620_v3 }
 0x1d3   : > { %v2024_v23 = vcombine.high %v6921_v36, %v6920_v15  ;;  %v5848_v6 = vrot.slane %v2264_v43, %v4133_v8  ;;  %v5851_v59 = vrot.slane %v2248_v1, %v4133_v8  ;;  %v5854_v50 = vrot.slane %v1664_v52, %v4165_v20  ;;  %v6925_v15 = vld [vmem:[#allocation54_spill] sm:$0xff]  ;;  %v6926_v3 = vld [vmem:[#allocation85_spill] sm:$0xff] }
 0x1d4   : > { %v1150_v47 = vcombine.low %v5819_v37, %v5816_v39  ;;  %v2008_v22 = vcombine.high %v6924_v57, %v6923_v4  ;;  %v1992_v34 = vcombine.high %v6926_v3, %v6925_v15  ;;  %v1920_v61 = vcombine.high %v5643_v24, %v5640_v62 }
 0x1d5   : > { %v2516_v49 = vcombine.high %v5707_v60, %v5679_v45  ;;  %v3175_v1 = vcombine.high %v5690_v18, %v5676_v0  ;;  %v5872_v43 = vrot.slane %v1696_v31, %v4165_v20  ;;  %v5875_v52 = vrot.slane %v1118_v17, %v4165_v20 }
 0x1d6   : > { %v5857_v38 = vrot.slane %v1150_v47, %v4165_v20  ;;  %2164 = vrot.lane.b32.xlu1 %v2122_v12, %s4071_s23  ;;  %2937 = vrot.lane.b32.xlu0 %v2781_v58, %s4076_s28  ;;  %v2359_v47 = vcombine.low %v5833_v55, %v5830_v53  ;;  %v5880_v62 = vrot.slane %v2040_v32, %v4133_v8 }
 0x1d7   : > { %v5883_v24 = vrot.slane %v2024_v23, %v4133_v8  ;;  %v1966_v45 = vrot.slane %v1952_v54, %v4165_v20  ;;  %v2327_v18 = vcombine.low %v5851_v59, %v5848_v6  ;;  %v2729_v0 = vcombine.high %v5493_v56, %v5490_v35 }
 0x1d8   : > { %6922 = vst [vmem:[#allocation94_spill] sm:$0xff] %v5857_v38  ;;  %v2761_v60 = vcombine.high %v5531_v11, %v5528_v33  ;;  %v5895_v31 = vrot.slane %v2008_v22, %v4133_v8  ;;  %v5898_v17 = vrot.slane %v1992_v34, %v4133_v8  ;;  %v1934_v32 = vrot.slane %v1920_v61, %v4165_v20 }
 0x1d9   : > { %v2103_v35 = vcombine.low %v5883_v24, %v5880_v62  ;;  %v5906_v11 = vrot.slane %v2359_v47, %v4165_v20  ;;  %v1729_v33 = vcombine.low %v5854_v50, %v5872_v43  ;;  %v5911_v36 = vrot.slane %v2729_v0, %v4165_v20 }
 0x1da   : > { %2564 = vrot.lane.b32.xlu1 %v2516_v49, %s4076_s28  ;;  %3337 = vrot.lane.b32.xlu0 %v3175_v1, %s4077_s29  ;;  %v1985_v56 = vcombine.low %v1934_v32, %v1966_v45  ;;  %v5914_v23 = vrot.slane %v2761_v60, %v4165_v20  ;;  %v1527_v54 = vcombine.low %v5772_v44, %v5760_v28  ;;  %v5944_v49 = vpop.permute.xlu1 %3705 }
 0x1db   : > { %v2071_v12 = vcombine.low %v5898_v17, %v5895_v31  ;;  %v2335_v4 = vrot.slane %v2327_v18, %v4165_v20  ;;  %v1559_v57 = vcombine.low %v5778_v2, %v5775_v48  ;;  %v2496_v22 = vcombine.high %v5590_v40, %v5587_v14  ;;  %v5957_v18 = vpop.permute.xlu0 %3733 }
 0x1dc   : > { %v5929_v3 = vrot.slane %v2103_v35, %v4165_v20  ;;  %v2782_v34 = vcombine.low %v5911_v36, %v5914_v23  ;;  %v2464_v61 = vcombine.high %v5609_v63, %v5606_v10  ;;  %v6928_v35 = vld [vmem:[#allocation86_spill] sm:$0xff]  ;;  %v1888_v58 = vcombine.high %v5543_v9, %v5577_v21  ;;  %v6938_v9 = vld [vmem:[#allocation23_spill] sm:$0xff] }
 0x1dd   : > { %v2379_v15 = vcombine.low %v2335_v4, %v5906_v11  ;;  %v2079_v14 = vrot.slane %v2071_v12, %v4165_v20  ;;  %v5942_v40 = vrot.slane %v1559_v57, %v4165_v20  ;;  %v5948_v47 = vrot.slane %v2496_v22, %v4165_v20  ;;  %v6931_v12 = vld [vmem:[#allocation67_spill] sm:$0xff]  ;;  %v6932_v57 = vld [vmem:[#allocation65_spill] sm:$0xff]  ;;  %v6939_v21 = vld [vmem:[#allocation22_spill] sm:$0xff] }
 0x1de   : > { %2973 = vrot.lane.b32.xlu1 %v2919_v26, %s4077_s29  ;;  %2132 = vrot.lane.b32.xlu0 %v1985_v56, %s4074_s26  ;;  %v5934_v26 = vrot.slane %v1527_v54, %v4165_v20  ;;  %v5953_v10 = vrot.slane %v2464_v61, %v4165_v20  ;;  %v6929_v56 = vld [vmem:[#allocation16_spill] sm:$0xff]  ;;  %v1616_v22 = vcombine.high %v6932_v57, %v6931_v12  ;;  %v6937_v12 = vld [vmem:[#allocation70_spill] sm:$0xff] }
 0x1df   : > { %v2123_v1 = vcombine.low %v2079_v14, %v5929_v3 }
 0x1e0   : > { %6927 = vst [vmem:[#allocation91_spill] sm:$0xff] %v5934_v26  ;;  %v1592_v63 = vcombine.high %v5934_v26, %v5942_v40  ;;  %v2517_v60 = vcombine.low %v5953_v10, %v5948_v47 }
 0x1e2   : > { %1768 = vrot.lane.b32.xlu1 %v1729_v33, %s4074_s26  ;;  %2532 = vrot.lane.b32.xlu0 %v2379_v15, %s4073_s25  ;;  %v6930_v33 = vcombine.low %v6928_v35, %v6929_v56  ;;  %v6933_v15 = vld [vmem:[#allocation68_spill] sm:$0xff] }
 0x1e6   : > { %2168 = vrot.lane.b32.xlu1 %v2123_v1, %s4073_s25  ;;  %2941 = vrot.lane.b32.xlu0 %v2782_v34, %s4075_s27  ;;  %v6934_v34 = vld [vmem:[#allocation66_spill] sm:$0xff]  ;;  %v1904_v1 = vcombine.high %v5541_v13, %v5575_v27  ;;  %v1528_v13 = vcombine.high %v5772_v44, %v5760_v28  ;;  %v1872_v27 = vcombine.high %v6938_v9, %v5512_v5  ;;  %v6945_v9 = vld [vmem:[#allocation3_spill] sm:$0xff] }
 0x1e7   : > { %v1600_v61 = vcombine.high %v6934_v34, %v6933_v15  ;;  %v1730_v15 = vcombine.high %v5854_v50, %v5872_v43  ;;  %v5993_v34 = vpop.permute.xlu0 %3737  ;;  %v6000_v50 = vrot.slane %v1616_v22, %v4133_v8  ;;  %v6009_v28 = vrot.slane %v1888_v58, %v4133_v8 }
 0x1e8   : > { %v3342_v0 = vpop.permute.xlu1 %3341  ;;  %v6006_v5 = vrot.slane %v1904_v1, %v4133_v8  ;;  %v6023_v22 = vrot.slane %v1528_v13, %v4165_v20  ;;  %v6944_v13 = vld [vmem:[#allocation5_spill] sm:$0xff] }
 0x1e9   : > { %v5965_v54 = vsel %vm575_vm2, %v6930_v33, %v3342_v0  ;;  %v1986_v0 = vcombine.high %v1934_v32, %v1966_v45  ;;  %v6936_v33 = vld [vmem:[#allocation18_spill] sm:$0xff]  ;;  %v6940_v45 = vld [vmem:[#allocation21_spill] sm:$0xff]  ;;  %v6003_v44 = vrot.slane %v1600_v61, %v4133_v8  ;;  %v6026_v61 = vrot.slane %v1872_v27, %v4133_v8 }
 0x1ea   : > { %2568 = vrot.lane.b32.xlu1 %v2517_v60, %s4075_s27  ;;  %1736 = vrot.lane.b32.xlu0 %v1592_v63, %s4072_s24  ;;  %v1319_v60 = vcombine.high %v5809_v29, %v5791_v41  ;;  %v6935_v63 = vld [vmem:[#allocation69_spill] sm:$0xff]  ;;  %v1632_v57 = vcombine.high %v6937_v12, %v6936_v33  ;;  %v1856_v32 = vcombine.high %v6940_v45, %v6939_v21  ;;  %v6946_v21 = vld [vmem:[#allocation10_spill] sm:$0xff]  ;;  %v6947_v45 = vld [vmem:[#allocation8_spill] sm:$0xff] }
 0x1eb   : > { %v1648_v56 = vcombine.high %v6935_v63, %v6881_v51  ;;  %v1560_v51 = vcombine.high %v5778_v2, %v5775_v48  ;;  %v2783_v2 = vcombine.high %v5911_v36, %v5914_v23  ;;  %v1287_v36 = vcombine.high %v5726_v16, %v5739_v25  ;;  %v6040_v23 = vpop.permute.xlu0 %3709  ;;  %v6942_v16 = vld [vmem:[#allocation6_spill] sm:$0xff] }
 0x1ec   : > { %v5977_v35 = vpop.permute.xlu1 %3741  ;;  %v6018_v48 = vrot.slane %v1632_v57, %v4133_v8  ;;  %v6029_v58 = vrot.slane %v1856_v32, %v4133_v8  ;;  %v2124_v63 = vcombine.high %v2079_v14, %v5929_v3  ;;  %v6941_v57 = vld [vmem:[#allocation102_spill] sm:$0xff]  ;;  %v6943_v3 = vld [vmem:[#allocation4_spill] sm:$0xff]  ;;  %v1464_v27 = vcombine.high %v6945_v9, %v6944_v13  ;;  %v6950_v13 = vld [vmem:[#allocation59_spill] sm:$0xff] }
 0x1ed   : > { %v1480_v14 = vcombine.high %v6943_v3, %v6942_v16  ;;  %v1512_v32 = vcombine.high %v6947_v45, %v6946_v21  ;;  %v6073_v16 = vrot.slane %v1287_v36, %v4165_v20  ;;  %v2328_v3 = vcombine.high %v5851_v59, %v5848_v6  ;;  %v6951_v9 = vld [vmem:[#allocation61_spill] sm:$0xff] }
 0x1ee   : > { %2136 = vrot.lane.b32.xlu0 %v1986_v0, %s4071_s23  ;;  %1355 = vrot.lane.b32.xlu1 %v1319_v60, %s4072_s24  ;;  %v2380_v0 = vcombine.high %v2335_v4, %v5906_v11  ;;  %v6015_v60 = vrot.slane %v1648_v56, %v4133_v8  ;;  %v6034_v11 = vrot.slane %v1560_v51, %v4165_v20  ;;  %v6948_v51 = vld [vmem:[#allocation9_spill] sm:$0xff] }
 0x1ef   : > { %v1967_v4 = vcombine.low %v6009_v28, %v6006_v5  ;;  %v1679_v56 = vcombine.low %v6003_v44, %v6000_v50  ;;  %v1935_v12 = vcombine.low %v6029_v58, %v6026_v61  ;;  %v6952_v21 = vcombine.low %v6950_v13, %v6951_v9 }
 0x1f0   : > { %v6011_v43 = vpop.permute.xlu1 %3345  ;;  %v1711_v33 = vcombine.low %v6018_v48, %v6015_v60  ;;  %v1593_v25 = vcombine.low %v6023_v22, %v6034_v11  ;;  %v2104_v59 = vcombine.high %v5883_v24, %v5880_v62  ;;  %v2072_v24 = vcombine.high %v5898_v17, %v5895_v31 }
 0x1f1   : > { %v6070_v26 = vrot.slane %v1967_v4, %v4165_v20  ;;  %v1119_v17 = vcombine.high %v5769_v30, %v5796_v46  ;;  %v1183_v46 = vcombine.high %v5875_v52, %v5857_v38  ;;  %v1594_v9 = vcombine.high %v6023_v22, %v6034_v11 }
 0x1f2   : > { %2536 = vrot.lane.b32.xlu0 %v2380_v0, %s4076_s28  ;;  %1772 = vrot.lane.b32.xlu1 %v1730_v15, %s4071_s23  ;;  %v1255_v15 = vcombine.high %v6941_v57, %v5723_v19  ;;  %v6949_v0 = vld [vmem:[#allocation7_spill] sm:$0xff]  ;;  %v2360_v19 = vcombine.high %v5833_v55, %v5830_v53  ;;  %v2518_v57 = vcombine.high %v5953_v10, %v5948_v47 }
 0x1f3   : > { %v1496_v42 = vcombine.high %v6949_v0, %v6948_v51  ;;  %v6082_v53 = vrot.slane %v1679_v56, %v4165_v20  ;;  %v6085_v55 = vrot.slane %v1711_v33, %v4165_v20  ;;  %v1943_v47 = vrot.slane %v1935_v12, %v4165_v20 }
 0x1f4   : > { %v6042_v1 = vpop.permute.xlu1 %3745  ;;  %v6091_v10 = vrot.slane %v1255_v15, %v4165_v20  ;;  %v6105_v12 = vrot.slane %v1480_v14, %v4133_v8  ;;  %v6108_v15 = vrot.slane %v1464_v27, %v4133_v8  ;;  %v6111_v51 = vrot.slane %v1512_v32, %v4133_v8 }
 0x1f5   : > { %v1987_v56 = vcombine.low %v1943_v47, %v6070_v26  ;;  %v6114_v62 = vrot.slane %v1496_v42, %v4133_v8  ;;  %v2342_v0 = vrot.slane %v2328_v3, %v4165_v20  ;;  %v1731_v14 = vcombine.low %v6082_v53, %v6085_v55 }
 0x1f6   : > { %2945 = vrot.lane.b32.xlu0 %v2783_v2, %s4077_s29  ;;  %2172 = vrot.lane.b32.xlu1 %v2124_v63, %s4076_s28  ;;  %v1320_v33 = vcombine.low %v6091_v10, %v6073_v16  ;;  %v1151_v27 = vcombine.high %v5819_v37, %v5816_v39  ;;  %v1543_v31 = vcombine.low %v6108_v15, %v6105_v12 }
 0x1f7   : > { %v6139_v39 = vrot.slane %v2072_v24, %v4165_v20  ;;  %v1575_v37 = vcombine.low %v6114_v62, %v6111_v51  ;;  %v1936_v22 = vcombine.high %v6029_v58, %v6026_v61  ;;  %v6956_v58 = vld [vmem:[#allocation26_spill] sm:$0xff] }
 0x1f8   : > { %v3318_v2 = vpop.permute.xlu1 %3317  ;;  %v3314_v63 = vpop.permute.xlu0 %3313  ;;  %v1165_v30 = vrot.slane %v1151_v27, %v4165_v20 }
 0x1f9   : > { %v3368_v45 = vsel %vm575_vm2, %v6952_v21, %v3314_v63  ;;  %v1133_v21 = vrot.slane %v1119_v17, %v4165_v20  ;;  %v1950_v61 = vrot.slane %v1936_v22, %v4165_v20  ;;  %v6962_v22 = vld [vmem:[#allocation51_spill] sm:$0xff] }
 0x1fa   : > { %1740 = vrot.lane.b32.xlu0 %v1593_v25, %s4074_s26  ;;  %2572 = vrot.lane.b32.xlu1 %v2518_v57, %s4077_s29  ;;  %v3369_v6 = vsel %vm577_vm3, %v3368_v45, %v3318_v2  ;;  %v2374_v25 = vrot.slane %v2360_v19, %v4165_v20  ;;  %v6130_v2 = vrot.slane %v2104_v59, %v4165_v20 }
 0x1fb   : > { %v6159_v45 = vrot.slane %v1543_v31, %v4165_v20  ;;  %v1583_v59 = vrot.slane %v1575_v37, %v4165_v20  ;;  %v1184_v24 = vcombine.low %v1133_v21, %v1165_v30  ;;  %v6954_v31 = vld [vmem:[#allocation93_spill] sm:$0xff] }
 0x1fc   : > { %v6096_v4 = vpop.permute.xlu1 %3717  ;;  %v6098_v36 = vpop.permute.xlu0 %3713  ;;  %v2381_v42 = vcombine.low %v2342_v0, %v2374_v25  ;;  %v2125_v3 = vcombine.low %v6139_v39, %v6130_v2 }
 0x1fd   : > { %v1595_v11 = vcombine.low %v6159_v45, %v1583_v59 }
 0x1fe   : > { %2140 = vrot.lane.b32.xlu0 %v1987_v56, %s4073_s25  ;;  %1359 = vrot.lane.b32.xlu1 %v1320_v33, %s4074_s26  ;;  %v1968_v56 = vcombine.high %v6009_v28, %v6006_v5  ;;  %v6953_v28 = vld [vmem:[#allocation95_spill] sm:$0xff] }
 0x1ff   : > { %v6955_v17 = vcombine.low %v6953_v28, %v6954_v31  ;;  %v2382_v28 = vcombine.high %v2342_v0, %v2374_v25  ;;  %v6961_v31 = vld [vmem:[#allocation47_spill] sm:$0xff] }
 0x200   : > { %v6125_v32 = vpop.permute.xlu1 %2921  ;;  %v6127_v19 = vpop.permute.xlu0 %2949  ;;  %v6175_v5 = vrot.slane %v1968_v56, %v4165_v20 }
 0x202   : > { %2540 = vrot.lane.b32.xlu0 %v2381_v42, %s4075_s27  ;;  %1776 = vrot.lane.b32.xlu1 %v1731_v14, %s4073_s25  ;;  %v1988_v42 = vcombine.high %v1943_v47, %v6070_v26 }
 0x204   : > { %v3322_v63 = vpop.permute.xlu1 %3321  ;;  %v6143_v57 = vpop.permute.xlu0 %3349 }
 0x205   : > { %v6151_v13 = vsel %vm579_vm4, %v3369_v6, %v3322_v63  ;;  %v6957_v63 = vld [vmem:[#allocation25_spill] sm:$0xff] }
 0x206   : > { %2176 = vrot.lane.b32.xlu1 %v2125_v3, %s4075_s27  ;;  %1327 = vrot.lane.b32.xlu0 %v1183_v46, %s4072_s24  ;;  %v1223_v3 = vcombine.high %v6957_v63, %v6956_v58  ;;  %v6958_v46 = vld [vmem:[#allocation99_spill] sm:$0xff] }
 0x208   : > { %v6164_v33 = vpop.permute.xlu1 %3721  ;;  %v3750_v6 = vpop.permute.xlu0 %3749  ;;  %v6200_v58 = vrot.slane %v1223_v3, %v4133_v8  ;;  %v1185_v3 = vcombine.high %v1133_v21, %v1165_v30  ;;  %v6969_v21 = vld [vmem:[#allocation107_spill] sm:$0xff] }
 0x20a   : > { %1331 = vrot.lane.b32.xlu1 %v1184_v24, %s4074_s26  ;;  %1744 = vrot.lane.b32.xlu0 %v1594_v9, %s4071_s23  ;;  %v6959_v9 = vld [vmem:[#allocation13_spill] sm:$0xff]  ;;  %v1989_v24 = vcombine.low %v1950_v61, %v6175_v5 }
 0x20b   : > { %v1239_v26 = vcombine.high %v6959_v9, %v6958_v46  ;;  %v6964_v46 = vld [vmem:[#allocation57_spill] sm:$0xff]  ;;  %v6965_v9 = vld [vmem:[#allocation58_spill] sm:$0xff] }
 0x20c   : > { %v2549_v14 = vpop.permute.xlu1 %2548  ;;  %v6171_v27 = vpop.permute.xlu0 %2953  ;;  %v6966_v25 = vcombine.low %v6964_v46, %v6965_v9 }
 0x20d   : > { %v2582_v37 = vsel %vm575_vm2, %v6955_v17, %v2549_v14  ;;  %v6960_v14 = vld [vmem:[#allocation28_spill] sm:$0xff]  ;;  %v6203_v63 = vrot.slane %v1239_v26, %v4133_v8  ;;  %v1321_v26 = vcombine.high %v6091_v10, %v6073_v16  ;;  %v1732_v16 = vcombine.high %v6082_v53, %v6085_v55 }
 0x20e   : > { %1748 = vrot.lane.b32.xlu1 %v1595_v11, %s4073_s25  ;;  %2144 = vrot.lane.b32.xlu0 %v1988_v42, %s4076_s28  ;;  %v1207_v11 = vcombine.high %v6961_v31, %v6960_v14  ;;  %v6963_v42 = vld [vmem:[#allocation43_spill] sm:$0xff]  ;;  %v3767_v0 = vsel %vm575_vm2, %v6966_v25, %v5957_v18  ;;  %v6967_v14 = vld [vmem:[#allocation60_spill] sm:$0xff]  ;;  %v1596_v18 = vcombine.high %v6159_v45, %v1583_v59 }
 0x20f   : > { %v1191_v17 = vcombine.high %v6963_v42, %v6962_v22  ;;  %v6970_v45 = vld [vmem:[#allocation103_spill] sm:$0xff] }
 0x210   : > { %v6188_v47 = vpop.permute.xlu1 %2957  ;;  %v6190_v56 = vpop.permute.xlu0 %3353  ;;  %v1103_v59 = vcombine.high %v6970_v45, %v6969_v21 }
 0x211   : > { %v1205_v10 = vrot.slane %v1191_v17, %v4133_v8 }
 0x212   : > { %2148 = vrot.lane.b32.xlu1 %v1989_v24, %s4075_s27  ;;  %2544 = vrot.lane.b32.xlu0 %v2382_v28, %s4077_s29  ;;  %v3768_v24 = vsel %vm577_vm3, %v3767_v0, %v5993_v34  ;;  %v6968_v28 = vld [vmem:[#allocation62_spill] sm:$0xff]  ;;  %v6222_v34 = vrot.slane %v1207_v11, %v4133_v8 }
 0x213   : > { %v2776_v31 = vcombine.low %v6968_v28, %v6967_v14  ;;  %v3769_v42 = vsel %vm579_vm4, %v3768_v24, %v5977_v35  ;;  %v1302_v35 = vcombine.low %v6200_v58, %v6203_v63  ;;  %v1712_v24 = vcombine.high %v6018_v48, %v6015_v60  ;;  %v6972_v14 = vld [vmem:[#allocation98_spill] sm:$0xff]  ;;  %v6973_v28 = vld [vmem:[#allocation48_spill] sm:$0xff] }
 0x214   : > { %v6214_v38 = vpop.permute.xlu1 %3357  ;;  %v3754_v22 = vpop.permute.xlu0 %3753  ;;  %v3770_v46 = vsel %vm581_vm5, %v3769_v42, %v6042_v1  ;;  %v6971_v1 = vld [vmem:[#allocation104_spill] sm:$0xff]  ;;  %v1990_v42 = vcombine.high %v1950_v61, %v6175_v5  ;;  %v1303_v5 = vcombine.high %v6200_v58, %v6203_v63 }
 0x215   : > { %v3771_v30 = vsel %vm583_vm6, %v3770_v46, %v3750_v6  ;;  %v1087_v11 = vcombine.high %v6971_v1, %v5786_v7  ;;  %v2976_v9 = vsel %vm575_vm2, %v2776_v31, %v6125_v32  ;;  %v1680_v6 = vcombine.high %v6003_v44, %v6000_v50  ;;  %v6974_v31 = vld [vmem:[#allocation52_spill] sm:$0xff] }
 0x216   : > { %1335 = vrot.lane.b32.xlu1 %v1185_v3, %s4071_s23  ;;  %1363 = vrot.lane.b32.xlu0 %v1321_v26, %s4071_s23  ;;  %v3772_v25 = vsel %vm585_vm7, %v3771_v30, %v3754_v22  ;;  %v1270_v7 = vcombine.low %v1205_v10, %v6222_v34  ;;  %v1071_v32 = vcombine.high %v6973_v28, %v6972_v14  ;;  %v6975_v22 = vld [vmem:[#allocation44_spill] sm:$0xff] }
 0x217   : > { %v1055_v3 = vcombine.high %v6975_v22, %v6974_v31  ;;  %v2126_v26 = vcombine.high %v6139_v39, %v6130_v2  ;;  %v1117_v50 = vrot.slane %v1103_v59, %v4133_v8  ;;  %v1101_v44 = vrot.slane %v1087_v11, %v4133_v8 }
 0x218   : > { %v3758_v53 = vpop.permute.xlu1 %3757  ;;  %v2926_v55 = vpop.permute.xlu0 %2925  ;;  %v1726_v30 = vrot.slane %v1712_v24, %v4165_v20  ;;  %v1085_v2 = vrot.slane %v1071_v32, %v4133_v8  ;;  %v1278_v39 = vrot.slane %v1270_v7, %v4165_v20  ;;  %v1544_v11 = vcombine.high %v6108_v15, %v6105_v12  ;;  %v6976_v12 = vld [vmem:[#allocation53_spill] sm:$0xff]  ;;  %v6977_v15 = vld [vmem:[#allocation20_spill] sm:$0xff] }
 0x219   : > { %v6242_v17 = vsel %vm577_vm3, %v2976_v9, %v2926_v55  ;;  %v3773_v0 = vsel %vm587_vm8, %v3772_v25, %v3758_v53  ;;  %v1069_v21 = vrot.slane %v1055_v3, %v4133_v8  ;;  %v1166_v61 = vcombine.low %v1101_v44, %v1117_v50 }
 0x21a   : > { %1752 = vrot.lane.b32.xlu1 %v1596_v18, %s4076_s28  ;;  %1780 = vrot.lane.b32.xlu0 %v1732_v16, %s4076_s28  ;;  %v1310_v18 = vrot.slane %v1302_v35, %v4165_v20  ;;  %v1694_v16 = vrot.slane %v1680_v6, %v4165_v20  ;;  %v1576_v9 = vcombine.high %v6114_v62, %v6111_v51 }
 0x21b   : > { %3813 = vmatprep.subr.mxu0 %v3773_v0  ;;  %v1271_v25 = vcombine.high %v1205_v10, %v6222_v34  ;;  %v1134_v53 = vcombine.low %v1069_v21, %v1085_v2  ;;  %v1167_v58 = vcombine.high %v1101_v44, %v1117_v50  ;;  %v6286_v0 = vrot.slane %v1303_v5, %v4165_v20  ;;  %v6980_v50 = vld [vmem:[#allocation64_spill] sm:$0xff] }
 0x21c   : > { %v2553_v60 = vpop.permute.xlu1 %2552  ;;  %v6260_v48 = vpop.permute.xlu0 %3325  ;;  %v1323_v45 = vcombine.high %v1278_v39, %v1310_v18  ;;  %v1322_v59 = vcombine.low %v1278_v39, %v1310_v18  ;;  %v1734_v1 = vcombine.high %v1694_v16, %v1726_v30  ;;  %v1733_v8 = vcombine.low %v1694_v16, %v1726_v30  ;;  %v6983_v18 = vld [vmem:[#allocation24_spill] sm:$0xff] }
 0x21d   : > { %v6265_v46 = vsel %vm577_vm3, %v2582_v37, %v2553_v60  ;;  %v1174_v6 = vrot.slane %v1166_v61, %v4165_v20  ;;  %v6978_v24 = vcombine.low %v6976_v12, %v6977_v15  ;;  %v1558_v62 = vrot.slane %v1544_v11, %v4165_v20 }
 0x21e   : > { %2152 = vrot.lane.b32.xlu1 %v1990_v42, %s4077_s29  ;;  %2180 = vrot.lane.b32.xlu0 %v2126_v26, %s4077_s29  ;;  %v1590_v34 = vrot.slane %v1576_v9, %v4165_v20  ;;  %v1135_v10 = vcombine.high %v1069_v21, %v1085_v2  ;;  %v1285_v7 = vrot.slane %v1271_v25, %v4165_v20  ;;  %v6979_v26 = vld [vmem:[#allocation63_spill] sm:$0xff]  ;;  %v4081_v12 = vmov 0  }
 0x21f   : > { %v1142_v14 = vrot.slane %v1134_v53, %v4165_v20  ;;  %v1181_v3 = vrot.slane %v1167_v58, %v4165_v20  ;;  %v6981_v44 = vcombine.low %v6979_v26, %v6980_v50  ;;  %v6982_v42 = vld [vmem:[#allocation27_spill] sm:$0xff]  ;;  %4027 = vset.pattern.permute.xlu0 %v4081_v12  ;;  %4028 = vset.pattern.permute.xlu1 %v4081_v12  ;;  %v6988_v26 = vld [vmem:[#allocation88_spill] sm:$0xff] }
 0x220   : > { %v6276_v37 = vpop.permute.xlu1 %2961  ;;  %v3726_v35 = vpop.permute.xlu0 %3725  ;;  %v1324_v31 = vcombine.low %v1285_v7, %v6286_v0  ;;  %v6984_v16 = vcombine.low %v6982_v42, %v6983_v18  ;;  %v1149_v39 = vrot.slane %v1135_v10, %v4165_v20  ;;  %v1597_v21 = vcombine.low %v1558_v62, %v1590_v34  ;;  %v6989_v50 = vld [vmem:[#allocation87_spill] sm:$0xff] }
 0x221   : > { %v1186_v22 = vcombine.low %v1142_v14, %v1174_v6  ;;  %v3760_v60 = vsel %vm575_vm2, %v6981_v44, %v5944_v49  ;;  %v3376_v20 = vsel %vm577_vm3, %v5965_v54, %v6011_v43  ;;  %v1187_v25 = vcombine.high %v1142_v14, %v1174_v6 }
 0x222   : > { %1371 = vrot.lane.b32.xlu1 %v1323_v45, %s4076_s28  ;;  %1367 = vrot.lane.b32.xlu0 %v1322_v59, %s4073_s25  ;;  %v3761_v2 = vsel %vm577_vm3, %v3760_v60, %v6040_v23  ;;  %v1188_v45 = vcombine.low %v1149_v39, %v1181_v3  ;;  %v1189_v9 = vcombine.high %v1149_v39, %v1181_v3 }
 0x223   : > { %v3762_v5 = vsel %vm579_vm4, %v3761_v2, %v6098_v36  ;;  %v1325_v15 = vcombine.high %v1285_v7, %v6286_v0  ;;  %v2912_v44 = vcombine.low %v6989_v50, %v6988_v26 }
 0x224   : > { %v3362_v63 = vpop.permute.xlu1 %3361  ;;  %v2521_v55 = vpop.permute.xlu0 %2520  ;;  %v3763_v59 = vsel %vm581_vm5, %v3762_v5, %v6096_v4  ;;  %v3377_v4 = vsel %vm579_vm4, %v3376_v20, %v6143_v57  ;;  %v3878_v57 = vld [vmem:[%s6555_s3] sm:$0xff]  ;;  %v6991_v20 = vld [vmem:[#allocation105_spill] sm:$0xff] }
 0x225   : > { %v2575_v51 = vsel %vm575_vm2, %v6978_v24, %v2521_v55  ;;  %v3764_v23 = vsel %vm583_vm6, %v3763_v59, %v6164_v33  ;;  %v1598_v33 = vcombine.high %v1558_v62, %v1590_v34  ;;  %v4080_v55 = vmov 0.0  }
 0x226   : > { %1788 = vrot.lane.b32.xlu1 %v1734_v1, %s4077_s29  ;;  %1784 = vrot.lane.b32.xlu0 %v1733_v8, %s4075_s27  ;;  %v3765_v36 = vsel %vm585_vm7, %v3764_v23, %v3726_v35  ;;  %v3378_v8 = vsel %vm581_vm5, %v3377_v4, %v6190_v56 }
 0x227   : > { %v3379_v54 = vsel %vm583_vm6, %v3378_v8, %v6214_v38  ;;  %3863 = vmatprep.mubr.f32.mxu0 %v4080_v55 }
 0x228   : > { %v2157_v28 = vpop.permute.xlu1 %2156  ;;  %v6299_v32 = vpop.permute.xlu0 %2929  ;;  %v3380_v43 = vsel %vm585_vm7, %v3379_v54, %v3362_v63 }
 0x229   : > { %v2190_v30 = vsel %vm575_vm2, %v6984_v16, %v2157_v28  ;;  %v6985_v28 = vld [vmem:[#allocation101_spill] sm:$0xff]  ;;  %v3371_v16 = vsel %vm581_vm5, %v6151_v13, %v6260_v48 }
 0x22a   : > { %1375 = vrot.lane.b32.xlu1 %v1324_v31, %s4075_s27  ;;  %1339 = vrot.lane.b32.xlu0 %v1186_v22, %s4073_s25  ;;  %v6986_v31 = vld [vmem:[#allocation100_spill] sm:$0xff] }
 0x22b   : > { %v6987_v22 = vcombine.low %v6985_v28, %v6986_v31 }
 0x22c   : > { %v6319_v61 = vpop.permute.xlu1 %2556  ;;  %v3330_v49 = vpop.permute.xlu0 %3329 }
 0x22d   : > { %v3372_v2 = vsel %vm583_vm6, %v3371_v16, %v3330_v49  ;;  %v6990_v49 = vld [vmem:[#allocation106_spill] sm:$0xff] }
 0x22e   : > { %1347 = vrot.lane.b32.xlu1 %v1188_v45, %s4075_s27  ;;  %1756 = vrot.lane.b32.xlu0 %v1597_v21, %s4075_s27 }
 0x230   : > { %v2966_v1 = vpop.permute.xlu1 %2965  ;;  %v3730_v11 = vpop.permute.xlu0 %3729 }
 0x231   : > { %v3766_v53 = vsel %vm587_vm8, %v3765_v36, %v3730_v11 }
 0x232   : > { %1351 = vrot.lane.b32.xlu1 %v1189_v9, %s4077_s29  ;;  %1343 = vrot.lane.b32.xlu0 %v1187_v25, %s4076_s28 }
 0x233   : > { %3814 = vmatpush1.msra.mxu0 %v3766_v53 }
 0x234   : > { %v3366_v35 = vpop.permute.xlu1 %3365  ;;  %v2525_v58 = vpop.permute.xlu0 %2524 }
 0x235   : > { %v6345_v56 = vsel %vm577_vm3, %v2575_v51, %v2525_v58  ;;  %v3381_v6 = vsel %vm587_vm8, %v3380_v43, %v3366_v35  ;;  %v3870_v51 = vld [vmem:[%s6554_s2] sm:$0xff]  ;;  %v6992_v35 = vcombine.low %v5809_v29, %v5791_v41  ;;  %v2584_v41 = vsel %vm579_vm4, %v6265_v46, %v6319_v61 }
 0x236   : > { %1760 = vrot.lane.b32.xlu0 %v1598_v33, %s4077_s29  ;;  %3815 = vmatprep.subr.mxu0 %v3381_v6  ;;  %v2978_v6 = vsel %vm579_vm4, %v6242_v17, %v6299_v32 }
 0x237   : > { %3881 = vperm.xlu1 %4028, %v3878_v57  }
 0x238   : > { %v2161_v38 = vpop.permute.xlu1 %2160  ;;  %v2934_v63 = vpop.permute.xlu0 %2933 }
 0x239   : > { %v2191_v24 = vsel %vm577_vm3, %v2190_v30, %v2161_v38  ;;  %v2983_v30 = vsel %vm575_vm2, %v2912_v44, %v6127_v19  ;;  %v2979_v12 = vsel %vm581_vm5, %v2978_v6, %v2934_v63 }
 0x23a   : > { %1379 = vrot.lane.b32.xlu0 %v1325_v15, %s4077_s29  ;;  %v2984_v39 = vsel %vm577_vm3, %v2983_v30, %v6171_v27  ;;  %v1727_v27 = vcombine.low %v6991_v20, %v6990_v49 }
 0x23b   : > { %v2985_v59 = vsel %vm579_vm4, %v2984_v39, %v6188_v47 }
 0x23c   : > { %v2561_v62 = vpop.permute.xlu1 %2560  ;;  %v3334_v34 = vpop.permute.xlu0 %3333  ;;  %v2986_v13 = vsel %vm581_vm5, %v2985_v59, %v6276_v37 }
 0x23d   : > { %v3373_v21 = vsel %vm585_vm7, %v3372_v2, %v3334_v34  ;;  %v2987_v19 = vsel %vm583_vm6, %v2986_v13, %v2966_v1  ;;  %v2585_v34 = vsel %vm581_vm5, %v2584_v41, %v2561_v62 }
 0x23e   : > { %3873 = vperm.xlu0 %4027, %v3870_v51  }
 0x240   : > { %v2970_v10 = vpop.permute.xlu1 %2969  ;;  %v2129_v14 = vpop.permute.xlu0 %2128 }
 0x241   : > { %v6359_v3 = vsel %vm575_vm2, %v6987_v22, %v2129_v14  ;;  %v2988_v48 = vsel %vm585_vm7, %v2987_v19, %v2970_v10 }
 0x244   : > { %v1765_v0 = vpop.permute.xlu1 %1764  ;;  %v6361_v7 = vpop.permute.xlu0 %2528 }
 0x245   : > { %v1798_v47 = vsel %vm575_vm2, %v1727_v27, %v1765_v0 }
 0x248   : > { %v2165_v60 = vpop.permute.xlu1 %2164  ;;  %v2938_v42 = vpop.permute.xlu0 %2937 }
 0x249   : > { %v6366_v18 = vsel %vm579_vm4, %v2191_v24, %v2165_v60  ;;  %v2980_v38 = vsel %vm583_vm6, %v2979_v12, %v2938_v42  ;;  %v2577_v60 = vsel %vm579_vm4, %v6345_v56, %v6361_v7  ;;  %v6994_v12 = vld [vmem:[#allocation30_spill] sm:$0xff] }
 0x24c   : > { %v2565_v5 = vpop.permute.xlu1 %2564  ;;  %v3338_v45 = vpop.permute.xlu0 %3337 }
 0x24d   : > { %v3374_v23 = vsel %vm587_vm8, %v3373_v21, %v3338_v45  ;;  %v2586_v10 = vsel %vm583_vm6, %v2585_v34, %v2565_v5  ;;  %v6999_v34 = vld [vmem:[#allocation35_spill] sm:$0xff] }
 0x24e   : > { %3816 = vmatpush1.msra.mxu0 %v3374_v23 }
 0x250   : > { %v2974_v36 = vpop.permute.xlu1 %2973  ;;  %v2133_v11 = vpop.permute.xlu0 %2132 }
 0x251   : > { %v2989_v9 = vsel %vm587_vm8, %v2988_v48, %v2974_v36  ;;  %v2184_v59 = vsel %vm577_vm3, %v6359_v3, %v2133_v11 }
 0x252   : > { %3817 = vmatprep.subr.mxu0 %v2989_v9 }
 0x254   : > { %v1769_v25 = vpop.permute.xlu1 %1768  ;;  %v2533_v4 = vpop.permute.xlu0 %2532 }
 0x255   : > { %v6389_v53 = vsel %vm577_vm3, %v1798_v47, %v1769_v25  ;;  %v2578_v42 = vsel %vm581_vm5, %v2577_v60, %v2533_v4  ;;  %v7008_v60 = vld [vmem:[#allocation50_spill] sm:$0xff] }
 0x258   : > { %v2169_v37 = vpop.permute.xlu1 %2168  ;;  %v2942_v8 = vpop.permute.xlu0 %2941 }
 0x259   : > { %v2981_v15 = vsel %vm585_vm7, %v2980_v38, %v2942_v8  ;;  %v2193_v7 = vsel %vm581_vm5, %v6366_v18, %v2169_v37  ;;  %v6995_v38 = vld [vmem:[#allocation11_spill] sm:$0xff] }
 0x25c   : > { %v2569_v1 = vpop.permute.xlu1 %2568  ;;  %v6391_v33 = vpop.permute.xlu0 %1736 }
 0x25d   : > { %v2587_v17 = vsel %vm585_vm7, %v2586_v10, %v2569_v1  ;;  %v7000_v10 = vld [vmem:[#allocation14_spill] sm:$0xff] }
 0x260   : > { %v1356_v54 = vpop.permute.xlu1 %1355  ;;  %v2137_v43 = vpop.permute.xlu0 %2136 }
 0x261   : > { %v6397_v58 = vsel %vm575_vm2, %v6992_v35, %v1356_v54  ;;  %v2185_v56 = vsel %vm579_vm4, %v2184_v59, %v2137_v43  ;;  %v7012_v59 = vld [vmem:[#allocation80_spill] sm:$0xff] }
 0x264   : > { %v1773_v55 = vpop.permute.xlu1 %1772  ;;  %v2537_v57 = vpop.permute.xlu0 %2536 }
 0x265   : > { %v2579_v16 = vsel %vm583_vm6, %v2578_v42, %v2537_v57  ;;  %v1800_v25 = vsel %vm579_vm4, %v6389_v53, %v1773_v55  ;;  %v6993_v57 = vld [vmem:[#allocation91_spill] sm:$0xff]  ;;  %v7009_v42 = vld [vmem:[#allocation49_spill] sm:$0xff] }
 0x266   : > { %v1591_v6 = vcombine.low %v6993_v57, %v5942_v40  ;;  %v7005_v40 = vld [vmem:[#allocation46_spill] sm:$0xff] }
 0x268   : > { %v2173_v24 = vpop.permute.xlu1 %2172  ;;  %v2946_v51 = vpop.permute.xlu0 %2945 }
 0x269   : > { %v2982_v29 = vsel %vm587_vm8, %v2981_v15, %v2946_v51  ;;  %v2194_v48 = vsel %vm583_vm6, %v2193_v7, %v2173_v24  ;;  %v6996_v15 = vld [vmem:[#allocation12_spill] sm:$0xff]  ;;  %v7013_v7 = vld [vmem:[#allocation94_spill] sm:$0xff] }
 0x26a   : > { %3818 = vmatpush1.msra.mxu0 %v2982_v29  ;;  %v6997_v24 = vcombine.low %v6995_v38, %v6996_v15  ;;  %v6998_v51 = vld [vmem:[#allocation32_spill] sm:$0xff]  ;;  %v7023_v15 = vld [vmem:[#allocation73_spill] sm:$0xff] }
 0x26c   : > { %v2573_v32 = vpop.permute.xlu1 %2572  ;;  %v1741_v63 = vpop.permute.xlu0 %1740  ;;  %v576_v53 = vsel %vm575_vm2, %v6997_v24, %v6994_v12  ;;  %v7021_v12 = vld [vmem:[#allocation31_spill] sm:$0xff]  ;;  %v7024_v24 = vld [vmem:[#allocation81_spill] sm:$0xff] }
 0x26d   : > { %v2588_v14 = vsel %vm587_vm8, %v2587_v17, %v2573_v32  ;;  %v578_v41 = vsel %vm577_vm3, %v576_v53, %v6998_v51  ;;  %v7001_v17 = vld [vmem:[#allocation15_spill] sm:$0xff] }
 0x26e   : > { %3819 = vmatprep.subr.mxu0 %v2588_v14  ;;  %v7002_v32 = vcombine.low %v7000_v10, %v7001_v17  ;;  %v7026_v10 = vld [vmem:[#allocation84_spill] sm:$0xff] }
 0x270   : > { %v6413_v28 = vpop.permute.xlu1 %1359  ;;  %v2141_v31 = vpop.permute.xlu0 %2140  ;;  %v589_v14 = vsel %vm575_vm2, %v7002_v32, %v6999_v34 }
 0x271   : > { %v2186_v19 = vsel %vm581_vm5, %v2185_v56, %v2141_v31  ;;  %v7003_v31 = vld [vmem:[#allocation72_spill] sm:$0xff] }
 0x274   : > { %v1777_v22 = vpop.permute.xlu1 %1776  ;;  %v2541_v0 = vpop.permute.xlu0 %2540 }
 0x275   : > { %v2580_v30 = vsel %vm585_vm7, %v2579_v16, %v2541_v0  ;;  %v1801_v4 = vsel %vm581_vm5, %v1800_v25, %v1777_v22  ;;  %v7004_v22 = vld [vmem:[#allocation45_spill] sm:$0xff]  ;;  %v7010_v16 = vcombine.low %v7008_v60, %v7009_v42 }
 0x276   : > { %v7006_v0 = vcombine.low %v7004_v22, %v7005_v40 }
 0x278   : > { %v2177_v46 = vpop.permute.xlu1 %2176  ;;  %v1328_v61 = vpop.permute.xlu0 %1327 }
 0x279   : > { %v2195_v20 = vsel %vm585_vm7, %v2194_v48, %v2177_v46  ;;  %v990_v46 = vsel %vm575_vm2, %v7006_v0, %v7003_v31  ;;  %v7027_v31 = vld [vmem:[#allocation39_spill] sm:$0xff] }
 0x27c   : > { %v1332_v26 = vpop.permute.xlu1 %1331  ;;  %v1745_v50 = vpop.permute.xlu0 %1744 }
 0x280   : > { %v1749_v62 = vpop.permute.xlu1 %1748  ;;  %v2145_v44 = vpop.permute.xlu0 %2144 }
 0x281   : > { %v2187_v49 = vsel %vm583_vm6, %v2186_v19, %v2145_v44  ;;  %v7007_v44 = vld [vmem:[#allocation77_spill] sm:$0xff]  ;;  %v7014_v19 = vcombine.low %v5875_v52, %v7013_v7  ;;  %v1390_v52 = vsel %vm577_vm3, %v6397_v58, %v6413_v28 }
 0x283   : > { %v1382_v48 = vsel %vm575_vm2, %v7014_v19, %v1328_v61  ;;  %v3776_v19 = vld [vmem:[%s6553_s1] sm:$0xff] }
 0x284   : > { %v2149_v2 = vpop.permute.xlu1 %2148  ;;  %v2545_v39 = vpop.permute.xlu0 %2544 }
 0x285   : > { %v2581_v21 = vsel %vm587_vm8, %v2580_v30, %v2545_v39  ;;  %v2188_v27 = vsel %vm585_vm7, %v2187_v49, %v2149_v2  ;;  %v997_v30 = vsel %vm575_vm2, %v7010_v16, %v7007_v44  ;;  %v1791_v2 = vsel %vm575_vm2, %v1591_v6, %v6391_v33  ;;  %v7011_v39 = vld [vmem:[#allocation29_spill] sm:$0xff]  ;;  %v7029_v44 = vld [vmem:[#allocation42_spill] sm:$0xff]  ;;  %v7030_v16 = vld [vmem:[#allocation83_spill] sm:$0xff] }
 0x286   : > { %3820 = vmatpush1.msra.mxu0 %v2581_v21  ;;  %v580_v21 = vsel %vm579_vm4, %v578_v41, %v7011_v39  ;;  %v1792_v56 = vsel %vm577_vm3, %v1791_v2, %v1741_v63  ;;  %v7025_v41 = vld [vmem:[#allocation76_spill] sm:$0xff]  ;;  %v7032_v39 = vld [vmem:[#allocation78_spill] sm:$0xff] }
 0x288   : > { %v1336_v5 = vpop.permute.xlu1 %1335  ;;  %v1364_v45 = vpop.permute.xlu0 %1363 }
 0x28c   : > { %v1753_v23 = vpop.permute.xlu1 %1752  ;;  %v1781_v13 = vpop.permute.xlu0 %1780 }
 0x28d   : > { %v1802_v37 = vsel %vm583_vm6, %v1801_v4, %v1781_v13  ;;  %v998_v13 = vsel %vm577_vm3, %v997_v30, %v7012_v59  ;;  %v7018_v4 = vld [vmem:[#allocation79_spill] sm:$0xff]  ;;  %v7033_v59 = vld [vmem:[#allocation41_spill] sm:$0xff] }
 0x28e   : > { %v7031_v30 = vld [vmem:[#allocation75_spill] sm:$0xff] }
 0x290   : > { %v2153_v36 = vpop.permute.xlu1 %2152  ;;  %v2181_v9 = vpop.permute.xlu0 %2180 }
 0x291   : > { %v2196_v3 = vsel %vm587_vm8, %v2195_v20, %v2181_v9  ;;  %v2189_v11 = vsel %vm587_vm8, %v2188_v27, %v2153_v36  ;;  %v7015_v20 = vld [vmem:[#allocation38_spill] sm:$0xff]  ;;  %v7016_v36 = vld [vmem:[#allocation71_spill] sm:$0xff]  ;;  %v1383_v9 = vsel %vm577_vm3, %v1382_v48, %v1332_v26  ;;  %v7035_v48 = vld [vmem:[#allocation36_spill] sm:$0xff] }
 0x292   : > { %3821 = vmatprep.subr.mxu0 %v2196_v3  ;;  %v590_v27 = vsel %vm577_vm3, %v589_v14, %v7015_v20  ;;  %v991_v33 = vsel %vm577_vm3, %v990_v46, %v7016_v36  ;;  %v1793_v3 = vsel %vm579_vm4, %v1792_v56, %v1745_v50  ;;  %v1384_v61 = vsel %vm579_vm4, %v1383_v9, %v1336_v5  ;;  %v7020_v5 = vld [vmem:[#allocation37_spill] sm:$0xff]  ;;  %v7028_v46 = vld [vmem:[#allocation34_spill] sm:$0xff] }
 0x293   : > { %3822 = vmatpush1.msra.mxu0 %v2189_v11  ;;  %v7017_v11 = vld [vmem:[#allocation74_spill] sm:$0xff]  ;;  %v1794_v63 = vsel %vm581_vm5, %v1793_v3, %v1749_v62  ;;  %v591_v6 = vsel %vm579_vm4, %v590_v27, %v7020_v5  ;;  %v7034_v56 = vld [vmem:[#allocation33_spill] sm:$0xff] }
 0x294   : > { %v1372_v47 = vpop.permute.xlu1 %1371  ;;  %v1368_v18 = vpop.permute.xlu0 %1367  ;;  %v992_v25 = vsel %vm579_vm4, %v991_v33, %v7017_v11  ;;  %v1795_v26 = vsel %vm583_vm6, %v1794_v63, %v1753_v23  ;;  %v582_v23 = vsel %vm581_vm5, %v580_v21, %v7021_v12 }
 0x298   : > { %v1789_v8 = vpop.permute.xlu1 %1788  ;;  %v1785_v1 = vpop.permute.xlu0 %1784 }
 0x299   : > { %v1803_v54 = vsel %vm585_vm7, %v1802_v37, %v1785_v1  ;;  %v999_v37 = vsel %vm579_vm4, %v998_v13, %v7018_v4 }
 0x29a   : > { %v1804_v43 = vsel %vm587_vm8, %v1803_v54, %v1789_v8  ;;  %v1391_v8 = vsel %vm579_vm4, %v1390_v52, %v1364_v45  ;;  %v7019_v54 = vld [vmem:[#allocation82_spill] sm:$0xff] }
 0x29b   : > { %3823 = vmatprep.subr.mxu0 %v1804_v43  ;;  %v1000_v43 = vsel %vm581_vm5, %v999_v37, %v7019_v54  ;;  %v1392_v57 = vsel %vm581_vm5, %v1391_v8, %v1368_v18  ;;  %v993_v18 = vsel %vm581_vm5, %v992_v25, %v7023_v15 }
 0x29c   : > { %v1340_v35 = vpop.permute.xlu0 %1339  ;;  %v1376_v29 = vpop.permute.xlu1 %1375  ;;  %v1001_v53 = vsel %vm583_vm6, %v1000_v43, %v7024_v24  ;;  %v994_v34 = vsel %vm583_vm6, %v993_v18, %v7025_v41 }
 0x29d   : > { %v1385_v50 = vsel %vm581_vm5, %v1384_v61, %v1340_v35  ;;  %v7022_v35 = vld [vmem:[#allocation40_spill] sm:$0xff]  ;;  %v1002_v17 = vsel %vm585_vm7, %v1001_v53, %v7026_v10  ;;  %v995_v2 = vsel %vm585_vm7, %v994_v34, %v7031_v30 }
 0x29e   : > { %v592_v38 = vsel %vm581_vm5, %v591_v6, %v7022_v35  ;;  %v996_v21 = vsel %vm587_vm8, %v995_v2, %v7032_v39 }
 0x29f   : > { %v593_v22 = vsel %vm583_vm6, %v592_v38, %v7027_v31 }
 0x2a0   : > { %v1757_v55 = vpop.permute.xlu0 %1756  ;;  %v1348_v1 = vpop.permute.xlu1 %1347  ;;  %v594_v60 = vsel %vm585_vm7, %v593_v22, %v7029_v44 }
 0x2a1   : > { %v1796_v58 = vsel %vm585_vm7, %v1795_v26, %v1757_v55  ;;  %v1393_v55 = vsel %vm583_vm6, %v1392_v57, %v1372_v47  ;;  %v584_v47 = vsel %vm583_vm6, %v582_v23, %v7028_v46  ;;  %v595_v13 = vsel %vm587_vm8, %v594_v60, %v7033_v59 }
 0x2a2   : > { %v1394_v32 = vsel %vm585_vm7, %v1393_v55, %v1376_v29  ;;  %v1003_v29 = vsel %vm587_vm8, %v1002_v17, %v7030_v16  ;;  %v586_v7 = vsel %vm585_vm7, %v584_v47, %v7034_v56 }
 0x2a4   : > { %v1344_v49 = vpop.permute.xlu0 %1343  ;;  %v1352_v40 = vpop.permute.xlu1 %1351 }
 0x2a5   : > { %v1386_v28 = vsel %vm583_vm6, %v1385_v50, %v1344_v49  ;;  %v588_v49 = vsel %vm587_vm8, %v586_v7, %v7035_v48 }
 0x2a6   : > { %v1387_v51 = vsel %vm585_vm7, %v1386_v28, %v1348_v1 }
 0x2a7   : > { %v1388_v42 = vsel %vm587_vm8, %v1387_v51, %v1352_v40 }
 0x2a8   : > { %v1761_v62 = vpop.permute.xlu0 %1760 }
 0x2a9   : > { %v1797_v45 = vsel %vm587_vm8, %v1796_v58, %v1761_v62 }
 0x2aa   : > { %3824 = vmatpush1.msra.mxu0 %v1797_v45 }
 0x2ac   : > { %v1380_v14 = vpop.permute.xlu0 %1379 }
 0x2ad   : > { %v1395_v0 = vsel %vm587_vm8, %v1394_v32, %v1380_v14 }
 0x2ae   : > { %3825 = vmatprep.subr.mxu0 %v1395_v0 }
 0x2af   : > { %3826 = vmatpush1.msra.mxu0 %v1388_v42 }
 0x2b0   : > { %3827 = vmatprep.subr.mxu0 %v1003_v29 }
 0x2b1   : > { %3828 = vmatpush1.msra.mxu0 %v996_v21 }
 0x2b2   : > { %3829 = vmatprep.subr.mxu0 %v595_v13  ;;  %v3882_v36 = vpop.permute.xlu1 %3881 }
 0x2b3   : > { %3830 = vmatpush1.msra.mxu0 %v588_v49 }
 0x2b4   : > { %3985 = vmatmul.mubr.msk.f32.vlgmr.msra.gmra.mxu0 %vm3795_vm9, %v3776_v19 }
 0x2b9   : > { %v3874_v20 = vpop.permute.xlu0 %3873 }
 0x374   : > { %v3865_v27 = vpop.f32.mrf.mxu0 }
 0x375   : > { %v3876_v33 = vmul.f32 %v3874_v20, %v3865_v27 }
 0x376   : > { %v3867_v9 = vpop.f32.mrf.mxu0 }
 0x377   : > { %v3884_v3 = vadd.f32 %v3882_v36, %v3876_v33  ;;  %v3877_v11 = vmul.f32 %v3874_v20, %v3867_v9 }
 0x379   : > { %vm3886_vm10 = vcmp.ge.f32.partialorder %v3884_v3, 0.0  ;;  %v3888_v25 = vmul.f32 0.2, %v3884_v3  ;;  %v3885_v52 = vadd.f32 %v3882_v36, %v3877_v11 }
 0x37b   : > { %v3890_v63 = vsel %vm3886_vm10, %v3884_v3, %v3888_v25  ;;  %vm3887_vm11 = vcmp.ge.f32.partialorder %v3885_v52, 0.0  ;;  %v3889_v61 = vmul.f32 0.2, %v3885_v52 }
 0x37c   : > { %3892 = vst [vmem:[%s219_s19] sm:$0xff] %v3890_v63 }
 0x37d   : > { %v3891_v4 = vsel %vm3887_vm11, %v3885_v52, %v3889_v61 }
 0x37e   : > { %3893 = vst [vmem:[%s219_s19 + $0x8] sm:$0xff] %v3891_v4 }
 0x37f PF: > { %s14_s17 = sadd.s32 1, %s4067_s17   ;;  %s7036_s15 = smov %s4063_s16 }
 0x380   : > { %p11_p5 = scmp.ge.s32.totalorder %s14_s17, 4   ;;  %s7037_s16 = smov %s7039_s18 }
 0x382   :  { %13 = sbr.rel (!%p11_p5) target bundleno = 2 (0x2), region = 67 }

// kernel: conv_block.2
= control target key start
LH: loop header
LB: loop body
LE: loop exit
PB: predicated region body
PF: predicated region fallthrough
CT: control target
= control target key end

     0   :  { %s4029_s9 = smov 0   ;;  %s4031_s10 = smov 0   ;;  %s6877_s0 = inlined_call_operand.vmem [shape: f32[2,8,18,18], index: 0, kind: input, shape index: {}]   ;;  %s6878_s1 = inlined_call_operand.vmem [shape: f32[8,72], index: 1, kind: input, shape index: {}]   ;;  %s6879_s2 = inlined_call_operand.vmem [shape: f32[2,1,8,2], index: 2, kind: output, shape index: {}]  }
   0x1   :  { %s4033_s11 = smov 0  }
   0x2 LB: > { %s24_s12 = sadd.s32 1, %s3996_s10  ;;  %p3903_p0 = scmp.ge.s32.totalorder %s4000_s11, 1  ;;  %s4000_s11 = sphi %s4033_s11, %s12_s11   ;;  %s3996_s10 = sphi %s4031_s10, %s7426_s10   ;;  %s3992_s9 = sphi %s4029_s9, %s7425_s9  }
   0x3   : > { %p26_p1 = scmp.ge.s32.totalorder %s24_s12, 2  ;;  %p126_p2 = scmp.lt.s32.totalorder %s4000_s11, 3 }
   0x5   : > { %s7428_s12 = smov (%p26_p1, %s24_s12), 0  ;;  %p127_p3 = pnand %p3903_p0, %p126_p2 }
   0x7   : > { %130 = sbr.rel (%p127_p3) target bundleno = 1063 (0x427), region = 28 }
   0xc   : > { %p150_p4 = scmp.lt.s32.totalorder %s3992_s9, 1  ;;  %vm2532_vm0 = vcmask 1045504   ;;  %s4002_s17 = smov 126   ;;  %vm1347_vm1 = vcmask 1046528   ;;  %vm516_vm2 = vcmask 130048   ;;  %vm518_vm3 = vcmask 261120  }
   0xd   : > { %s4003_s18 = smov 127   ;;  %s4006_s19 = smov 16   ;;  %vm520_vm4 = vcmask 392192   ;;  %vm522_vm5 = vcmask 523264   ;;  %vm524_vm6 = vcmask 654336   ;;  %vm526_vm7 = vcmask 785408  }
   0xe   : > { %s7430_s9 = smov (!%p150_p4, %s3992_s9), 1  ;;  %s4007_s20 = smov 32   ;;  %vm528_vm8 = vcmask 916480   ;;  %vm3736_vm9 = vcmask 588800   ;;  %vm3817_vm10 = vcmask 7168   ;;  %vm3824_vm11 = vcmask 15368  }
   0xf   : > { %s3909_s13 = smul.u32 192, %s7430_s9  ;;  %s4008_s21 = smov 48  }
  0x10   : > { %s4009_s22 = smov 64   ;;  %s4010_s23 = smov 80  }
  0x11   : > { %s4053_s16 = scalar_lea.vmem %s6877_s0, %s3909_s13  ;;  %s4011_s24 = smov 96  }
  0x12   : > { %v4056_v0 = vld [vmem:[%s4053_s16 + $0x38] sm:$0xff]  ;;  %v4059_v1 = vld [vmem:[%s4053_s16 + $0x40] sm:$0x3]  ;;  %v4062_v2 = vld [vmem:[%s4053_s16 + $0x8] sm:$0xff]  ;;  %s4012_s25 = smov 112   ;;  %s3905_s28 = sshll.u32 %s7430_s9, 3 }
  0x13   : > { %v2544_v3 = vrot.slane %v4056_v0, 2  ;;  %v2546_v4 = vrot.slane %v4059_v1, 2  ;;  %v4067_v5 = vld [vmem:[%s4053_s16 + $0x10] sm:$0x3]  ;;  %v2534_v6 = vrot.slane %v4062_v2, 2  ;;  %v4079_v11 = vld [vmem:[%s4053_s16 + $0x20] sm:$0xff]  ;;  %s161_s3 = scalar_lea.vmem %s6879_s2, %s3905_s28 }
  0x14   : > { %v4071_v7 = vld [vmem:[%s4053_s16 + $0x50] sm:$0xff]  ;;  %v2536_v8 = vrot.slane %v4067_v5, 2  ;;  %v4075_v9 = vld [vmem:[%s4053_s16 + $0x58] sm:$0x3]  ;;  %v4082_v12 = vld [vmem:[%s4053_s16 + $0x80] sm:$0xff]  ;;  %v2539_v16 = vrot.slane %v4079_v11, 2 }
  0x15   : > { %v2549_v10 = vrot.slane %v4071_v7, 2  ;;  %v4087_v13 = vsel %vm2532_vm0, %v2544_v3, %v2546_v4  ;;  %v2551_v14 = vrot.slane %v4075_v9, 2  ;;  %v4091_v15 = vld [vmem:[%s4053_s16 + $0x28] sm:$0x3]  ;;  %v2559_v20 = vrot.slane %v4082_v12, 2  ;;  %v4124_v28 = vld [vmem:[%s4053_s16 + $0xb0] sm:$0xff] }
  0x16   : > { %v4095_v17 = vld [vmem:[%s4053_s16 + $0x88] sm:$0x3]  ;;  %3335 = vrot.lane.b32.xlu1 %v4087_v13, %s4002_s17  ;;  %v4102_v18 = vsel %vm2532_vm0, %v2534_v6, %v2536_v8  ;;  %v2541_v19 = vrot.slane %v4091_v15, 2  ;;  %v4111_v23 = vld [vmem:[%s4053_s16 + $0x70] sm:$0x3]  ;;  %v4130_v30 = vld [vmem:[%s4053_s16 + $0x98] sm:$0xff] }
  0x17   : > { %v2561_v21 = vrot.slane %v4095_v17, 2  ;;  %v4108_v22 = vld [vmem:[%s4053_s16 + $0x68] sm:$0xff]  ;;  %3327 = vrot.lane.b32.xlu0 %v4102_v18, %s4002_s17  ;;  %v2725_v24 = vcombine.low %v4102_v18, %v4087_v13  ;;  %v4120_v26 = vsel %vm2532_vm0, %v2549_v10, %v2551_v14  ;;  %v4127_v29 = vld [vmem:[%s4053_s16 + $0xb8] sm:$0x3]  ;;  %v2556_v32 = vrot.slane %v4111_v23, 2  ;;  %v4144_v36 = vld [vmem:[%s4053_s16] sm:$0xff] }
  0x18   : > { %v2554_v27 = vrot.slane %v4108_v22, 2  ;;  %v4133_v31 = vsel %vm2532_vm0, %v2539_v16, %v2541_v19  ;;  %v2569_v33 = vrot.slane %v4124_v28, 2  ;;  %v4138_v34 = vld [vmem:[%s4053_s16 + $0xa0] sm:$0x3]  ;;  %v4141_v35 = vld [vmem:[%s4053_s16 + $0x18] sm:$0xff]  ;;  %v4151_v39 = vld [vmem:[%s4053_s16 + $0x48] sm:$0xff] }
  0x19   : > { %v2741_v37 = vcombine.low %v4133_v31, %v4120_v26  ;;  %7060 = vst [vmem:[#allocation3_spill] sm:$0xff] %v4151_v39  ;;  %v4154_v40 = vld [vmem:[%s4053_s16 + $0x30] sm:$0xff]  ;;  %v2571_v41 = vrot.slane %v4127_v29, 2  ;;  %v2564_v42 = vrot.slane %v4130_v30, 2  ;;  %v2566_v43 = vrot.slane %v4138_v34, 2  ;;  %v4188_v56 = vld [vmem:[%s4053_s16 + $0x78] sm:$0xff] }
  0x1a   : > { %7061 = vst [vmem:[#allocation4_spill] sm:$0xff] %v4154_v40  ;;  %3339 = vrot.lane.b32.xlu1 %v4120_v26, %s4002_s17  ;;  %v4164_v44 = vsel %vm2532_vm0, %v2559_v20, %v2561_v21  ;;  %v4167_v45 = vsel %vm2532_vm0, %v2554_v27, %v2556_v32  ;;  %v2538_v46 = vrot.slane %v4141_v35, 2  ;;  %v2533_v47 = vrot.slane %v4144_v36, 2  ;;  %7062 = vst [vmem:[#allocation5_spill] sm:$0xff] %v4188_v56  ;;  %v4193_v57 = vld [vmem:[%s4053_s16 + $0x60] sm:$0xff]  ;;  %v4196_v58 = vld [vmem:[%s4053_s16 + $0xa8] sm:$0xff] }
  0x1b   : > { %3331 = vrot.lane.b32.xlu0 %v4133_v31, %s4002_s17  ;;  %v4172_v48 = vsel %vm2532_vm0, %v2569_v33, %v2571_v41  ;;  %v4175_v49 = vsel %vm2532_vm0, %v2564_v42, %v2566_v43  ;;  %v2548_v50 = vrot.slane %v4151_v39, 2  ;;  %v2543_v51 = vrot.slane %v4154_v40, 2  ;;  %7063 = vst [vmem:[#allocation6_spill] sm:$0xff] %v4193_v57  ;;  %v4199_v59 = vld [vmem:[%s4053_s16 + $0x90] sm:$0xff] }
  0x1c   : > { %v2773_v52 = vcombine.low %v4164_v44, %v4172_v48  ;;  %v2757_v54 = vcombine.low %v4167_v45, %v4175_v49  ;;  %v4204_v60 = vsel %vm2532_vm0, %v2538_v46, %v2539_v16  ;;  %v4209_v61 = vsel %vm2532_vm0, %v2533_v47, %v2534_v6 }
  0x1d   : > { %v4212_v62 = vsel %vm2532_vm0, %v2548_v50, %v2549_v10  ;;  %v4217_v63 = vsel %vm2532_vm0, %v2543_v51, %v2544_v3  ;;  %v2558_v10 = vrot.slane %v4188_v56, 2  ;;  %v2553_v16 = vrot.slane %v4193_v57, 2 }
  0x1e   : > { %3347 = vrot.lane.b32.xlu1 %v4164_v44, %s4002_s17  ;;  %v2605_v4 = vcombine.low %v4204_v60, %v4212_v62  ;;  %v2589_v14 = vcombine.low %v4209_v61, %v4217_v63  ;;  %v2568_v19 = vrot.slane %v4196_v58, 2  ;;  %v2563_v3 = vrot.slane %v4199_v59, 2 }
  0x1f   : > { %3343 = vrot.lane.b32.xlu0 %v4167_v45, %s4002_s17  ;;  %v4236_v21 = vsel %vm2532_vm0, %v2558_v10, %v2559_v20  ;;  %v4239_v32 = vsel %vm2532_vm0, %v2553_v16, %v2554_v27  ;;  %v1354_v27 = vrot.slane %v4079_v11, 1  ;;  %v1351_v51 = vrot.slane %v4067_v5, 1 }
  0x20   : > { %v4242_v41 = vsel %vm2532_vm0, %v2568_v19, %v2569_v33  ;;  %v4245_v43 = vsel %vm2532_vm0, %v2563_v3, %v2564_v42  ;;  %v1356_v33 = vrot.slane %v4091_v15, 1  ;;  %v1349_v42 = vrot.slane %v4062_v2, 1 }
  0x21   : > { %v1364_v16 = vrot.slane %v4071_v7, 1  ;;  %v1366_v19 = vrot.slane %v4075_v9, 1  ;;  %v1359_v3 = vrot.slane %v4056_v0, 1  ;;  %v1361_v5 = vrot.slane %v4059_v1, 1 }
  0x22   : > { %3355 = vrot.lane.b32.xlu1 %v4172_v48, %s4002_s17  ;;  %v4308_v10 = vsel %vm1347_vm1, %v1354_v27, %v1356_v33  ;;  %v4313_v15 = vsel %vm1347_vm1, %v1349_v42, %v1351_v51  ;;  %v193_v20 = vlaneseq  ;;  %v1374_v47 = vrot.slane %v4082_v12, 1 }
  0x23   : > { %3351 = vrot.lane.b32.xlu0 %v4175_v49, %s4002_s17  ;;  %7064 = vst [vmem:[#allocation7_spill] sm:$0xff] %v4308_v10  ;;  %7065 = vst [vmem:[#allocation8_spill] sm:$0xff] %v4313_v15  ;;  %v4322_v33 = vsel %vm1347_vm1, %v1364_v16, %v1366_v19  ;;  %v1376_v9 = vrot.slane %v4095_v17, 1  ;;  %v4004_v51 = vmov 1983009808   ;;  %v4327_v8 = vsel %vm1347_vm1, %v1359_v3, %v1361_v5 }
  0x24   : > { %7066 = vst [vmem:[#allocation9_spill] sm:$0xff] %v4322_v33  ;;  %v191_v6 = vunpack.c.l.s4 %v4004_v51  ;;  %7067 = vst [vmem:[#allocation10_spill] sm:$0xff] %v4327_v8  ;;  %v1369_v1 = vrot.slane %v4108_v22, 1  ;;  %v1371_v55 = vrot.slane %v4111_v23, 1  ;;  %v194_v53 = vshrl.u32 %v193_v20, 7 }
  0x25   : > { %v4336_v19 = vsel %vm1347_vm1, %v1374_v47, %v1376_v9  ;;  %v1384_v17 = vrot.slane %v4124_v28, 1  ;;  %v1386_v51 = vrot.slane %v4127_v29, 1  ;;  %v1379_v23 = vrot.slane %v4130_v30, 1 }
  0x26   : > { %3329 = vrot.lane.b32.xlu1 %v4204_v60, %s4002_s17  ;;  %7068 = vst [vmem:[#allocation11_spill] sm:$0xff] %v4336_v19  ;;  %v192_v5 = vunpack.c.0.s8 %v191_v6  ;;  %v4341_v38 = vsel %vm1347_vm1, %v1369_v1, %v1371_v55  ;;  %v1381_v25 = vrot.slane %v4138_v34, 1  ;;  %v1353_v9 = vrot.slane %v4141_v35, 1 }
  0x27   : > { %3325 = vrot.lane.b32.xlu0 %v4209_v61, %s4002_s17  ;;  %7069 = vst [vmem:[#allocation12_spill] sm:$0xff] %v4341_v38  ;;  %v4350_v20 = vsel %vm1347_vm1, %v1384_v17, %v1386_v51  ;;  %v1348_v6 = vrot.slane %v4144_v36, 1  ;;  %v1358_v50 = vrot.slane %v4154_v40, 1  ;;  %v1378_v40 = vrot.slane %v4199_v59, 1 }
  0x28   : > { %7070 = vst [vmem:[#allocation13_spill] sm:$0xff] %v4350_v20  ;;  %v4353_v29 = vsub.s32 %v192_v5, %v194_v53  ;;  %v4356_v55 = vsel %vm1347_vm1, %v1379_v23, %v1381_v25 }
  0x29   : > { %7071 = vst [vmem:[#allocation14_spill] sm:$0xff] %v4356_v55 }
  0x2a   : > { %3337 = vrot.lane.b32.xlu1 %v4212_v62, %s4002_s17  ;;  %v4363_v34 = vrot.slane %v2725_v24, %v4353_v29  ;;  %v4369_v51 = vrot.slane %v2741_v37, %v4353_v29  ;;  %v4375_v25 = vrot.slane %v2773_v52, %v4353_v29  ;;  %v4381_v5 = vrot.slane %v2757_v54, %v4353_v29 }
  0x2b   : > { %3333 = vrot.lane.b32.xlu0 %v4217_v63, %s4002_s17  ;;  %v4388_v24 = vsel %vm1347_vm1, %v1353_v9, %v1354_v27  ;;  %v1363_v37 = vrot.slane %v4151_v39, 1  ;;  %v4392_v52 = vsel %vm1347_vm1, %v1348_v6, %v1349_v42  ;;  %v1373_v42 = vrot.slane %v4188_v56, 1 }
  0x2c   : > { %7072 = vst [vmem:[#allocation15_spill] sm:$0xff] %v4363_v34  ;;  %7073 = vst [vmem:[#allocation16_spill] sm:$0xff] %v4369_v51  ;;  %v4408_v9 = vsel %vm1347_vm1, %v1358_v50, %v1359_v3  ;;  %v1368_v6 = vrot.slane %v4193_v57, 1  ;;  %v4415_v54 = vrot.slane %v2605_v4, %v4353_v29  ;;  %v4421_v46 = vrot.slane %v2589_v14, %v4353_v29 }
  0x2d   : > { %7074 = vst [vmem:[#allocation17_spill] sm:$0xff] %v4375_v25  ;;  %7075 = vst [vmem:[#allocation18_spill] sm:$0xff] %v4381_v5  ;;  %v4404_v27 = vsel %vm1347_vm1, %v1363_v37, %v1364_v16  ;;  %v7082_v16 = vcombine.low %v4236_v21, %v4242_v41  ;;  %v7084_v3 = vcombine.low %v4239_v32, %v4245_v43  ;;  %v1383_v14 = vrot.slane %v4196_v58, 1 }
  0x2e   : > { %3345 = vrot.lane.b32.xlu1 %v4236_v21, %s4002_s17  ;;  %7076 = vst [vmem:[#allocation19_spill] sm:$0xff] %v4388_v24  ;;  %7077 = vst [vmem:[#allocation20_spill] sm:$0xff] %v4392_v52  ;;  %v4440_v4 = vsel %vm1347_vm1, %v1373_v42, %v1374_v47  ;;  %v4005_v57 = vmov 1934713408   ;;  %v4444_v56 = vsel %vm1347_vm1, %v1368_v6, %v1369_v1  ;;  %v4459_v1 = vsel %vm1347_vm1, %v1378_v40, %v1379_v23 }
  0x2f   : > { %3341 = vrot.lane.b32.xlu0 %v4239_v32, %s4002_s17  ;;  %7078 = vst [vmem:[#allocation21_spill] sm:$0xff] %v4404_v27  ;;  %7079 = vst [vmem:[#allocation22_spill] sm:$0xff] %v4408_v9  ;;  %v4427_v50 = vrot.slane %v7082_v16, %v4353_v29  ;;  %v4433_v37 = vrot.slane %v7084_v3, %v4353_v29  ;;  %v255_v16 = vunpack.c.l.s4 %v4005_v57 }
  0x30   : > { %7080 = vst [vmem:[#allocation23_spill] sm:$0xff] %v4415_v54  ;;  %7081 = vst [vmem:[#allocation24_spill] sm:$0xff] %v4421_v46  ;;  %v4456_v47 = vsel %vm1347_vm1, %v1383_v14, %v1384_v17  ;;  %v2790_v6 = vcombine.high %v4363_v34, %v4369_v51  ;;  %v2822_v39 = vcombine.high %v4381_v5, %v4375_v25  ;;  %v7119_v25 = vld [vmem:[#allocation6_spill] sm:$0xff] }
  0x31   : > { %7083 = vst [vmem:[#allocation25_spill] sm:$0xff] %v4427_v50  ;;  %7085 = vst [vmem:[#allocation26_spill] sm:$0xff] %v4433_v37  ;;  %v256_v57 = vunpack.c.0.s8 %v255_v16  ;;  %v2686_v23 = vcombine.high %v4433_v37, %v4427_v50  ;;  %v7113_v50 = vld [vmem:[#allocation3_spill] sm:$0xff] }
  0x32   : > { %3353 = vrot.lane.b32.xlu1 %v4242_v41, %s4002_s17  ;;  %7086 = vst [vmem:[#allocation27_spill] sm:$0xff] %v4440_v4  ;;  %7087 = vst [vmem:[#allocation28_spill] sm:$0xff] %v4444_v56 }
  0x33   : > { %3349 = vrot.lane.b32.xlu0 %v4245_v43, %s4002_s17  ;;  %7088 = vst [vmem:[#allocation29_spill] sm:$0xff] %v4456_v47  ;;  %7089 = vst [vmem:[#allocation30_spill] sm:$0xff] %v4459_v1  ;;  %v4465_v42 = vsub.s32 %v256_v57, %v194_v53  ;;  %v7095_v53 = vcombine.high %v4133_v31, %v4120_v26 }
  0x35   : > { %v4472_v17 = vrot.slane %v2790_v6, %v4465_v42  ;;  %v4475_v40 = vrot.slane %v2822_v39, %v4465_v42  ;;  %v2654_v39 = vcombine.high %v4421_v46, %v4415_v54  ;;  %v4499_v16 = vrot.slane %v2686_v23, %v4465_v42  ;;  %v7118_v46 = vld [vmem:[#allocation5_spill] sm:$0xff] }
  0x36   : > { %2939 = vrot.lane.b32.xlu1 %v4133_v31, %s4003_s18  ;;  %v7094_v6 = vcombine.high %v4102_v18, %v4087_v13  ;;  %v4531_v3 = vrot.slane %v7095_v53, %v4353_v29 }
  0x37   : > { %2935 = vrot.lane.b32.xlu0 %v4102_v18, %s4003_s18  ;;  %7090 = vst [vmem:[#allocation31_spill] sm:$0xff] %v4472_v17  ;;  %7091 = vst [vmem:[#allocation32_spill] sm:$0xff] %v4475_v40  ;;  %v4496_v14 = vrot.slane %v2654_v39, %v4465_v42 }
  0x38   : > { %7093 = vst [vmem:[#allocation34_spill] sm:$0xff] %v4499_v16  ;;  %v4525_v57 = vrot.slane %v7094_v6, %v4353_v29 }
  0x39   : > { %7092 = vst [vmem:[#allocation33_spill] sm:$0xff] %v4496_v14 }
  0x3a   : > { %2947 = vrot.lane.b32.xlu1 %v4120_v26, %s4003_s18  ;;  %v2805_v31 = vcombine.low %v4525_v57, %v4531_v3 }
  0x3b   : > { %2943 = vrot.lane.b32.xlu0 %v4087_v13, %s4003_s18 }
  0x3e   : > { %2955 = vrot.lane.b32.xlu1 %v4164_v44, %s4003_s18 }
  0x3f   : > { %2951 = vrot.lane.b32.xlu0 %v4167_v45, %s4003_s18 }
  0x42   : > { %2963 = vrot.lane.b32.xlu1 %v4172_v48, %s4003_s18 }
  0x43   : > { %2959 = vrot.lane.b32.xlu0 %v4175_v49, %s4003_s18 }
  0x46   : > { %2937 = vrot.lane.b32.xlu1 %v4204_v60, %s4003_s18 }
  0x47   : > { %2933 = vrot.lane.b32.xlu0 %v4209_v61, %s4003_s18 }
  0x4a   : > { %2945 = vrot.lane.b32.xlu1 %v4212_v62, %s4003_s18 }
  0x4b   : > { %2941 = vrot.lane.b32.xlu0 %v4217_v63, %s4003_s18 }
  0x4e   : > { %2953 = vrot.lane.b32.xlu1 %v4236_v21, %s4003_s18 }
  0x4f   : > { %2949 = vrot.lane.b32.xlu0 %v4239_v32, %s4003_s18 }
  0x52   : > { %2961 = vrot.lane.b32.xlu1 %v4242_v41, %s4003_s18 }
  0x53   : > { %2957 = vrot.lane.b32.xlu0 %v4245_v43, %s4003_s18 }
  0x56   : > { %2146 = vrot.lane.b32.xlu1 %v4308_v10, %s4002_s17 }
  0x57   : > { %2142 = vrot.lane.b32.xlu0 %v4313_v15, %s4002_s17 }
  0x5a   : > { %2154 = vrot.lane.b32.xlu1 %v4322_v33, %s4002_s17 }
  0x5b   : > { %2150 = vrot.lane.b32.xlu0 %v4327_v8, %s4002_s17 }
  0x5e   : > { %2162 = vrot.lane.b32.xlu1 %v4336_v19, %s4002_s17 }
  0x5f   : > { %2158 = vrot.lane.b32.xlu0 %v4341_v38, %s4002_s17 }
  0x62   : > { %2170 = vrot.lane.b32.xlu1 %v4350_v20, %s4002_s17 }
  0x63   : > { %2166 = vrot.lane.b32.xlu0 %v4356_v55, %s4002_s17 }
  0x66   : > { %2144 = vrot.lane.b32.xlu1 %v4388_v24, %s4002_s17 }
  0x67   : > { %2140 = vrot.lane.b32.xlu0 %v4392_v52, %s4002_s17 }
  0x6a   : > { %2152 = vrot.lane.b32.xlu1 %v4404_v27, %s4002_s17 }
  0x6b   : > { %2148 = vrot.lane.b32.xlu0 %v4408_v9, %s4002_s17 }
  0x6e   : > { %2160 = vrot.lane.b32.xlu1 %v4440_v4, %s4002_s17 }
  0x6f   : > { %2156 = vrot.lane.b32.xlu0 %v4444_v56, %s4002_s17 }
  0x72   : > { %2168 = vrot.lane.b32.xlu1 %v4456_v47, %s4002_s17 }
  0x73   : > { %2164 = vrot.lane.b32.xlu0 %v4459_v1, %s4002_s17 }
  0x76   : > { %1754 = vrot.lane.b32.xlu1 %v4308_v10, %s4003_s18 }
  0x77   : > { %1750 = vrot.lane.b32.xlu0 %v4313_v15, %s4003_s18 }
  0x7a   : > { %1762 = vrot.lane.b32.xlu1 %v4322_v33, %s4003_s18 }
  0x7b   : > { %1758 = vrot.lane.b32.xlu0 %v4327_v8, %s4003_s18  ;;  %v7104_v8 = vcombine.high %v4236_v21, %v4242_v41 }
  0x7d   : > { %v4633_v10 = vrot.slane %v7104_v8, %v4353_v29 }
  0x7e   : > { %1770 = vrot.lane.b32.xlu1 %v4336_v19, %s4003_s18 }
  0x7f   : > { %1766 = vrot.lane.b32.xlu0 %v4341_v38, %s4003_s18 }
  0x82   : > { %1778 = vrot.lane.b32.xlu1 %v4350_v20, %s4003_s18  ;;  %v7103_v20 = vcombine.high %v4209_v61, %v4217_v63 }
  0x83   : > { %1774 = vrot.lane.b32.xlu0 %v4356_v55, %s4003_s18 }
  0x84   : > { %v4627_v15 = vrot.slane %v7103_v20, %v4353_v29 }
  0x86   : > { %1752 = vrot.lane.b32.xlu1 %v4388_v24, %s4003_s18 }
  0x87   : > { %1748 = vrot.lane.b32.xlu0 %v4392_v52, %s4003_s18  ;;  %v7096_v52 = vcombine.high %v4164_v44, %v4172_v48 }
  0x88   : > { %v4513_v39 = vpop.permute.xlu1 %3335 }
  0x89   : > { %v4515_v23 = vpop.permute.xlu0 %3327  ;;  %v4537_v24 = vrot.slane %v7096_v52, %v4353_v29 }
  0x8a   : > { %1760 = vrot.lane.b32.xlu1 %v4404_v27, %s4003_s18  ;;  %v3509_v6 = vcombine.low %v4515_v23, %v4513_v39 }
  0x8b   : > { %1756 = vrot.lane.b32.xlu0 %v4408_v9, %s4003_s18  ;;  %v7097_v9 = vcombine.high %v4167_v45, %v4175_v49  ;;  %v4568_v49 = vrot.slane %v2805_v31, %v4465_v42 }
  0x8c   : > { %v4545_v13 = vpop.permute.xlu1 %3339  ;;  %v4603_v31 = vrot.slane %v3509_v6, %v4353_v29 }
  0x8d   : > { %v4543_v27 = vrot.slane %v7097_v9, %v4353_v29  ;;  %v4547_v18 = vpop.permute.xlu0 %3331  ;;  %7098 = vst [vmem:[#allocation35_spill] sm:$0xff] %v4568_v49 }
  0x8e   : > { %1768 = vrot.lane.b32.xlu1 %v4440_v4, %s4003_s18  ;;  %v3525_v48 = vcombine.low %v4547_v18, %v4545_v13 }
  0x8f   : > { %1764 = vrot.lane.b32.xlu0 %v4444_v56, %s4003_s18  ;;  %v2837_v44 = vcombine.low %v4543_v27, %v4537_v24 }
  0x90   : > { %v4553_v26 = vpop.permute.xlu1 %3347  ;;  %v4590_v9 = vrot.slane %v3525_v48, %v4353_v29 }
  0x91   : > { %v4559_v45 = vpop.permute.xlu0 %3343  ;;  %v4571_v52 = vrot.slane %v2837_v44, %v4465_v42 }
  0x92   : > { %1776 = vrot.lane.b32.xlu1 %v4456_v47, %s4003_s18 }
  0x93   : > { %1772 = vrot.lane.b32.xlu0 %v4459_v1, %s4003_s18  ;;  %7099 = vst [vmem:[#allocation36_spill] sm:$0xff] %v4571_v52 }
  0x94   : > { %v4575_v53 = vpop.permute.xlu1 %3355 }
  0x95   : > { %v3557_v56 = vcombine.low %v4553_v26, %v4575_v53  ;;  %v4581_v4 = vpop.permute.xlu0 %3351 }
  0x96   : > { %v3541_v44 = vcombine.low %v4559_v45, %v4581_v4  ;;  %953 = vrot.lane.b32.xlu1 %v4079_v11, %s4002_s17 }
  0x97   : > { %v4593_v1 = vrot.slane %v3557_v56, %v4353_v29  ;;  %949 = vrot.lane.b32.xlu0 %v4062_v2, %s4002_s17  ;;  %v3573_v56 = vcombine.low %v4603_v31, %v4590_v9 }
  0x98   : > { %v4598_v47 = vrot.slane %v3541_v44, %v4353_v29  ;;  %v4600_v38 = vpop.permute.xlu1 %3329  ;;  %v7102_v44 = vcombine.high %v4204_v60, %v4212_v62  ;;  %v7105_v60 = vcombine.high %v4239_v32, %v4245_v43 }
  0x99   : > { %7100 = vst [vmem:[#allocation37_spill] sm:$0xff] %v4600_v38  ;;  %v4605_v55 = vpop.permute.xlu0 %3325  ;;  %v4651_v61 = vrot.slane %v3573_v56, %v4465_v42 }
  0x9a   : > { %7101 = vst [vmem:[#allocation38_spill] sm:$0xff] %v4605_v55  ;;  %v3605_v48 = vcombine.low %v4598_v47, %v4593_v1  ;;  %961 = vrot.lane.b32.xlu1 %v4071_v7, %s4002_s17  ;;  %v4619_v6 = vrot.slane %v7102_v44, %v4353_v29  ;;  %v4639_v62 = vrot.slane %v7105_v60, %v4353_v29 }
  0x9b   : > { %957 = vrot.lane.b32.xlu0 %v4056_v0, %s4002_s17  ;;  %7108 = vst [vmem:[#allocation41_spill] sm:$0xff] %v4651_v61 }
  0x9c   : > { %v4621_v19 = vpop.permute.xlu1 %3337  ;;  %v4644_v33 = vrot.slane %v3605_v48, %v4465_v42  ;;  %v2669_v21 = vcombine.low %v4627_v15, %v4619_v6  ;;  %v2701_v32 = vcombine.low %v4639_v62, %v4633_v10 }
  0x9d   : > { %v4641_v44 = vpop.permute.xlu0 %3333  ;;  %v3389_v43 = vcombine.low %v4600_v38, %v4621_v19 }
  0x9e   : > { %7106 = vst [vmem:[#allocation39_spill] sm:$0xff] %v4641_v44  ;;  %7107 = vst [vmem:[#allocation40_spill] sm:$0xff] %v4644_v33  ;;  %969 = vrot.lane.b32.xlu1 %v4082_v12, %s4002_s17  ;;  %v3373_v20 = vcombine.low %v4605_v55, %v4641_v44  ;;  %v4672_v48 = vrot.slane %v2669_v21, %v4465_v42  ;;  %v4675_v56 = vrot.slane %v2701_v32, %v4465_v42 }
  0x9f   : > { %965 = vrot.lane.b32.xlu0 %v4108_v22, %s4002_s17  ;;  %v4692_v32 = vrot.slane %v3389_v43, %v4353_v29  ;;  %v2806_v55 = vcombine.high %v4525_v57, %v4531_v3 }
  0xa0   : > { %v4653_v63 = vpop.permute.xlu1 %3345  ;;  %7109 = vst [vmem:[#allocation42_spill] sm:$0xff] %v4672_v48  ;;  %7110 = vst [vmem:[#allocation43_spill] sm:$0xff] %v4675_v56  ;;  %v4695_v60 = vrot.slane %v3373_v20, %v4353_v29  ;;  %v7114_v20 = vld [vmem:[#allocation4_spill] sm:$0xff] }
  0xa1   : > { %v4655_v8 = vpop.permute.xlu0 %3341  ;;  %v4750_v3 = vrot.slane %v2806_v55, %v4465_v42 }
  0xa2   : > { %977 = vrot.lane.b32.xlu1 %v4124_v28, %s4002_s17 }
  0xa3   : > { %973 = vrot.lane.b32.xlu0 %v4130_v30, %s4002_s17  ;;  %7122 = vst [vmem:[#allocation47_spill] sm:$0xff] %v4750_v3 }
  0xa4   : > { %v4679_v41 = vpop.permute.xlu1 %3353 }
  0xa5   : > { %v3421_v16 = vcombine.low %v4653_v63, %v4679_v41  ;;  %v4683_v14 = vpop.permute.xlu0 %3349 }
  0xa6   : > { %v3405_v21 = vcombine.low %v4655_v8, %v4683_v14  ;;  %951 = vrot.lane.b32.xlu1 %v4141_v35, %s4002_s17 }
  0xa7   : > { %v4698_v52 = vrot.slane %v3421_v16, %v4353_v29  ;;  %947 = vrot.lane.b32.xlu0 %v4144_v36, %s4002_s17  ;;  %v3437_v16 = vcombine.low %v4695_v60, %v4692_v32 }
  0xa8   : > { %v4703_v40 = vrot.slane %v3405_v21, %v4353_v29  ;;  %v4705_v49 = vpop.permute.xlu1 %2939 }
  0xa9   : > { %7111 = vst [vmem:[#allocation44_spill] sm:$0xff] %v4705_v49  ;;  %v4707_v17 = vpop.permute.xlu0 %2935  ;;  %v4729_v5 = vrot.slane %v3437_v16, %v4465_v42 }
  0xaa   : > { %7112 = vst [vmem:[#allocation45_spill] sm:$0xff] %v4707_v17  ;;  %v3469_v43 = vcombine.low %v4703_v40, %v4698_v52  ;;  %959 = vrot.lane.b32.xlu1 %v7113_v50, %s4002_s17 }
  0xab   : > { %955 = vrot.lane.b32.xlu0 %v7114_v20, %s4002_s17  ;;  %7120 = vst [vmem:[#allocation5_spill] sm:$0xff] %v4729_v5 }
  0xac   : > { %v4717_v37 = vpop.permute.xlu1 %2947  ;;  %v4722_v54 = vrot.slane %v3469_v43, %v4465_v42  ;;  %v2838_v43 = vcombine.high %v4543_v27, %v4537_v24 }
  0xad   : > { %7115 = vst [vmem:[#allocation3_spill] sm:$0xff] %v4717_v37  ;;  %v4719_v21 = vpop.permute.xlu0 %2943  ;;  %v3133_v38 = vcombine.low %v4705_v49, %v4717_v37 }
  0xae   : > { %7116 = vst [vmem:[#allocation4_spill] sm:$0xff] %v4719_v21  ;;  %7117 = vst [vmem:[#allocation46_spill] sm:$0xff] %v4722_v54  ;;  %967 = vrot.lane.b32.xlu1 %v7118_v46, %s4002_s17  ;;  %v3117_v16 = vcombine.low %v4707_v17, %v4719_v21  ;;  %v4753_v24 = vrot.slane %v2838_v43, %v4465_v42 }
  0xaf   : > { %963 = vrot.lane.b32.xlu0 %v7119_v25, %s4002_s17  ;;  %v4770_v43 = vrot.slane %v3133_v38, %v4353_v29 }
  0xb0   : > { %v4731_v51 = vpop.permute.xlu1 %2955  ;;  %7123 = vst [vmem:[#allocation48_spill] sm:$0xff] %v4753_v24  ;;  %v4773_v27 = vrot.slane %v3117_v16, %v4353_v29 }
  0xb1   : > { %v4733_v34 = vpop.permute.xlu0 %2951 }
  0xb2   : > { %7121 = vst [vmem:[#allocation6_spill] sm:$0xff] %v4733_v34  ;;  %975 = vrot.lane.b32.xlu1 %v4196_v58, %s4002_s17  ;;  %v3181_v38 = vcombine.low %v4773_v27, %v4770_v43 }
  0xb3   : > { %971 = vrot.lane.b32.xlu0 %v4199_v59, %s4002_s17 }
  0xb4   : > { %v4757_v57 = vpop.permute.xlu1 %2963 }
  0xb5   : > { %v3165_v44 = vcombine.low %v4731_v51, %v4757_v57  ;;  %v4761_v49 = vpop.permute.xlu0 %2959 }
  0xb6   : > { %v3149_v55 = vcombine.low %v4733_v34, %v4761_v49  ;;  %561 = vrot.lane.b32.xlu1 %v4079_v11, %s4003_s18 }
  0xb7   : > { %v4776_v56 = vrot.slane %v3165_v44, %v4353_v29  ;;  %557 = vrot.lane.b32.xlu0 %v4062_v2, %s4003_s18 }
  0xb8   : > { %v4781_v17 = vrot.slane %v3149_v55, %v4353_v29  ;;  %v4783_v48 = vpop.permute.xlu1 %2937 }
  0xb9   : > { %v4785_v21 = vpop.permute.xlu0 %2933 }
  0xba   : > { %7124 = vst [vmem:[#allocation49_spill] sm:$0xff] %v4785_v21  ;;  %v3213_v11 = vcombine.low %v4781_v17, %v4776_v56  ;;  %569 = vrot.lane.b32.xlu1 %v4071_v7, %s4003_s18  ;;  %v4807_v7 = vrot.slane %v3181_v38, %v4465_v42 }
  0xbb   : > { %565 = vrot.lane.b32.xlu0 %v4056_v0, %s4003_s18  ;;  %v2670_v0 = vcombine.high %v4627_v15, %v4619_v6 }
  0xbc   : > { %v4795_v2 = vpop.permute.xlu1 %2945  ;;  %v4800_v16 = vrot.slane %v3213_v11, %v4465_v42  ;;  %7127 = vst [vmem:[#allocation52_spill] sm:$0xff] %v4807_v7  ;;  %v2702_v11 = vcombine.high %v4639_v62, %v4633_v10 }
  0xbd   : > { %v4797_v44 = vpop.permute.xlu0 %2941  ;;  %v4830_v10 = vrot.slane %v2670_v0, %v4465_v42 }
  0xbe   : > { %7125 = vst [vmem:[#allocation50_spill] sm:$0xff] %v4797_v44  ;;  %7126 = vst [vmem:[#allocation51_spill] sm:$0xff] %v4800_v16  ;;  %577 = vrot.lane.b32.xlu1 %v4082_v12, %s4003_s18  ;;  %v2997_v12 = vcombine.low %v4783_v48, %v4795_v2  ;;  %v4833_v6 = vrot.slane %v2702_v11, %v4465_v42 }
  0xbf   : > { %573 = vrot.lane.b32.xlu0 %v4108_v22, %s4003_s18  ;;  %v2981_v22 = vcombine.low %v4785_v21, %v4797_v44  ;;  %7128 = vst [vmem:[#allocation53_spill] sm:$0xff] %v4830_v10  ;;  %v3574_v44 = vcombine.high %v4603_v31, %v4590_v9 }
  0xc0   : > { %v4809_v55 = vpop.permute.xlu1 %2953  ;;  %7129 = vst [vmem:[#allocation54_spill] sm:$0xff] %v4833_v6  ;;  %v4848_v0 = vrot.slane %v2997_v12, %v4353_v29 }
  0xc1   : > { %v4811_v37 = vpop.permute.xlu0 %2949  ;;  %v4851_v11 = vrot.slane %v2981_v22, %v4353_v29 }
  0xc2   : > { %585 = vrot.lane.b32.xlu1 %v4124_v28, %s4003_s18 }
  0xc3   : > { %581 = vrot.lane.b32.xlu0 %v4130_v30, %s4003_s18  ;;  %v3045_v12 = vcombine.low %v4851_v11, %v4848_v0 }
  0xc4   : > { %v4835_v62 = vpop.permute.xlu1 %2961 }
  0xc5   : > { %v3029_v28 = vcombine.low %v4809_v55, %v4835_v62  ;;  %v4839_v38 = vpop.permute.xlu0 %2957 }
  0xc6   : > { %v3013_v30 = vcombine.low %v4811_v37, %v4839_v38  ;;  %559 = vrot.lane.b32.xlu1 %v4141_v35, %s4003_s18 }
  0xc7   : > { %v4854_v15 = vrot.slane %v3029_v28, %v4353_v29  ;;  %555 = vrot.lane.b32.xlu0 %v4144_v36, %s4003_s18 }
  0xc8   : > { %v4859_v34 = vrot.slane %v3013_v30, %v4353_v29  ;;  %v4861_v24 = vpop.permute.xlu1 %2146 }
  0xc9   : > { %v4863_v3 = vpop.permute.xlu0 %2142 }
  0xca   : > { %v3077_v35 = vcombine.low %v4859_v34, %v4854_v15  ;;  %567 = vrot.lane.b32.xlu1 %v7113_v50, %s4003_s18  ;;  %v4885_v50 = vrot.slane %v3045_v12, %v4465_v42  ;;  %v3638_v12 = vcombine.high %v4651_v61, %v4644_v33 }
  0xcb   : > { %563 = vrot.lane.b32.xlu0 %v7114_v20, %s4003_s18  ;;  %v3606_v20 = vcombine.high %v4598_v47, %v4593_v1 }
  0xcc   : > { %v4873_v36 = vpop.permute.xlu1 %2154  ;;  %v4878_v28 = vrot.slane %v3077_v35, %v4465_v42  ;;  %7131 = vst [vmem:[#allocation56_spill] sm:$0xff] %v4885_v50 }
  0xcd   : > { %v4875_v22 = vpop.permute.xlu0 %2150  ;;  %v2340_v47 = vcombine.low %v4861_v24, %v4873_v36 }
  0xce   : > { %7130 = vst [vmem:[#allocation55_spill] sm:$0xff] %v4878_v28  ;;  %575 = vrot.lane.b32.xlu1 %v7118_v46, %s4003_s18  ;;  %v3558_v46 = vcombine.high %v4553_v26, %v4575_v53  ;;  %v2324_v1 = vcombine.low %v4863_v3, %v4875_v22  ;;  %v3510_v26 = vcombine.high %v4515_v23, %v4513_v39 }
  0xcf   : > { %571 = vrot.lane.b32.xlu0 %v7119_v25, %s4003_s18  ;;  %v3542_v25 = vcombine.high %v4559_v45, %v4581_v4  ;;  %v3526_v4 = vcombine.high %v4547_v18, %v4545_v13  ;;  %v3470_v53 = vcombine.high %v4703_v40, %v4698_v52  ;;  %v3620_v39 = vrot.slane %v3606_v20, %v4465_v42 }
  0xd0   : > { %v4887_v30 = vpop.permute.xlu1 %2162  ;;  %v4929_v23 = vrot.slane %v3558_v46, %v4353_v29  ;;  %v3588_v40 = vrot.slane %v3574_v44, %v4465_v42  ;;  %v3438_v52 = vcombine.high %v4695_v60, %v4692_v32  ;;  %v4941_v35 = vrot.slane %v2340_v47, %v4353_v29 }
  0xd1   : > { %v4891_v21 = vpop.permute.xlu0 %2158  ;;  %v4932_v13 = vrot.slane %v3542_v25, %v4353_v29  ;;  %v4944_v20 = vrot.slane %v2324_v1, %v4353_v29  ;;  %v3214_v25 = vcombine.high %v4781_v17, %v4776_v56  ;;  %v3246_v60 = vcombine.high %v4807_v7, %v4800_v16 }
  0xd2   : > { %583 = vrot.lane.b32.xlu1 %v4196_v58, %s4003_s18  ;;  %v3502_v58 = vcombine.high %v4729_v5, %v4722_v54  ;;  %v3639_v47 = vcombine.low %v3588_v40, %v3620_v39  ;;  %v3484_v1 = vrot.slane %v3470_v53, %v4465_v42  ;;  %v4971_v56 = vrot.slane %v3510_v26, %v4353_v29 }
  0xd3   : > { %579 = vrot.lane.b32.xlu0 %v4199_v59, %s4003_s18  ;;  %v2388_v53 = vcombine.low %v4944_v20, %v4941_v35  ;;  %v3640_v26 = vcombine.high %v3588_v40, %v3620_v39  ;;  %v4986_v9 = vrot.slane %v3214_v25, %v4465_v42 }
  0xd4   : > { %v4915_v45 = vpop.permute.xlu1 %2170 }
  0xd5   : > { %v2372_v59 = vcombine.low %v4887_v30, %v4915_v45  ;;  %v4923_v31 = vpop.permute.xlu0 %2166  ;;  %v5008_v25 = vrot.slane %v2388_v53, %v4465_v42  ;;  %v7144_v53 = vld [vmem:[#allocation16_spill] sm:$0xff] }
  0xd6   : > { %v2356_v18 = vcombine.low %v4891_v21, %v4923_v31  ;;  %3646 = vrot.lane.b32.xlu1 %v3502_v58, %s4006_s19 }
  0xd7   : > { %v4947_v46 = vrot.slane %v2372_v59, %v4353_v29  ;;  %3674 = vrot.lane.b32.xlu0 %v3638_v12, %s4006_s19  ;;  %v4963_v59 = vrot.slane %v3526_v4, %v4353_v29  ;;  %v3182_v12 = vcombine.high %v4773_v27, %v4770_v43  ;;  %v3452_v4 = vrot.slane %v3438_v52, %v4465_v42 }
  0xd8   : > { %v4953_v58 = vrot.slane %v2356_v18, %v4353_v29  ;;  %v4955_v44 = vpop.permute.xlu1 %2144  ;;  %v3621_v18 = vcombine.low %v4932_v13, %v4929_v23  ;;  %v3422_v27 = vcombine.high %v4653_v63, %v4679_v41  ;;  %v3406_v43 = vcombine.high %v4655_v8, %v4683_v14  ;;  %v7137_v63 = vld [vmem:[#allocation37_spill] sm:$0xff]  ;;  %v7139_v14 = vld [vmem:[#allocation38_spill] sm:$0xff] }
  0xd9   : > { %7132 = vst [vmem:[#allocation57_spill] sm:$0xff] %v4955_v44  ;;  %v4959_v32 = vpop.permute.xlu0 %2140  ;;  %v3503_v7 = vcombine.low %v3452_v4, %v3484_v1  ;;  %v3589_v52 = vcombine.low %v4971_v56, %v4963_v59  ;;  %v3390_v41 = vcombine.high %v7137_v63, %v4621_v19  ;;  %v5001_v39 = vrot.slane %v3182_v12, %v4465_v42 }
  0xda   : > { %7133 = vst [vmem:[#allocation58_spill] sm:$0xff] %v4959_v32  ;;  %v2420_v17 = vcombine.low %v4953_v58, %v4947_v46  ;;  %3282 = vrot.lane.b32.xlu1 %v3246_v60, %s4006_s19  ;;  %v5005_v40 = vrot.slane %v3621_v18, %v4465_v42  ;;  %7140 = vst [vmem:[#allocation37_spill] sm:$0xff] %v5008_v25  ;;  %v5014_v19 = vrot.slane %v3406_v43, %v4353_v29 }
  0xdb   : > { %3678 = vrot.lane.b32.xlu0 %v3639_v47, %s4007_s20  ;;  %v7138_v47 = vld [vmem:[#allocation39_spill] sm:$0xff]  ;;  %v3110_v18 = vcombine.high %v4885_v50, %v4878_v28 }
  0xdc   : > { %v4983_v60 = vpop.permute.xlu1 %2152  ;;  %v4991_v54 = vrot.slane %v2420_v17, %v4465_v42  ;;  %v3374_v8 = vcombine.high %v7139_v14, %v7138_v47  ;;  %v5011_v17 = vrot.slane %v3422_v27, %v4353_v29  ;;  %v5029_v27 = vrot.slane %v3390_v41, %v4353_v29  ;;  %v7143_v41 = vld [vmem:[#allocation15_spill] sm:$0xff] }
  0xdd   : > { %7134 = vst [vmem:[#allocation59_spill] sm:$0xff] %v4983_v60  ;;  %v4988_v16 = vpop.permute.xlu0 %2148  ;;  %v2204_v47 = vcombine.low %v4955_v44, %v4983_v60  ;;  %v7160_v44 = vld [vmem:[#allocation25_spill] sm:$0xff] }
  0xde   : > { %7135 = vst [vmem:[#allocation60_spill] sm:$0xff] %v4988_v16  ;;  %7136 = vst [vmem:[#allocation61_spill] sm:$0xff] %v4991_v54  ;;  %3682 = vrot.lane.b32.xlu1 %v3640_v26, %s4008_s21  ;;  %v3078_v26 = vcombine.high %v4859_v34, %v4854_v15  ;;  %v5032_v43 = vrot.slane %v3374_v8, %v4353_v29  ;;  %v3046_v34 = vcombine.high %v4851_v11, %v4848_v0  ;;  %v7147_v0 = vld [vmem:[#allocation18_spill] sm:$0xff]  ;;  %v7148_v11 = vld [vmem:[#allocation17_spill] sm:$0xff] }
  0xdf   : > { %3650 = vrot.lane.b32.xlu0 %v3503_v7, %s4007_s20  ;;  %v3247_v7 = vcombine.low %v5001_v39, %v4986_v9  ;;  %v3597_v15 = vrot.slane %v3589_v52, %v4465_v42  ;;  %v2188_v14 = vcombine.low %v4959_v32, %v4988_v16  ;;  %v7145_v8 = vcombine.low %v7143_v41, %v7144_v53  ;;  %v7159_v16 = vld [vmem:[#allocation26_spill] sm:$0xff] }
  0xe0   : > { %v5018_v63 = vpop.permute.xlu1 %2160  ;;  %v3485_v52 = vcombine.low %v5014_v19, %v5011_v17  ;;  %v7161_v60 = vcombine.low %v7159_v16, %v7160_v44 }
  0xe1   : > { %7141 = vst [vmem:[#allocation39_spill] sm:$0xff] %v5018_v63  ;;  %v5022_v12 = vpop.permute.xlu0 %2156  ;;  %v5047_v28 = vrot.slane %v7145_v8, %v4465_v42  ;;  %v3641_v33 = vcombine.low %v3597_v15, %v5005_v40  ;;  %v3504_v8 = vcombine.high %v3452_v4, %v3484_v1  ;;  %v5077_v61 = vrot.slane %v2188_v14, %v4353_v29 }
  0xe2   : > { %7142 = vst [vmem:[#allocation38_spill] sm:$0xff] %v5022_v12  ;;  %3286 = vrot.lane.b32.xlu1 %v3247_v7, %s4007_s20  ;;  %v7149_v7 = vcombine.low %v7147_v0, %v7148_v11  ;;  %v3453_v0 = vcombine.low %v5032_v43, %v5029_v27  ;;  %v3166_v14 = vcombine.high %v4731_v51, %v4757_v57  ;;  %v7165_v57 = vld [vmem:[#allocation4_spill] sm:$0xff] }
  0xe3   : > { %3254 = vrot.lane.b32.xlu0 %v3110_v18, %s4006_s19  ;;  %7146 = vst [vmem:[#allocation15_spill] sm:$0xff] %v5047_v28  ;;  %v5061_v18 = vrot.slane %v3078_v26, %v4465_v42  ;;  %v5074_v26 = vrot.slane %v2204_v47, %v4353_v29  ;;  %v5092_v47 = vrot.slane %v3485_v52, %v4465_v42 }
  0xe4   : > { %v5053_v50 = vrot.slane %v7149_v7, %v4465_v42  ;;  %v5057_v5 = vpop.permute.xlu1 %2168  ;;  %v3060_v7 = vrot.slane %v3046_v34, %v4465_v42  ;;  %v5110_v52 = vrot.slane %v7161_v60, %v4465_v42  ;;  %v5127_v60 = vrot.slane %v3166_v14, %v4353_v29 }
  0xe5   : > { %v2236_v53 = vcombine.low %v5018_v63, %v5057_v5  ;;  %v5065_v41 = vpop.permute.xlu0 %2164  ;;  %v7166_v63 = vld [vmem:[#allocation45_spill] sm:$0xff] }
  0xe6   : > { %7150 = vst [vmem:[#allocation16_spill] sm:$0xff] %v5053_v50  ;;  %7151 = vst [vmem:[#allocation18_spill] sm:$0xff] %v5065_v41  ;;  %v2220_v11 = vcombine.low %v5022_v12, %v5065_v41  ;;  %3686 = vrot.lane.b32.xlu1 %v3641_v33, %s4009_s22  ;;  %v2854_v1 = vcombine.high %v5047_v28, %v5053_v50  ;;  %v3111_v34 = vcombine.low %v3060_v7, %v5061_v18  ;;  %v7155_v28 = vld [vmem:[#allocation24_spill] sm:$0xff]  ;;  %v7156_v50 = vld [vmem:[#allocation23_spill] sm:$0xff] }
  0xe7   : > { %v5080_v6 = vrot.slane %v2236_v53, %v4353_v29  ;;  %3654 = vrot.lane.b32.xlu0 %v3504_v8, %s4008_s21  ;;  %v7153_v53 = vld [vmem:[#allocation6_spill] sm:$0xff]  ;;  %7162 = vst [vmem:[#allocation23_spill] sm:$0xff] %v5110_v52  ;;  %v7163_v12 = vld [vmem:[#allocation3_spill] sm:$0xff]  ;;  %v7164_v41 = vld [vmem:[#allocation44_spill] sm:$0xff] }
  0xe8   : > { %v5086_v4 = vrot.slane %v2220_v11, %v4353_v29  ;;  %v5088_v33 = vpop.permute.xlu1 %1754  ;;  %v3150_v10 = vcombine.high %v7153_v53, %v4761_v49  ;;  %v7157_v11 = vcombine.low %v7155_v28, %v7156_v50  ;;  %v3134_v51 = vcombine.high %v7164_v41, %v7163_v12 }
  0xe9   : > { %7152 = vst [vmem:[#allocation17_spill] sm:$0xff] %v5088_v33  ;;  %v5098_v8 = vpop.permute.xlu0 %1750  ;;  %v3118_v49 = vcombine.high %v7166_v63, %v7165_v57  ;;  %v3461_v28 = vrot.slane %v3453_v0, %v4465_v42  ;;  %v2252_v50 = vcombine.low %v5077_v61, %v5074_v26  ;;  %v3248_v41 = vcombine.high %v5001_v39, %v4986_v9 }
  0xea   : > { %7154 = vst [vmem:[#allocation6_spill] sm:$0xff] %v5098_v8  ;;  %v5104_v32 = vrot.slane %v7157_v11, %v4465_v42  ;;  %v2284_v53 = vcombine.low %v5086_v4, %v5080_v6  ;;  %3258 = vrot.lane.b32.xlu1 %v3111_v34, %s4007_s20  ;;  %v5130_v63 = vrot.slane %v3150_v10, %v4353_v29 }
  0xeb   : > { %2890 = vrot.lane.b32.xlu0 %v2854_v1, %s4006_s19  ;;  %v3505_v44 = vcombine.low %v3461_v28, %v5092_v47  ;;  %v5140_v1 = vrot.slane %v3134_v51, %v4353_v29  ;;  %v5143_v34 = vrot.slane %v3118_v49, %v4353_v29  ;;  %v5150_v14 = vrot.slane %v2252_v50, %v4465_v42 }
  0xec   : > { %7158 = vst [vmem:[#allocation24_spill] sm:$0xff] %v5104_v32  ;;  %v5123_v16 = vpop.permute.xlu1 %1762  ;;  %v5137_v0 = vrot.slane %v2284_v53, %v4465_v42  ;;  %v2718_v10 = vcombine.high %v5104_v32, %v5110_v52  ;;  %v3229_v39 = vcombine.low %v5130_v63, %v5127_v60  ;;  %v3642_v51 = vcombine.high %v3597_v15, %v5005_v40 }
  0xed   : > { %7167 = vst [vmem:[#allocation26_spill] sm:$0xff] %v5123_v16  ;;  %v5132_v12 = vpop.permute.xlu0 %1758  ;;  %7170 = vst [vmem:[#allocation44_spill] sm:$0xff] %v5150_v14  ;;  %v3197_v49 = vcombine.low %v5143_v34, %v5140_v1  ;;  %v1948_v53 = vcombine.low %v5088_v33, %v5123_v16  ;;  %v3622_v40 = vcombine.high %v4932_v13, %v4929_v23 }
  0xee   : > { %7168 = vst [vmem:[#allocation25_spill] sm:$0xff] %v5132_v12  ;;  %7169 = vst [vmem:[#allocation3_spill] sm:$0xff] %v5137_v0  ;;  %3658 = vrot.lane.b32.xlu1 %v3505_v44, %s4009_s22  ;;  %v1932_v50 = vcombine.low %v5098_v8, %v5132_v12  ;;  %v3112_v44 = vcombine.high %v3060_v7, %v5061_v18  ;;  %v3590_v23 = vcombine.high %v4971_v56, %v4963_v59 }
  0xef   : > { %3290 = vrot.lane.b32.xlu0 %v3248_v41, %s4008_s21  ;;  %v3030_v41 = vcombine.high %v4809_v55, %v4835_v62  ;;  %v2998_v13 = vcombine.high %v4783_v48, %v4795_v2  ;;  %v7171_v55 = vld [vmem:[#allocation50_spill] sm:$0xff]  ;;  %v7172_v62 = vld [vmem:[#allocation49_spill] sm:$0xff]  ;;  %v5194_v7 = vrot.slane %v1948_v53, %v4353_v29  ;;  %v7173_v48 = vld [vmem:[#allocation31_spill] sm:$0xff]  ;;  %v3636_v52 = vrot.slane %v3622_v40, %v4465_v42 }
  0xf0   : > { %v5152_v9 = vpop.permute.xlu1 %1770  ;;  %v7174_v2 = vld [vmem:[#allocation32_spill] sm:$0xff]  ;;  %v2453_v40 = vcombine.high %v5008_v25, %v4991_v54  ;;  %v3486_v25 = vcombine.high %v5014_v19, %v5011_v17  ;;  %v7183_v19 = vld [vmem:[#allocation33_spill] sm:$0xff] }
  0xf1   : > { %v5156_v11 = vpop.permute.xlu0 %1766  ;;  %v7175_v56 = vcombine.low %v7173_v48, %v7174_v2  ;;  %v5213_v53 = vrot.slane %v3030_v41, %v4353_v29  ;;  %v3604_v41 = vrot.slane %v3590_v23, %v4465_v42 }
  0xf2   : > { %2862 = vrot.lane.b32.xlu1 %v2718_v10, %s4006_s19  ;;  %v3014_v10 = vcombine.high %v4811_v37, %v4839_v38  ;;  %v3205_v37 = vrot.slane %v3197_v49, %v4465_v42  ;;  %v2982_v38 = vcombine.high %v7172_v62, %v7171_v55  ;;  %v3506_v55 = vcombine.high %v3461_v28, %v5092_v47 }
  0xf3   : > { %3690 = vrot.lane.b32.xlu0 %v3642_v51, %s4010_s23  ;;  %v3237_v51 = vrot.slane %v3229_v39, %v4465_v42  ;;  %v5197_v39 = vrot.slane %v1932_v50, %v4353_v29  ;;  %v3643_v8 = vcombine.low %v3604_v41, %v3636_v52 }
  0xf4   : > { %v5171_v15 = vpop.permute.xlu1 %1778  ;;  %v5216_v50 = vrot.slane %v3014_v10, %v4353_v29  ;;  %v5228_v47 = vrot.slane %v2982_v38, %v4353_v29 }
  0xf5   : > { %v1980_v57 = vcombine.low %v5152_v9, %v5171_v15  ;;  %v5180_v32 = vpop.permute.xlu0 %1774  ;;  %v3249_v62 = vcombine.low %v3205_v37, %v3237_v51  ;;  %v1996_v28 = vcombine.low %v5197_v39, %v5194_v7 }
  0xf6   : > { %v1964_v18 = vcombine.low %v5156_v11, %v5180_v32  ;;  %3262 = vrot.lane.b32.xlu1 %v3112_v44, %s4008_s21 }
  0xf7   : > { %v5200_v59 = vrot.slane %v1980_v57, %v4353_v29  ;;  %2894 = vrot.lane.b32.xlu0 %v7175_v56, %s4007_s20  ;;  %v5250_v23 = vrot.slane %v1996_v28, %v4465_v42  ;;  %v3454_v28 = vcombine.high %v5032_v43, %v5029_v27 }
  0xf8   : > { %v5207_v44 = vrot.slane %v1964_v18, %v4353_v29  ;;  %v5209_v49 = vpop.permute.xlu1 %1752  ;;  %v5225_v18 = vrot.slane %v2998_v13, %v4353_v29 }
  0xf9   : > { %7176 = vst [vmem:[#allocation4_spill] sm:$0xff] %v5209_v49  ;;  %v5218_v57 = vpop.permute.xlu0 %1748  ;;  %7181 = vst [vmem:[#allocation32_spill] sm:$0xff] %v5250_v23 }
  0xfa   : > { %7177 = vst [vmem:[#allocation45_spill] sm:$0xff] %v5218_v57  ;;  %v2028_v56 = vcombine.low %v5207_v44, %v5200_v59  ;;  %3662 = vrot.lane.b32.xlu1 %v3506_v55, %s4010_s23  ;;  %v3093_v55 = vcombine.low %v5216_v50, %v5213_v53 }
  0xfb   : > { %3294 = vrot.lane.b32.xlu0 %v3249_v62, %s4009_s22  ;;  %v3061_v62 = vcombine.low %v5228_v47, %v5225_v18 }
  0xfc   : > { %v5234_v10 = vpop.permute.xlu1 %1760  ;;  %v5243_v38 = vrot.slane %v2028_v56, %v4465_v42  ;;  %v5259_v56 = vrot.slane %v3093_v55, %v4465_v42  ;;  %v7184_v55 = vld [vmem:[#allocation34_spill] sm:$0xff] }
  0xfd   : > { %7178 = vst [vmem:[#allocation50_spill] sm:$0xff] %v5234_v10  ;;  %v5240_v13 = vpop.permute.xlu0 %1756  ;;  %v1812_v33 = vcombine.low %v5209_v49, %v5234_v10  ;;  %v7185_v16 = vcombine.low %v7183_v19, %v7184_v55 }
  0xfe   : > { %7179 = vst [vmem:[#allocation49_spill] sm:$0xff] %v5240_v13  ;;  %7180 = vst [vmem:[#allocation31_spill] sm:$0xff] %v5243_v38  ;;  %2489 = vrot.lane.b32.xlu1 %v2453_v40, %s4006_s19  ;;  %v1796_v17 = vcombine.low %v5218_v57, %v5240_v13  ;;  %v3069_v40 = vrot.slane %v3061_v62, %v4465_v42  ;;  %v3500_v13 = vrot.slane %v3486_v25, %v4465_v42 }
  0xff   : > { %3694 = vrot.lane.b32.xlu0 %v3643_v8, %s4011_s24  ;;  %v7182_v8 = vcombine.high %v7173_v48, %v7174_v2  ;;  %v2421_v48 = vcombine.high %v4953_v58, %v4947_v46  ;;  %v5294_v46 = vrot.slane %v1812_v33, %v4353_v29  ;;  %v3468_v25 = vrot.slane %v3454_v28, %v4465_v42 }
 0x100   : > { %v5252_v54 = vpop.permute.xlu1 %1768  ;;  %v3113_v57 = vcombine.low %v3069_v40, %v5259_v56  ;;  %v5297_v58 = vrot.slane %v1796_v17, %v4353_v29 }
 0x101   : > { %v5256_v12 = vpop.permute.xlu0 %1764  ;;  %v3507_v49 = vcombine.low %v3468_v25, %v3500_v13 }
 0x102   : > { %2898 = vrot.lane.b32.xlu1 %v7182_v8, %s4008_s21  ;;  %v3250_v8 = vcombine.high %v3205_v37, %v3237_v51  ;;  %v3644_v37 = vcombine.high %v3604_v41, %v3636_v52  ;;  %v1860_v28 = vcombine.low %v5297_v58, %v5294_v46  ;;  %v3230_v52 = vcombine.high %v5130_v63, %v5127_v60 }
 0x103   : > { %2866 = vrot.lane.b32.xlu0 %v7185_v16, %s4007_s20  ;;  %v2389_v16 = vcombine.high %v4944_v20, %v4941_v35 }
 0x104   : > { %v5280_v2 = vpop.permute.xlu1 %1776  ;;  %v5335_v60 = vrot.slane %v1860_v28, %v4465_v42 }
 0x105   : > { %v1844_v27 = vcombine.low %v5252_v54, %v5280_v2  ;;  %v5284_v43 = vpop.permute.xlu0 %1772 }
 0x106   : > { %v1828_v62 = vcombine.low %v5256_v12, %v5284_v43  ;;  %3298 = vrot.lane.b32.xlu1 %v3250_v8, %s4010_s23  ;;  %v2435_v8 = vrot.slane %v2421_v48, %v4465_v42  ;;  %7191 = vst [vmem:[#allocation65_spill] sm:$0xff] %v5335_v60 }
 0x107   : > { %v5300_v51 = vrot.slane %v1844_v27, %v4353_v29  ;;  %3266 = vrot.lane.b32.xlu0 %v3113_v57, %s4009_s22  ;;  %v2403_v57 = vrot.slane %v2389_v16, %v4465_v42  ;;  %v3198_v16 = vcombine.high %v5143_v34, %v5140_v1  ;;  %v7195_v1 = vld [vmem:[#allocation36_spill] sm:$0xff] }
 0x108   : > { %v5305_v35 = vrot.slane %v1828_v62, %v4353_v29  ;;  %v5307_v20 = vpop.permute.xlu1 %953  ;;  %v2317_v62 = vcombine.high %v5150_v14, %v5137_v0  ;;  %v7194_v0 = vld [vmem:[#allocation35_spill] sm:$0xff] }
 0x109   : > { %7186 = vst [vmem:[#allocation33_spill] sm:$0xff] %v5307_v20  ;;  %v5310_v33 = vpop.permute.xlu0 %949  ;;  %v2454_v48 = vcombine.low %v2403_v57, %v2435_v8  ;;  %v7196_v34 = vcombine.low %v7194_v0, %v7195_v1 }
 0x10a   : > { %7187 = vst [vmem:[#allocation34_spill] sm:$0xff] %v5310_v33  ;;  %v1892_v17 = vcombine.low %v5305_v35, %v5300_v51  ;;  %3698 = vrot.lane.b32.xlu1 %v3644_v37, %s4012_s25 }
 0x10b   : > { %3666 = vrot.lane.b32.xlu0 %v3507_v49, %s4011_s24  ;;  %v5340_v49 = vrot.slane %v3230_v52, %v4465_v42 }
 0x10c   : > { %v5321_v41 = vpop.permute.xlu1 %961  ;;  %v5328_v37 = vrot.slane %v1892_v17, %v4465_v42 }
 0x10d   : > { %7188 = vst [vmem:[#allocation62_spill] sm:$0xff] %v5321_v41  ;;  %v5323_v27 = vpop.permute.xlu0 %957  ;;  %v1147_v28 = vcombine.low %v5307_v20, %v5321_v41 }
 0x10e   : > { %7189 = vst [vmem:[#allocation63_spill] sm:$0xff] %v5323_v27  ;;  %7190 = vst [vmem:[#allocation64_spill] sm:$0xff] %v5328_v37  ;;  %2493 = vrot.lane.b32.xlu1 %v2454_v48, %s4007_s20  ;;  %v5351_v48 = vrot.slane %v3198_v16, %v4465_v42  ;;  %v1131_v52 = vcombine.low %v5310_v33, %v5323_v27  ;;  %v2285_v16 = vcombine.high %v5086_v4, %v5080_v6 }
 0x10f   : > { %2461 = vrot.lane.b32.xlu0 %v2317_v62, %s4006_s19  ;;  %v7197_v62 = vcombine.high %v7183_v19, %v7184_v55  ;;  %v3114_v33 = vcombine.high %v3069_v40, %v5259_v56  ;;  %v2253_v19 = vcombine.high %v5077_v61, %v5074_v26  ;;  %v5378_v55 = vrot.slane %v1147_v28, %v4353_v29 }
 0x110   : > { %v5337_v63 = vpop.permute.xlu1 %969  ;;  %v3251_v14 = vcombine.low %v5351_v48, %v5340_v49  ;;  %v5381_v6 = vrot.slane %v1131_v52, %v4353_v29  ;;  %v3508_v26 = vcombine.high %v3468_v25, %v3500_v13  ;;  %v5397_v28 = vrot.slane %v2285_v16, %v4465_v42 }
 0x111   : > { %7192 = vst [vmem:[#allocation66_spill] sm:$0xff] %v5337_v63  ;;  %v5342_v10 = vpop.permute.xlu0 %965  ;;  %7200 = vst [vmem:[#allocation68_spill] sm:$0xff] %v5378_v55  ;;  %v2357_v13 = vcombine.high %v4891_v21, %v4923_v31  ;;  %v2455_v16 = vcombine.high %v2403_v57, %v2435_v8  ;;  %v2325_v21 = vcombine.high %v4863_v3, %v4875_v22  ;;  %v7213_v22 = vld [vmem:[#allocation10_spill] sm:$0xff] }
 0x112   : > { %7193 = vst [vmem:[#allocation67_spill] sm:$0xff] %v5342_v10  ;;  %2902 = vrot.lane.b32.xlu1 %v7196_v34, %s4009_s22  ;;  %7201 = vst [vmem:[#allocation69_spill] sm:$0xff] %v5381_v6  ;;  %v2029_v3 = vcombine.high %v5207_v44, %v5200_v59 }
 0x113   : > { %2870 = vrot.lane.b32.xlu0 %v7197_v62, %s4008_s21  ;;  %v2373_v62 = vcombine.high %v4887_v30, %v4915_v45  ;;  %v2341_v30 = vcombine.high %v4861_v24, %v4873_v36  ;;  %v3062_v45 = vcombine.high %v5228_v47, %v5225_v18  ;;  %v5440_v24 = vrot.slane %v2357_v13, %v4353_v29  ;;  %v7214_v18 = vld [vmem:[#allocation8_spill] sm:$0xff]  ;;  %v7218_v13 = vld [vmem:[#allocation14_spill] sm:$0xff] }
 0x114   : > { %v5361_v17 = vpop.permute.xlu1 %977  ;;  %v1540_v47 = vcombine.low %v7214_v18, %v7213_v22  ;;  %v5463_v44 = vrot.slane %v2325_v21, %v4353_v29  ;;  %v7257_v18 = vld [vmem:[#allocation28_spill] sm:$0xff] }
 0x115   : > { %7198 = vst [vmem:[#allocation35_spill] sm:$0xff] %v5361_v17  ;;  %v1179_v34 = vcombine.low %v5337_v63, %v5361_v17  ;;  %v5369_v20 = vpop.permute.xlu0 %973  ;;  %v5437_v57 = vrot.slane %v2373_v62, %v4353_v29  ;;  %v5460_v59 = vrot.slane %v2341_v30, %v4353_v29  ;;  %v7221_v30 = vld [vmem:[#allocation42_spill] sm:$0xff]  ;;  %v7222_v63 = vld [vmem:[#allocation43_spill] sm:$0xff]  ;;  %v5480_v21 = vrot.slane %v3062_v45, %v4465_v42 }
 0x116   : > { %7199 = vst [vmem:[#allocation36_spill] sm:$0xff] %v5369_v20  ;;  %v1163_v27 = vcombine.low %v5342_v10, %v5369_v20  ;;  %3302 = vrot.lane.b32.xlu1 %v3251_v14, %s4011_s24  ;;  %v2061_v14 = vcombine.high %v5250_v23, %v5243_v38  ;;  %v7219_v23 = vld [vmem:[#allocation12_spill] sm:$0xff]  ;;  %v1997_v10 = vcombine.high %v5197_v39, %v5194_v7 }
 0x117   : > { %v5384_v4 = vrot.slane %v1179_v34, %v4353_v29  ;;  %3270 = vrot.lane.b32.xlu0 %v3114_v33, %s4010_s23  ;;  %v1195_v33 = vcombine.low %v5381_v6, %v5378_v55  ;;  %v3094_v34 = vcombine.high %v5216_v50, %v5213_v53  ;;  %v7210_v53 = vld [vmem:[#allocation9_spill] sm:$0xff]  ;;  %v7211_v50 = vld [vmem:[#allocation7_spill] sm:$0xff]  ;;  %v1572_v41 = vcombine.low %v7219_v23, %v7218_v13 }
 0x118   : > { %v5388_v56 = vrot.slane %v1163_v27, %v4353_v29  ;;  %v5390_v40 = vpop.permute.xlu1 %951  ;;  %v5406_v27 = vrot.slane %v2253_v19, %v4465_v42  ;;  %v1556_v8 = vcombine.low %v7211_v50, %v7210_v53  ;;  %v7223_v17 = vcombine.low %v7221_v30, %v7222_v63  ;;  %v7251_v23 = vld [vmem:[#allocation29_spill] sm:$0xff] }
 0x119   : > { %7202 = vst [vmem:[#allocation70_spill] sm:$0xff] %v5384_v4  ;;  %7204 = vst [vmem:[#allocation72_spill] sm:$0xff] %v5390_v40  ;;  %v5394_v61 = vpop.permute.xlu0 %947  ;;  %v5432_v31 = vrot.slane %v1195_v33, %v4465_v42  ;;  %v7216_v33 = vld [vmem:[#allocation11_spill] sm:$0xff]  ;;  %v5453_v38 = vrot.slane %v3094_v34, %v4465_v42  ;;  %v7220_v34 = vcombine.high %v7194_v0, %v7195_v1 }
 0x11a   : > { %7203 = vst [vmem:[#allocation71_spill] sm:$0xff] %v5388_v56  ;;  %7205 = vst [vmem:[#allocation73_spill] sm:$0xff] %v5394_v61  ;;  %v1227_v52 = vcombine.low %v5388_v56, %v5384_v4  ;;  %2097 = vrot.lane.b32.xlu1 %v2061_v14, %s4006_s19  ;;  %v5483_v7 = vrot.slane %v1556_v8, %v4353_v29  ;;  %v2436_v0 = vcombine.low %v5440_v24, %v5437_v57 }
 0x11b   : > { %3670 = vrot.lane.b32.xlu0 %v3508_v26, %s4012_s25  ;;  %v2318_v26 = vcombine.low %v5406_v27, %v5397_v28  ;;  %7209 = vst [vmem:[#allocation77_spill] sm:$0xff] %v5432_v31  ;;  %v3252_v1 = vcombine.high %v5351_v48, %v5340_v49  ;;  %v2404_v49 = vcombine.low %v5463_v44, %v5460_v59 }
 0x11c   : > { %v5412_v25 = vpop.permute.xlu1 %959  ;;  %v5421_v19 = vrot.slane %v1227_v52, %v4465_v42  ;;  %v7215_v52 = vld [vmem:[#allocation13_spill] sm:$0xff]  ;;  %v2319_v6 = vcombine.high %v5406_v27, %v5397_v28 }
 0x11d   : > { %7206 = vst [vmem:[#allocation74_spill] sm:$0xff] %v5412_v25  ;;  %v5416_v14 = vpop.permute.xlu0 %955  ;;  %v1011_v62 = vcombine.low %v5390_v40, %v5412_v25  ;;  %v5507_v40 = vrot.slane %v1572_v41, %v4353_v29 }
 0x11e   : > { %7207 = vst [vmem:[#allocation75_spill] sm:$0xff] %v5416_v14  ;;  %7208 = vst [vmem:[#allocation76_spill] sm:$0xff] %v5421_v19  ;;  %2497 = vrot.lane.b32.xlu1 %v2455_v16, %s4008_s21  ;;  %v1588_v16 = vcombine.low %v7216_v33, %v7215_v52  ;;  %v995_v20 = vcombine.low %v5394_v61, %v5416_v14  ;;  %v5495_v61 = vrot.slane %v1540_v47, %v4353_v29  ;;  %v7254_v33 = vld [vmem:[#allocation48_spill] sm:$0xff] }
 0x11f   : > { %2465 = vrot.lane.b32.xlu0 %v2318_v26, %s4007_s20  ;;  %v3115_v14 = vcombine.low %v5480_v21, %v5453_v38  ;;  %v5518_v47 = vrot.slane %v1011_v62, %v4353_v29 }
 0x120   : > { %v5444_v36 = vpop.permute.xlu1 %967 }
 0x121   : > { %7212 = vst [vmem:[#allocation9_spill] sm:$0xff] %v5444_v36  ;;  %v5450_v26 = vpop.permute.xlu0 %963  ;;  %7226 = vst [vmem:[#allocation43_spill] sm:$0xff] %v5518_v47 }
 0x122   : > { %7217 = vst [vmem:[#allocation7_spill] sm:$0xff] %v5450_v26  ;;  %2906 = vrot.lane.b32.xlu1 %v7220_v34, %s4010_s23  ;;  %v5492_v34 = vrot.slane %v2029_v3, %v4465_v42  ;;  %v5515_v3 = vrot.slane %v1997_v10, %v4465_v42 }
 0x123   : > { %2874 = vrot.lane.b32.xlu0 %v7223_v17, %s4009_s22  ;;  %v5498_v17 = vrot.slane %v1588_v16, %v4353_v29  ;;  %v5521_v16 = vrot.slane %v995_v20, %v4353_v29  ;;  %v1925_v20 = vcombine.high %v5335_v60, %v5328_v37 }
 0x124   : > { %v5487_v39 = vpop.permute.xlu1 %975  ;;  %v2062_v10 = vcombine.low %v5515_v3, %v5492_v34 }
 0x125   : > { %7224 = vst [vmem:[#allocation10_spill] sm:$0xff] %v5487_v39  ;;  %v1043_v45 = vcombine.low %v5444_v36, %v5487_v39  ;;  %v5502_v8 = vpop.permute.xlu0 %971  ;;  %7227 = vst [vmem:[#allocation78_spill] sm:$0xff] %v5521_v16  ;;  %v7234_v36 = vld [vmem:[#allocation18_spill] sm:$0xff] }
 0x126   : > { %7225 = vst [vmem:[#allocation42_spill] sm:$0xff] %v5502_v8  ;;  %v1027_v48 = vcombine.low %v5450_v26, %v5502_v8  ;;  %3306 = vrot.lane.b32.xlu1 %v3252_v1, %s4012_s25  ;;  %v5535_v1 = vrot.slane %v2436_v0, %v4465_v42  ;;  %v1636_v0 = vcombine.low %v5507_v40, %v5498_v17  ;;  %v7235_v39 = vld [vmem:[#allocation38_spill] sm:$0xff] }
 0x127   : > { %v5524_v41 = vrot.slane %v1043_v45, %v4353_v29  ;;  %3274 = vrot.lane.b32.xlu0 %v3115_v14, %s4011_s24  ;;  %v5545_v14 = vrot.slane %v2404_v49, %v4465_v42  ;;  %v1059_v8 = vcombine.low %v5521_v16, %v5518_v47 }
 0x128   : > { %v5528_v25 = vrot.slane %v1027_v48, %v4353_v29  ;;  %v5530_v26 = vpop.permute.xlu1 %561  ;;  %v1604_v48 = vcombine.low %v5495_v61, %v5483_v7  ;;  %v5574_v47 = vrot.slane %v1636_v0, %v4465_v42 }
 0x129   : > { %7228 = vst [vmem:[#allocation79_spill] sm:$0xff] %v5524_v41  ;;  %7230 = vst [vmem:[#allocation81_spill] sm:$0xff] %v5530_v26  ;;  %v5537_v62 = vpop.permute.xlu0 %557  ;;  %v2456_v60 = vcombine.low %v5545_v14, %v5535_v1  ;;  %v5582_v28 = vrot.slane %v1059_v8, %v4465_v42 }
 0x12a   : > { %7229 = vst [vmem:[#allocation80_spill] sm:$0xff] %v5528_v25  ;;  %7231 = vst [vmem:[#allocation82_spill] sm:$0xff] %v5537_v62  ;;  %v1091_v45 = vcombine.low %v5528_v25, %v5524_v41  ;;  %2101 = vrot.lane.b32.xlu1 %v2062_v10, %s4007_s20  ;;  %v7233_v10 = vld [vmem:[#allocation39_spill] sm:$0xff]  ;;  %v2221_v25 = vcombine.high %v7235_v39, %v7234_v36  ;;  %v7242_v36 = vld [vmem:[#allocation60_spill] sm:$0xff] }
 0x12b   : > { %2069 = vrot.lane.b32.xlu0 %v1925_v20, %s4006_s19  ;;  %v2237_v49 = vcombine.high %v7233_v10, %v5057_v5  ;;  %v5571_v20 = vrot.slane %v1604_v48, %v4465_v42  ;;  %7239 = vst [vmem:[#allocation84_spill] sm:$0xff] %v5574_v47  ;;  %v7240_v5 = vld [vmem:[#allocation59_spill] sm:$0xff]  ;;  %v7241_v10 = vld [vmem:[#allocation57_spill] sm:$0xff]  ;;  %v7243_v39 = vld [vmem:[#allocation58_spill] sm:$0xff]  ;;  %v1893_v48 = vcombine.high %v5305_v35, %v5300_v51 }
 0x12c   : > { %v5554_v37 = vpop.permute.xlu1 %569  ;;  %v5567_v16 = vrot.slane %v1091_v45, %v4465_v42  ;;  %v2205_v55 = vcombine.high %v7241_v10, %v7240_v5  ;;  %v2189_v56 = vcombine.high %v7243_v39, %v7242_v36  ;;  %7244 = vst [vmem:[#allocation59_spill] sm:$0xff] %v5582_v28  ;;  %v5590_v45 = vrot.slane %v2221_v25, %v4353_v29  ;;  %v7248_v10 = vld [vmem:[#allocation19_spill] sm:$0xff]  ;;  %v7249_v36 = vld [vmem:[#allocation22_spill] sm:$0xff]  ;;  %v7250_v39 = vld [vmem:[#allocation20_spill] sm:$0xff] }
 0x12d   : > { %7232 = vst [vmem:[#allocation83_spill] sm:$0xff] %v5554_v37  ;;  %v5562_v41 = vpop.permute.xlu0 %565  ;;  %7238 = vst [vmem:[#allocation38_spill] sm:$0xff] %v5571_v20  ;;  %v1404_v4 = vcombine.low %v7250_v39, %v7249_v36  ;;  %v7253_v25 = vld [vmem:[#allocation47_spill] sm:$0xff]  ;;  %v1669_v51 = vcombine.high %v5571_v20, %v5574_v47  ;;  %v7256_v35 = vld [vmem:[#allocation30_spill] sm:$0xff] }
 0x12e   : > { %7236 = vst [vmem:[#allocation39_spill] sm:$0xff] %v5562_v41  ;;  %7237 = vst [vmem:[#allocation18_spill] sm:$0xff] %v5567_v16  ;;  %2501 = vrot.lane.b32.xlu1 %v2456_v60, %s4009_s22  ;;  %v5587_v60 = vrot.slane %v2237_v49, %v4353_v29  ;;  %v7252_v49 = vld [vmem:[#allocation27_spill] sm:$0xff]  ;;  %v7255_v52 = vcombine.low %v7253_v25, %v7254_v33  ;;  %v1436_v5 = vcombine.low %v7257_v18, %v7256_v35 }
 0x12f   : > { %2469 = vrot.lane.b32.xlu0 %v2319_v6, %s4008_s21  ;;  %v7247_v6 = vld [vmem:[#allocation21_spill] sm:$0xff]  ;;  %v1452_v13 = vcombine.low %v7252_v49, %v7251_v23  ;;  %v5613_v28 = vrot.slane %v2205_v55, %v4353_v29  ;;  %v1861_v49 = vcombine.high %v5297_v58, %v5294_v46  ;;  %v7258_v23 = vcombine.high %v7221_v30, %v7222_v63 }
 0x130   : > { %v5584_v27 = vpop.permute.xlu1 %577  ;;  %v1420_v8 = vcombine.low %v7248_v10, %v7247_v6  ;;  %v5616_v10 = vrot.slane %v2189_v56, %v4353_v29  ;;  %v2300_v20 = vcombine.low %v5590_v45, %v5587_v60  ;;  %v3116_v55 = vcombine.high %v5480_v21, %v5453_v38 }
 0x131   : > { %7245 = vst [vmem:[#allocation57_spill] sm:$0xff] %v5584_v27  ;;  %v5594_v0 = vpop.permute.xlu0 %573  ;;  %v5633_v56 = vrot.slane %v1893_v48, %v4465_v42  ;;  %v5639_v58 = vrot.slane %v1404_v4, %v4353_v29  ;;  %v5646_v63 = vrot.slane %v1436_v5, %v4353_v29  ;;  %v5652_v30 = vrot.slane %v1861_v49, %v4465_v42 }
 0x132   : > { %7246 = vst [vmem:[#allocation60_spill] sm:$0xff] %v5594_v0  ;;  %2910 = vrot.lane.b32.xlu1 %v7255_v52, %s4011_s24  ;;  %v5636_v46 = vrot.slane %v1420_v8, %v4353_v29  ;;  %v2268_v38 = vcombine.low %v5616_v10, %v5613_v28  ;;  %v1981_v4 = vcombine.high %v5152_v9, %v5171_v15  ;;  %v7264_v15 = vld [vmem:[#allocation17_spill] sm:$0xff] }
 0x133   : > { %2878 = vrot.lane.b32.xlu0 %v7258_v23, %s4010_s23  ;;  %v5643_v23 = vrot.slane %v1452_v13, %v4353_v29  ;;  %v1965_v21 = vcombine.high %v5156_v11, %v5180_v32  ;;  %v2063_v13 = vcombine.high %v5515_v3, %v5492_v34  ;;  %v1605_v5 = vcombine.high %v5495_v61, %v5483_v7  ;;  %v7263_v11 = vld [vmem:[#allocation26_spill] sm:$0xff]  ;;  %v7265_v3 = vld [vmem:[#allocation25_spill] sm:$0xff] }
 0x134   : > { %v5624_v52 = vpop.permute.xlu1 %585  ;;  %v1926_v9 = vcombine.low %v5652_v30, %v5633_v56  ;;  %v5673_v32 = vrot.slane %v2300_v20, %v4465_v42  ;;  %v1949_v34 = vcombine.high %v7264_v15, %v7263_v11  ;;  %v1637_v7 = vcombine.high %v5507_v40, %v5498_v17 }
 0x135   : > { %7259 = vst [vmem:[#allocation58_spill] sm:$0xff] %v5624_v52  ;;  %v5628_v47 = vpop.permute.xlu0 %581  ;;  %v787_v8 = vcombine.low %v5584_v27, %v5624_v52  ;;  %v739_v20 = vcombine.low %v5537_v62, %v5562_v41  ;;  %v5690_v11 = vrot.slane %v2268_v38, %v4465_v42  ;;  %v5695_v15 = vrot.slane %v1981_v4, %v4353_v29  ;;  %v7275_v27 = vld [vmem:[#allocation54_spill] sm:$0xff] }
 0x136   : > { %7260 = vst [vmem:[#allocation21_spill] sm:$0xff] %v5628_v47  ;;  %1705 = vrot.lane.b32.xlu1 %v1669_v51, %s4006_s19  ;;  %v771_v49 = vcombine.low %v5594_v0, %v5628_v47  ;;  %v1468_v0 = vcombine.low %v5639_v58, %v5636_v46  ;;  %v755_v47 = vcombine.low %v5530_v26, %v5554_v37  ;;  %v7274_v37 = vld [vmem:[#allocation53_spill] sm:$0xff] }
 0x137   : > { %3278 = vrot.lane.b32.xlu0 %v3116_v55, %s4012_s25  ;;  %v7266_v55 = vld [vmem:[#allocation6_spill] sm:$0xff]  ;;  %v5698_v40 = vrot.slane %v1965_v21, %v4353_v29  ;;  %v2320_v4 = vcombine.low %v5690_v11, %v5673_v32  ;;  %v5715_v62 = vrot.slane %v1949_v34, %v4353_v29  ;;  %v7276_v52 = vcombine.low %v7274_v37, %v7275_v27 }
 0x138   : > { %v5658_v48 = vpop.permute.xlu1 %559  ;;  %v1933_v61 = vcombine.high %v7266_v55, %v7265_v3  ;;  %v2457_v3 = vcombine.high %v5545_v14, %v5535_v1  ;;  %v5705_v55 = vrot.slane %v787_v8, %v4353_v29  ;;  %v5708_v38 = vrot.slane %v771_v49, %v4353_v29 }
 0x139   : > { %7261 = vst [vmem:[#allocation22_spill] sm:$0xff] %v5658_v48  ;;  %v5668_v51 = vpop.permute.xlu0 %555  ;;  %v5722_v1 = vrot.slane %v1605_v5, %v4465_v42  ;;  %v5725_v14 = vrot.slane %v1637_v7, %v4465_v42  ;;  %v5728_v8 = vrot.slane %v755_v47, %v4353_v29  ;;  %v5731_v49 = vrot.slane %v739_v20, %v4353_v29 }
 0x13a   : > { %7262 = vst [vmem:[#allocation20_spill] sm:$0xff] %v5668_v51  ;;  %2105 = vrot.lane.b32.xlu1 %v2063_v13, %s4008_s21  ;;  %v1500_v13 = vcombine.low %v5646_v63, %v5643_v23  ;;  %v5718_v21 = vrot.slane %v1933_v61, %v4353_v29  ;;  %v5735_v34 = vrot.slane %v1468_v0, %v4465_v42 }
 0x13b   : > { %2073 = vrot.lane.b32.xlu0 %v1926_v9, %s4007_s20  ;;  %v2044_v5 = vcombine.low %v5698_v40, %v5695_v15  ;;  %v835_v47 = vcombine.low %v5708_v38, %v5705_v55  ;;  %v1670_v41 = vcombine.low %v5722_v1, %v5725_v14  ;;  %v803_v26 = vcombine.low %v5731_v49, %v5728_v8 }
 0x13c   : > { %v5700_v17 = vpop.permute.xlu1 %567  ;;  %7269 = vst [vmem:[#allocation30_spill] sm:$0xff] %v5735_v34  ;;  %v5738_v61 = vrot.slane %v1500_v13, %v4465_v42  ;;  %v2012_v20 = vcombine.low %v5718_v21, %v5715_v62 }
 0x13d   : > { %7267 = vst [vmem:[#allocation47_spill] sm:$0xff] %v5700_v17  ;;  %v5710_v9 = vpop.permute.xlu0 %563  ;;  %v619_v0 = vcombine.low %v5658_v48, %v5700_v17 }
 0x13e   : > { %7268 = vst [vmem:[#allocation48_spill] sm:$0xff] %v5710_v9  ;;  %2505 = vrot.lane.b32.xlu1 %v2457_v3, %s4010_s23  ;;  %7270 = vst [vmem:[#allocation28_spill] sm:$0xff] %v5738_v61  ;;  %v603_v13 = vcombine.low %v5668_v51, %v5710_v9  ;;  %v1533_v48 = vcombine.high %v5735_v34, %v5738_v61  ;;  %v2437_v51 = vcombine.high %v5440_v24, %v5437_v57 }
 0x13f   : > { %2473 = vrot.lane.b32.xlu0 %v2320_v4, %s4009_s22  ;;  %v7273_v4 = vcombine.high %v7253_v25, %v7254_v33  ;;  %v5773_v33 = vrot.slane %v2044_v5, %v4465_v42  ;;  %v2405_v25 = vcombine.high %v5463_v44, %v5460_v59  ;;  %v5785_v34 = vrot.slane %v619_v0, %v4353_v29 }
 0x140   : > { %v5742_v3 = vpop.permute.xlu1 %575  ;;  %v5788_v57 = vrot.slane %v603_v13, %v4353_v29  ;;  %v5794_v59 = vrot.slane %v2012_v20, %v4465_v42  ;;  %v5801_v5 = vrot.slane %v803_v26, %v4465_v42  ;;  %v1845_v20 = vcombine.high %v5252_v54, %v5280_v2  ;;  %v7282_v2 = vld [vmem:[#allocation4_spill] sm:$0xff] }
 0x141   : > { %7271 = vst [vmem:[#allocation26_spill] sm:$0xff] %v5742_v3  ;;  %v5746_v7 = vpop.permute.xlu0 %571  ;;  %v1927_v26 = vcombine.high %v5652_v30, %v5633_v56  ;;  %v5829_v54 = vrot.slane %v2405_v25, %v4465_v42  ;;  %v1469_v30 = vcombine.high %v5639_v58, %v5636_v46  ;;  %v2321_v46 = vcombine.high %v5690_v11, %v5673_v32 }
 0x142   : > { %7272 = vst [vmem:[#allocation17_spill] sm:$0xff] %v5746_v7  ;;  %2914 = vrot.lane.b32.xlu1 %v7273_v4, %s4012_s25  ;;  %7280 = vst [vmem:[#allocation54_spill] sm:$0xff] %v5801_v5  ;;  %v2064_v13 = vcombine.low %v5794_v59, %v5773_v33  ;;  %v667_v61 = vcombine.low %v5788_v57, %v5785_v34  ;;  %v1260_v11 = vcombine.high %v5432_v31, %v5421_v19  ;;  %v7297_v31 = vld [vmem:[#allocation69_spill] sm:$0xff] }
 0x143   : > { %2882 = vrot.lane.b32.xlu0 %v7276_v52, %s4011_s24  ;;  %v5782_v52 = vrot.slane %v835_v47, %v4465_v42 }
 0x144   : > { %v5770_v9 = vpop.permute.xlu1 %583  ;;  %v5859_v58 = vrot.slane %v667_v61, %v4465_v42  ;;  %v1671_v61 = vcombine.high %v5722_v1, %v5725_v14 }
 0x145   : > { %7277 = vst [vmem:[#allocation25_spill] sm:$0xff] %v5770_v9  ;;  %v651_v4 = vcombine.low %v5742_v3, %v5770_v9  ;;  %v5779_v17 = vpop.permute.xlu0 %579  ;;  %7279 = vst [vmem:[#allocation53_spill] sm:$0xff] %v5782_v52  ;;  %v7291_v9 = vld [vmem:[#allocation12_spill] sm:$0xff] }
 0x146   : > { %7278 = vst [vmem:[#allocation6_spill] sm:$0xff] %v5779_v17  ;;  %v635_v24 = vcombine.low %v5746_v7, %v5779_v17  ;;  %1709 = vrot.lane.b32.xlu1 %v1670_v41, %s4007_s20  ;;  %v5811_v41 = vrot.slane %v2437_v51, %v4465_v42  ;;  %v7283_v7 = vld [vmem:[#allocation49_spill] sm:$0xff]  ;;  %7286 = vst [vmem:[#allocation4_spill] sm:$0xff] %v5859_v58 }
 0x147   : > { %v5797_v44 = vrot.slane %v651_v4, %v4353_v29  ;;  %1677 = vrot.lane.b32.xlu0 %v1533_v48, %s4006_s19  ;;  %v1829_v48 = vcombine.high %v5256_v12, %v5284_v43  ;;  %v7281_v12 = vld [vmem:[#allocation50_spill] sm:$0xff]  ;;  %v7284_v17 = vld [vmem:[#allocation45_spill] sm:$0xff] }
 0x148   : > { %v5804_v47 = vrot.slane %v635_v24, %v4353_v29  ;;  %v5806_v0 = vpop.permute.xlu1 %3646  ;;  %v1813_v43 = vcombine.high %v7282_v2, %v7281_v12  ;;  %v1797_v56 = vcombine.high %v7284_v17, %v7283_v7  ;;  %v1501_v24 = vcombine.high %v5646_v63, %v5643_v23 }
 0x149   : > { %v5817_v4 = vpop.permute.xlu0 %3674  ;;  %v2458_v25 = vcombine.low %v5829_v54, %v5811_v41  ;;  %v5848_v12 = vrot.slane %v1845_v20, %v4353_v29  ;;  %v5851_v17 = vrot.slane %v1829_v48, %v4353_v29  ;;  %v5869_v20 = vrot.slane %v1469_v30, %v4465_v42  ;;  %v7289_v30 = vld [vmem:[#allocation11_spill] sm:$0xff] }
 0x14a   : > { %v699_v51 = vcombine.low %v5804_v47, %v5797_v44  ;;  %2109 = vrot.lane.b32.xlu1 %v2064_v13, %s4009_s22  ;;  %v5862_v23 = vrot.slane %v1813_v43, %v4353_v29  ;;  %v5865_v63 = vrot.slane %v1797_v56, %v4353_v29  ;;  %v5872_v48 = vrot.slane %v1501_v24, %v4465_v42  ;;  %v7287_v43 = vld [vmem:[#allocation8_spill] sm:$0xff]  ;;  %v7288_v56 = vld [vmem:[#allocation13_spill] sm:$0xff] }
 0x14b   : > { %2077 = vrot.lane.b32.xlu0 %v1927_v26, %s4008_s21  ;;  %v1557_v26 = vcombine.high %v7211_v50, %v7210_v53  ;;  %v1541_v24 = vcombine.high %v7287_v43, %v7213_v22  ;;  %v7292_v50 = vcombine.high %v7274_v37, %v7275_v27 }
 0x14c   : > { %v5840_v3 = vpop.permute.xlu1 %3282  ;;  %v5845_v13 = vrot.slane %v699_v51, %v4465_v42  ;;  %v1908_v51 = vcombine.low %v5851_v17, %v5848_v12  ;;  %v1876_v53 = vcombine.low %v5865_v63, %v5862_v23  ;;  %v1534_v22 = vcombine.low %v5869_v20, %v5872_v48 }
 0x14d   : > { %v5853_v7 = vpop.permute.xlu0 %3678  ;;  %v5911_v14 = vrot.slane %v1557_v26, %v4353_v29  ;;  %v7294_v26 = vld [vmem:[#allocation70_spill] sm:$0xff] }
 0x14e   : > { %7285 = vst [vmem:[#allocation50_spill] sm:$0xff] %v5845_v13  ;;  %2509 = vrot.lane.b32.xlu1 %v2458_v25, %s4011_s24  ;;  %v1589_v25 = vcombine.high %v7289_v30, %v7288_v56  ;;  %v1916_v1 = vrot.slane %v1908_v51, %v4465_v42  ;;  %v5914_v56 = vrot.slane %v1541_v24, %v4353_v29  ;;  %v7295_v51 = vld [vmem:[#allocation71_spill] sm:$0xff] }
 0x14f   : > { %2477 = vrot.lane.b32.xlu0 %v2321_v46, %s4010_s23  ;;  %v7290_v46 = vld [vmem:[#allocation14_spill] sm:$0xff]  ;;  %v1228_v30 = vcombine.high %v7295_v51, %v7294_v26 }
 0x150   : > { %v5874_v32 = vpop.permute.xlu1 %3682  ;;  %v1573_v19 = vcombine.high %v7291_v9, %v7290_v46  ;;  %v2301_v9 = vcombine.high %v5590_v45, %v5587_v60  ;;  %v5917_v37 = vrot.slane %v1589_v25, %v4353_v29  ;;  %v2269_v60 = vcombine.high %v5616_v10, %v5613_v28 }
 0x151   : > { %v5884_v2 = vpop.permute.xlu0 %3650  ;;  %v1884_v45 = vrot.slane %v1876_v53, %v4465_v42  ;;  %v2065_v25 = vcombine.high %v5794_v59, %v5773_v33  ;;  %v1620_v10 = vcombine.low %v5914_v56, %v5911_v14 }
 0x152   : > { %1296 = vrot.lane.b32.xlu1 %v1260_v11, %s4006_s19  ;;  %v5920_v27 = vrot.slane %v1573_v19, %v4353_v29  ;;  %v2283_v33 = vrot.slane %v2269_v60, %v4465_v42 }
 0x153   : > { %2886 = vrot.lane.b32.xlu0 %v7292_v50, %s4012_s25  ;;  %v1928_v19 = vcombine.low %v1884_v45, %v1916_v1  ;;  %v7296_v50 = vld [vmem:[#allocation68_spill] sm:$0xff] }
 0x154   : > { %v5903_v43 = vpop.permute.xlu1 %3286  ;;  %v1196_v28 = vcombine.high %v7297_v31, %v7296_v50  ;;  %v1652_v53 = vcombine.low %v5920_v27, %v5917_v37  ;;  %v7300_v50 = vld [vmem:[#allocation59_spill] sm:$0xff] }
 0x155   : > { %v5907_v11 = vpop.permute.xlu0 %3254 }
 0x156   : > { %7293 = vst [vmem:[#allocation49_spill] sm:$0xff] %v5907_v11  ;;  %1713 = vrot.lane.b32.xlu1 %v1671_v61, %s4008_s21  ;;  %v2315_v61 = vrot.slane %v2301_v9, %v4465_v42  ;;  %v5950_v9 = vrot.slane %v1228_v30, %v4465_v42  ;;  %v1210_v51 = vrot.slane %v1196_v28, %v4465_v42  ;;  %v7325_v11 = vld [vmem:[#allocation40_spill] sm:$0xff] }
 0x157   : > { %1681 = vrot.lane.b32.xlu0 %v1534_v22, %s4007_s20  ;;  %v2459_v22 = vcombine.high %v5829_v54, %v5811_v41  ;;  %v5960_v60 = vrot.slane %v1652_v53, %v4465_v42  ;;  %v2045_v41 = vcombine.high %v5698_v40, %v5695_v15  ;;  %v1124_v28 = vcombine.high %v7300_v50, %v5567_v16  ;;  %v7316_v50 = vld [vmem:[#allocation62_spill] sm:$0xff] }
 0x158   : > { %v5929_v24 = vpop.permute.xlu1 %3686  ;;  %v2322_v26 = vcombine.low %v2283_v33, %v2315_v61  ;;  %v1261_v30 = vcombine.low %v1210_v51, %v5950_v9  ;;  %v2013_v53 = vcombine.high %v5718_v21, %v5715_v62  ;;  %v1405_v40 = vcombine.high %v7250_v39, %v7249_v36 }
 0x159   : > { %v5933_v46 = vpop.permute.xlu0 %3654  ;;  %v1437_v16 = vcombine.high %v7257_v18, %v7256_v35  ;;  %v5991_v21 = vrot.slane %v2045_v41, %v4465_v42  ;;  %v7306_v41 = vld [vmem:[#allocation79_spill] sm:$0xff] }
 0x15a   : > { %2113 = vrot.lane.b32.xlu1 %v2065_v25, %s4010_s23  ;;  %v5957_v25 = vrot.slane %v1620_v10, %v4465_v42  ;;  %v7301_v10 = vld [vmem:[#allocation19_spill] sm:$0xff]  ;;  %v5997_v36 = vrot.slane %v2013_v53, %v4465_v42  ;;  %v6003_v18 = vrot.slane %v1405_v40, %v4353_v29  ;;  %v1929_v53 = vcombine.high %v1884_v45, %v1916_v1 }
 0x15b   : > { %2081 = vrot.lane.b32.xlu0 %v1928_v19, %s4009_s22  ;;  %v2323_v1 = vcombine.high %v2283_v33, %v2315_v61  ;;  %v7313_v33 = vld [vmem:[#allocation36_spill] sm:$0xff] }
 0x15c   : > { %v5945_v59 = vpop.permute.xlu1 %3258  ;;  %v1672_v15 = vcombine.low %v5957_v25, %v5960_v60 }
 0x15d   : > { %7298 = vst [vmem:[#allocation45_spill] sm:$0xff] %v5945_v59  ;;  %v5952_v31 = vpop.permute.xlu0 %2890 }
 0x15e   : > { %7299 = vst [vmem:[#allocation8_spill] sm:$0xff] %v5952_v31  ;;  %2513 = vrot.lane.b32.xlu1 %v2459_v22, %s4012_s25  ;;  %v1421_v22 = vcombine.high %v7301_v10, %v7247_v6  ;;  %v7303_v31 = vld [vmem:[#allocation27_spill] sm:$0xff]  ;;  %v1535_v6 = vcombine.high %v5869_v20, %v5872_v48  ;;  %v6009_v20 = vrot.slane %v1437_v16, %v4353_v29 }
 0x15f   : > { %2481 = vrot.lane.b32.xlu0 %v2322_v26, %s4011_s24  ;;  %v7302_v26 = vld [vmem:[#allocation29_spill] sm:$0xff] }
 0x160   : > { %v5965_v54 = vpop.permute.xlu1 %3658  ;;  %v1453_v59 = vcombine.high %v7303_v31, %v7302_v26  ;;  %v6000_v39 = vrot.slane %v1421_v22, %v4353_v29  ;;  %v2066_v31 = vcombine.low %v5997_v36, %v5991_v21 }
 0x161   : > { %v5968_v19 = vpop.permute.xlu0 %3290 }
 0x162   : > { %1300 = vrot.lane.b32.xlu1 %v1261_v30, %s4007_s20  ;;  %v6006_v35 = vrot.slane %v1453_v59, %v4353_v29  ;;  %v7309_v59 = vld [vmem:[#allocation43_spill] sm:$0xff]  ;;  %v1484_v16 = vcombine.low %v6003_v18, %v6000_v39 }
 0x163   : > { %1268 = vrot.lane.b32.xlu0 %v1124_v28, %s4006_s19  ;;  %v7307_v28 = vld [vmem:[#allocation80_spill] sm:$0xff] }
 0x164   : > { %v5988_v62 = vpop.permute.xlu1 %2862  ;;  %v1092_v10 = vcombine.high %v7307_v28, %v7306_v41  ;;  %v1516_v26 = vcombine.low %v6009_v20, %v6006_v35  ;;  %v868_v41 = vcombine.high %v5801_v5, %v5782_v52  ;;  %v7312_v52 = vld [vmem:[#allocation66_spill] sm:$0xff] }
 0x165   : > { %7304 = vst [vmem:[#allocation13_spill] sm:$0xff] %v5988_v62  ;;  %v5993_v30 = vpop.permute.xlu0 %3690 }
 0x166   : > { %1717 = vrot.lane.b32.xlu1 %v1672_v15, %s4009_s22  ;;  %v7310_v15 = vld [vmem:[#allocation78_spill] sm:$0xff]  ;;  %v6035_v45 = vrot.slane %v1092_v10, %v4465_v42  ;;  %v7314_v10 = vld [vmem:[#allocation67_spill] sm:$0xff] }
 0x167   : > { %1685 = vrot.lane.b32.xlu0 %v1535_v6, %s4008_s21  ;;  %v1060_v40 = vcombine.high %v7310_v15, %v7309_v59  ;;  %v6046_v59 = vrot.slane %v1516_v26, %v4465_v42  ;;  %v7311_v15 = vld [vmem:[#allocation35_spill] sm:$0xff]  ;;  %v1164_v5 = vcombine.high %v7314_v10, %v7313_v33  ;;  %v7319_v10 = vld [vmem:[#allocation34_spill] sm:$0xff] }
 0x168   : > { %v6012_v48 = vpop.permute.xlu1 %3262  ;;  %v1180_v61 = vcombine.high %v7312_v52, %v7311_v15  ;;  %v7317_v52 = vld [vmem:[#allocation33_spill] sm:$0xff]  ;;  %v7318_v33 = vld [vmem:[#allocation63_spill] sm:$0xff] }
 0x169   : > { %7305 = vst [vmem:[#allocation11_spill] sm:$0xff] %v6012_v48  ;;  %v6018_v22 = vpop.permute.xlu0 %2894  ;;  %v1148_v15 = vcombine.high %v7317_v52, %v7316_v50  ;;  %v1132_v62 = vcombine.high %v7319_v10, %v7318_v33  ;;  %v6108_v52 = vld [vmem:[%s4053_s16 + $0x98] sm:$0xff]  ;;  %v7324_v48 = vld [vmem:[#allocation41_spill] sm:$0xff] }
 0x16a   : > { %7308 = vst [vmem:[#allocation14_spill] sm:$0xff] %v6018_v22  ;;  %2117 = vrot.lane.b32.xlu1 %v2066_v31, %s4011_s24  ;;  %v6040_v31 = vrot.slane %v1060_v40, %v4465_v42  ;;  %v1909_v40 = vcombine.high %v5851_v17, %v5848_v12  ;;  %v1673_v12 = vcombine.high %v5957_v25, %v5960_v60  ;;  %v6084_v60 = vld [vmem:[%s4053_s16 + $0x38] sm:$0xff] }
 0x16b   : > { %2085 = vrot.lane.b32.xlu0 %v1929_v53, %s4010_s23  ;;  %v6043_v53 = vrot.slane %v1484_v16, %v4465_v42  ;;  %v1877_v17 = vcombine.high %v5865_v63, %v5862_v23  ;;  %v6074_v50 = vrot.slane %v1180_v61, %v4353_v29  ;;  %v6077_v25 = vrot.slane %v1164_v5, %v4353_v29  ;;  %v6097_v5 = vld [vmem:[%s4053_s16 + $0x50] sm:$0xff] }
 0x16c   : > { %v6028_v6 = vpop.permute.xlu1 %3662  ;;  %v1125_v26 = vcombine.low %v6040_v31, %v6035_v45  ;;  %v836_v23 = vcombine.high %v5708_v38, %v5705_v55  ;;  %v6094_v61 = vrot.slane %v1909_v40, %v4465_v42  ;;  %v6100_v55 = vld [vmem:[%s4053_s16 + $0x20] sm:$0xff]  ;;  %v6113_v10 = vrot.slane %v1148_v15, %v4353_v29 }
 0x16d   : > { %v6032_v28 = vpop.permute.xlu0 %3294  ;;  %v340_v38 = vcombine.low %v6100_v55, %v6097_v5  ;;  %v6116_v40 = vrot.slane %v1132_v62, %v4353_v29  ;;  %v7326_v15 = vcombine.low %v7324_v48, %v7325_v11  ;;  %v6136_v62 = vrot.slane %v1877_v17, %v4465_v42 }
 0x16e   : > { %904 = vrot.lane.b32.xlu1 %v868_v41, %s4006_s19 }
 0x16f   : > { %2485 = vrot.lane.b32.xlu0 %v2323_v1, %s4012_s25  ;;  %v1262_v1 = vcombine.high %v1210_v51, %v5950_v9  ;;  %v1536_v9 = vcombine.low %v6043_v53, %v6046_v59  ;;  %v2067_v51 = vcombine.high %v5997_v36, %v5991_v21  ;;  %v1211_v17 = vcombine.low %v6116_v40, %v6113_v10 }
 0x170   : > { %v6052_v41 = vpop.permute.xlu1 %2489 }
 0x171   : > { %7315 = vst [vmem:[#allocation12_spill] sm:$0xff] %v6052_v41  ;;  %v3695_v16 = vpop.permute.xlu0 %3694  ;;  %v804_v41 = vcombine.high %v5731_v49, %v5728_v8  ;;  %v1621_v8 = vcombine.high %v5914_v56, %v5911_v14  ;;  %v1653_v49 = vcombine.high %v5920_v27, %v5917_v37  ;;  %v1930_v37 = vcombine.low %v6136_v62, %v6094_v61 }
 0x172   : > { %1304 = vrot.lane.b32.xlu1 %v1262_v1, %s4008_s21  ;;  %v6087_v1 = vld [vmem:[%s4053_s16 + $0x8] sm:$0xff]  ;;  %v6161_v27 = vrot.slane %v340_v38, %v4353_v29 }
 0x173   : > { %1272 = vrot.lane.b32.xlu0 %v1125_v26, %s4007_s20  ;;  %v324_v21 = vcombine.low %v6087_v1, %v6084_v60  ;;  %v6105_v26 = vld [vmem:[%s4053_s16 + $0x68] sm:$0xff] }
 0x174   : > { %v6081_v63 = vpop.permute.xlu1 %2898  ;;  %7322 = vst [vmem:[#allocation68_spill] sm:$0xff] %v6105_v26  ;;  %v356_v33 = vcombine.low %v6105_v26, %v6108_v52  ;;  %v3708_v26 = vsel %vm516_vm2, %v7326_v15, %v5817_v4  ;;  %v6149_v4 = vrot.slane %v836_v23, %v4465_v42 }
 0x175   : > { %7320 = vst [vmem:[#allocation70_spill] sm:$0xff] %v6081_v63  ;;  %v6091_v36 = vpop.permute.xlu0 %2866  ;;  %v6125_v63 = vld [vmem:[%s4053_s16 + $0xb0] sm:$0xff]  ;;  %v6152_v48 = vrot.slane %v324_v21, %v4353_v29 }
 0x176   : > { %7321 = vst [vmem:[#allocation71_spill] sm:$0xff] %v6091_v36  ;;  %1721 = vrot.lane.b32.xlu1 %v1673_v12, %s4010_s23  ;;  %v6122_v36 = vld [vmem:[%s4053_s16 + $0x80] sm:$0xff]  ;;  %v1243_v12 = vcombine.low %v6077_v25, %v6074_v50 }
 0x177   : > { %7323 = vst [vmem:[#allocation69_spill] sm:$0xff] %v6122_v36  ;;  %v372_v22 = vcombine.low %v6122_v36, %v6125_v63  ;;  %1689 = vrot.lane.b32.xlu0 %v1536_v9, %s4009_s22  ;;  %v3709_v36 = vsel %vm518_vm3, %v3708_v26, %v5853_v7  ;;  %v6164_v7 = vrot.slane %v356_v33, %v4353_v29 }
 0x178   : > { %v6146_v11 = vpop.permute.xlu1 %3298  ;;  %v3710_v14 = vsel %vm520_vm4, %v3709_v36, %v5874_v32  ;;  %v6172_v32 = vrot.slane %v804_v41, %v4465_v42  ;;  %v6195_v33 = vrot.slane %v1653_v49, %v4465_v42  ;;  %v388_v15 = vcombine.low %v6152_v48, %v6161_v27  ;;  %v7328_v49 = vld [vmem:[#allocation10_spill] sm:$0xff] }
 0x179   : > { %v6156_v56 = vpop.permute.xlu0 %3266  ;;  %v3711_v9 = vsel %vm522_vm5, %v3710_v14, %v5929_v24  ;;  %v6175_v23 = vrot.slane %v372_v22, %v4353_v29  ;;  %v6184_v24 = vrot.slane %v1243_v12, %v4465_v42  ;;  %v732_v22 = vcombine.high %v5859_v58, %v5845_v13  ;;  %v7336_v13 = vld [vmem:[#allocation75_spill] sm:$0xff]  ;;  %v7337_v58 = vld [vmem:[#allocation73_spill] sm:$0xff] }
 0x17a   : > { %2121 = vrot.lane.b32.xlu1 %v2067_v51, %s4012_s25  ;;  %v3712_v21 = vsel %vm524_vm6, %v3711_v9, %v5993_v30  ;;  %v869_v26 = vcombine.low %v6172_v32, %v6149_v4  ;;  %v6192_v30 = vrot.slane %v1621_v8, %v4465_v42 }
 0x17b   : > { %2089 = vrot.lane.b32.xlu0 %v1930_v37, %s4011_s24  ;;  %v3713_v36 = vsel %vm526_vm7, %v3712_v21, %v3695_v16  ;;  %v6199_v16 = vrot.slane %v1211_v17, %v4465_v42  ;;  %v420_v12 = vcombine.low %v6164_v7, %v6175_v23  ;;  %v7329_v37 = vld [vmem:[#allocation9_spill] sm:$0xff]  ;;  %v7330_v21 = vld [vmem:[#allocation42_spill] sm:$0xff] }
 0x17c   : > { %v3699_v38 = vpop.permute.xlu1 %3698  ;;  %v1044_v9 = vcombine.high %v7329_v37, %v7328_v49  ;;  %v7334_v37 = vld [vmem:[#allocation74_spill] sm:$0xff] }
 0x17d   : > { %v6186_v51 = vpop.permute.xlu0 %3666  ;;  %v3714_v41 = vsel %vm528_vm8, %v3713_v36, %v3699_v38  ;;  %v1263_v8 = vcombine.low %v6199_v16, %v6184_v24  ;;  %v7331_v36 = vld [vmem:[#allocation7_spill] sm:$0xff]  ;;  %v6225_v49 = vrot.slane %v420_v12, %v4465_v42  ;;  %v1517_v12 = vcombine.high %v6009_v20, %v6006_v35  ;;  %v6262_v35 = vld [vmem:[%s4053_s16 + $0x18] sm:$0xff]  ;;  %v6265_v20 = vld [vmem:[%s4053_s16 + $0x48] sm:$0xff] }
 0x17e   : > { %908 = vrot.lane.b32.xlu1 %v869_v26, %s4007_s20  ;;  %3754 = vmatprep.subr.mxu0 %v3714_v41  ;;  %v1028_v17 = vcombine.high %v7331_v36, %v7330_v21  ;;  %v1126_v26 = vcombine.high %v6040_v31, %v6035_v45  ;;  %v1674_v41 = vcombine.low %v6192_v30, %v6195_v33  ;;  %v7335_v21 = vld [vmem:[#allocation72_spill] sm:$0xff] }
 0x17f   : > { %876 = vrot.lane.b32.xlu0 %v732_v22, %s4006_s19  ;;  %v6222_v22 = vrot.slane %v388_v15, %v4465_v42  ;;  %7333 = vst [vmem:[#allocation27_spill] sm:$0xff] %v6225_v49  ;;  %v1012_v36 = vcombine.high %v7335_v21, %v7334_v37  ;;  %v996_v45 = vcombine.high %v7337_v58, %v7336_v13  ;;  %7340 = vst [vmem:[#allocation43_spill] sm:$0xff] %v6262_v35 }
 0x180   : > { %v6206_v14 = vpop.permute.xlu1 %2493  ;;  %v1537_v31 = vcombine.high %v6043_v53, %v6046_v59  ;;  %v1485_v15 = vcombine.high %v6003_v18, %v6000_v39  ;;  %v6241_v37 = vrot.slane %v1044_v9, %v4353_v29  ;;  %v6244_v13 = vrot.slane %v1028_v17, %v4353_v29  ;;  %v6251_v59 = vld [vmem:[%s4053_s16] sm:$0xff]  ;;  %7341 = vst [vmem:[#allocation78_spill] sm:$0xff] %v6265_v20  ;;  %v6273_v9 = vld [vmem:[%s4053_s16 + $0x90] sm:$0xff] }
 0x181   : > { %7327 = vst [vmem:[#allocation19_spill] sm:$0xff] %v6206_v14  ;;  %v6214_v38 = vpop.permute.xlu0 %2461  ;;  %7332 = vst [vmem:[#allocation29_spill] sm:$0xff] %v6222_v22  ;;  %v700_v58 = vcombine.high %v5804_v47, %v5797_v44  ;;  %v453_v18 = vcombine.high %v6222_v22, %v6225_v49  ;;  %v204_v44 = vcombine.low %v6262_v35, %v6265_v20  ;;  %v6270_v47 = vld [vmem:[%s4053_s16 + $0x60] sm:$0xff]  ;;  %v6287_v49 = vld [vmem:[%s4053_s16 + $0x78] sm:$0xff] }
 0x182   : > { %1308 = vrot.lane.b32.xlu1 %v1263_v8, %s4009_s22  ;;  %7342 = vst [vmem:[#allocation35_spill] sm:$0xff] %v6270_v47  ;;  %7343 = vst [vmem:[#allocation66_spill] sm:$0xff] %v6273_v9  ;;  %v220_v17 = vcombine.low %v6270_v47, %v6273_v9  ;;  %v6278_v21 = vrot.slane %v1012_v36, %v4353_v29  ;;  %v668_v22 = vcombine.high %v5788_v57, %v5785_v34  ;;  %v6290_v14 = vld [vmem:[%s4053_s16 + $0xa8] sm:$0xff]  ;;  %v7347_v47 = vld [vmem:[#allocation46_spill] sm:$0xff] }
 0x183   : > { %1276 = vrot.lane.b32.xlu0 %v1126_v26, %s4008_s21  ;;  %v6254_v26 = vld [vmem:[%s4053_s16 + $0x30] sm:$0xff]  ;;  %7344 = vst [vmem:[#allocation36_spill] sm:$0xff] %v6287_v49  ;;  %7345 = vst [vmem:[#allocation67_spill] sm:$0xff] %v6290_v14  ;;  %v1931_v34 = vcombine.high %v6136_v62, %v6094_v61  ;;  %v6304_v57 = vrot.slane %v1485_v15, %v4465_v42  ;;  %v389_v62 = vcombine.high %v6152_v48, %v6161_v27  ;;  %v7349_v48 = vld [vmem:[#allocation58_spill] sm:$0xff] }
 0x184   : > { %v6234_v8 = vpop.permute.xlu1 %2902  ;;  %v188_v39 = vcombine.low %v6251_v59, %v6254_v26  ;;  %v6327_v15 = vrot.slane %v204_v44, %v4353_v29  ;;  %v7350_v27 = vld [vmem:[#allocation57_spill] sm:$0xff]  ;;  %v7352_v44 = vld [vmem:[#allocation60_spill] sm:$0xff] }
 0x185   : > { %7338 = vst [vmem:[#allocation79_spill] sm:$0xff] %v6234_v8  ;;  %v6248_v53 = vpop.permute.xlu0 %2870  ;;  %v7346_v8 = vld [vmem:[#allocation5_spill] sm:$0xff] }
 0x186   : > { %7339 = vst [vmem:[#allocation80_spill] sm:$0xff] %v6248_v53  ;;  %1725 = vrot.lane.b32.xlu1 %v1674_v41, %s4011_s24  ;;  %v6281_v41 = vrot.slane %v996_v45, %v4353_v29  ;;  %v236_v53 = vcombine.low %v6287_v49, %v6290_v14  ;;  %v7348_v36 = vcombine.low %v7346_v8, %v7347_v47 }
 0x187   : > { %1693 = vrot.lane.b32.xlu0 %v1537_v31, %s4010_s23  ;;  %v6307_v31 = vrot.slane %v1517_v12, %v4465_v42  ;;  %v1107_v49 = vcombine.low %v6244_v13, %v6241_v37  ;;  %v6319_v47 = vrot.slane %v188_v39, %v4353_v29  ;;  %v788_v39 = vcombine.high %v7350_v27, %v7349_v48 }
 0x188   : > { %v3701_v9 = vsel %vm516_vm2, %v7348_v36, %v5806_v0  ;;  %v6299_v45 = vpop.permute.xlu1 %3302  ;;  %v6316_v0 = vrot.slane %v700_v58, %v4465_v42  ;;  %v1075_v12 = vcombine.low %v6281_v41, %v6278_v21 }
 0x189   : > { %v3702_v14 = vsel %vm518_vm3, %v3701_v9, %v5884_v2  ;;  %v6313_v8 = vpop.permute.xlu0 %3270  ;;  %v6330_v2 = vrot.slane %v220_v17, %v4353_v29 }
 0x18a   : > { %v3703_v61 = vsel %vm520_vm4, %v3702_v14, %v5933_v46  ;;  %489 = vrot.lane.b32.xlu1 %v453_v18, %s4006_s19  ;;  %v6338_v46 = vrot.slane %v668_v22, %v4465_v42  ;;  %v6341_v14 = vrot.slane %v236_v53, %v4353_v29  ;;  %v7351_v18 = vld [vmem:[#allocation21_spill] sm:$0xff] }
 0x18b   : > { %v3704_v58 = vsel %vm522_vm5, %v3703_v61, %v5965_v54  ;;  %2093 = vrot.lane.b32.xlu0 %v1931_v34, %s4012_s25  ;;  %v772_v9 = vcombine.high %v7352_v44, %v7351_v18  ;;  %v870_v54 = vcombine.high %v6172_v32, %v6149_v4  ;;  %v7353_v34 = vld [vmem:[#allocation32_spill] sm:$0xff]  ;;  %v7354_v61 = vld [vmem:[#allocation31_spill] sm:$0xff]  ;;  %v6362_v18 = vrot.slane %v1107_v49, %v4465_v42  ;;  %v7359_v32 = vld [vmem:[#allocation82_spill] sm:$0xff] }
 0x18c   : > { %v3705_v17 = vsel %vm524_vm6, %v3704_v58, %v6028_v6  ;;  %v2098_v36 = vpop.permute.xlu1 %2097  ;;  %v7355_v53 = vcombine.low %v7353_v34, %v7354_v61  ;;  %v733_v27 = vcombine.low %v6338_v46, %v6316_v0  ;;  %v7356_v6 = vld [vmem:[#allocation83_spill] sm:$0xff]  ;;  %v7357_v58 = vld [vmem:[#allocation81_spill] sm:$0xff]  ;;  %v252_v49 = vcombine.low %v6319_v47, %v6327_v15 }
 0x18d   : > { %v3706_v22 = vsel %vm526_vm7, %v3705_v17, %v6186_v51  ;;  %v3671_v48 = vpop.permute.xlu0 %3670  ;;  %v756_v44 = vcombine.high %v7357_v58, %v7356_v6  ;;  %v7358_v4 = vld [vmem:[#allocation39_spill] sm:$0xff]  ;;  %v421_v17 = vcombine.high %v6164_v7, %v6175_v23  ;;  %v284_v34 = vcombine.low %v6330_v2, %v6341_v14  ;;  %v7360_v23 = vld [vmem:[#allocation44_spill] sm:$0xff] }
 0x18e   : > { %v6357_v35 = vsel %vm516_vm2, %v7355_v53, %v2098_v36  ;;  %v740_v20 = vcombine.high %v7359_v32, %v7358_v4  ;;  %912 = vrot.lane.b32.xlu1 %v870_v54, %s4008_s21  ;;  %v3707_v51 = vsel %vm528_vm8, %v3706_v22, %v3671_v48  ;;  %v6374_v36 = vrot.slane %v1075_v12, %v4465_v42  ;;  %v7361_v12 = vld [vmem:[#allocation3_spill] sm:$0xff]  ;;  %v7363_v4 = vld [vmem:[#allocation52_spill] sm:$0xff] }
 0x18f   : > { %3755 = vmatpush1.msra.mxu0 %v3707_v51  ;;  %880 = vrot.lane.b32.xlu0 %v733_v27, %s4007_s20  ;;  %v6381_v61 = vrot.slane %v788_v39, %v4353_v29  ;;  %v6384_v54 = vrot.slane %v772_v9, %v4353_v29  ;;  %v1264_v7 = vcombine.high %v6199_v16, %v6184_v24 }
 0x190   : > { %v6386_v22 = vpop.permute.xlu1 %2497  ;;  %v7362_v53 = vcombine.low %v7360_v23, %v7361_v12  ;;  %v1127_v6 = vcombine.low %v6374_v36, %v6362_v18  ;;  %v1675_v39 = vcombine.high %v6192_v30, %v6195_v33  ;;  %v6400_v9 = vrot.slane %v389_v62, %v4465_v42  ;;  %v7364_v30 = vld [vmem:[#allocation51_spill] sm:$0xff] }
 0x191   : > { %v2466_v27 = vpop.permute.xlu0 %2465  ;;  %v6403_v58 = vrot.slane %v756_v44, %v4353_v29  ;;  %v6406_v24 = vrot.slane %v740_v20, %v4353_v29  ;;  %v7365_v33 = vcombine.low %v7363_v4, %v7364_v30  ;;  %v1538_v20 = vcombine.low %v6304_v57, %v6307_v31  ;;  %v7369_v4 = vld [vmem:[#allocation17_spill] sm:$0xff] }
 0x192   : > { %v2516_v48 = vsel %vm516_vm2, %v7362_v53, %v6214_v38  ;;  %1312 = vrot.lane.b32.xlu1 %v1264_v7, %s4010_s23  ;;  %v6413_v38 = vrot.slane %v421_v17, %v4465_v42  ;;  %v6424_v44 = vrot.slane %v252_v49, %v4465_v42  ;;  %v6427_v32 = vrot.slane %v284_v34, %v4465_v42 }
 0x193   : > { %v6409_v16 = vsel %vm518_vm3, %v2516_v48, %v2466_v27  ;;  %v3316_v62 = vsel %vm516_vm2, %v7365_v33, %v5840_v3  ;;  %1280 = vrot.lane.b32.xlu0 %v1127_v6, %s4009_s22  ;;  %v851_v51 = vcombine.low %v6384_v54, %v6381_v61  ;;  %v819_v49 = vcombine.low %v6406_v24, %v6403_v58  ;;  %v7366_v48 = vld [vmem:[#allocation25_spill] sm:$0xff]  ;;  %v7367_v27 = vld [vmem:[#allocation26_spill] sm:$0xff] }
 0x194   : > { %v3317_v17 = vsel %vm518_vm3, %v3316_v62, %v5903_v43  ;;  %v6433_v7 = vpop.permute.xlu1 %2906  ;;  %v454_v12 = vcombine.low %v6400_v9, %v6413_v38  ;;  %v1244_v43 = vcombine.high %v6077_v25, %v6074_v50  ;;  %v652_v6 = vcombine.high %v7367_v27, %v7366_v48  ;;  %v7373_v48 = vld [vmem:[#allocation20_spill] sm:$0xff] }
 0x195   : > { %v3318_v3 = vsel %vm520_vm4, %v3317_v17, %v5968_v19  ;;  %v6437_v23 = vpop.permute.xlu0 %2874  ;;  %v317_v19 = vcombine.high %v6424_v44, %v6427_v32  ;;  %v6460_v50 = vrot.slane %v851_v51, %v4465_v42  ;;  %v1212_v25 = vcombine.high %v6116_v40, %v6113_v10 }
 0x196   : > { %v3319_v34 = vsel %vm522_vm5, %v3318_v3, %v6032_v28  ;;  %1729 = vrot.lane.b32.xlu1 %v1675_v39, %s4012_s25  ;;  %v7368_v28 = vld [vmem:[#allocation6_spill] sm:$0xff]  ;;  %v285_v17 = vcombine.high %v6330_v2, %v6341_v14  ;;  %v7370_v3 = vld [vmem:[#allocation47_spill] sm:$0xff]  ;;  %v6477_v10 = vrot.slane %v819_v49, %v4465_v42  ;;  %v6481_v40 = vrot.slane %v652_v6, %v4353_v29 }
 0x197   : > { %v3320_v53 = vsel %vm524_vm6, %v3319_v34, %v6146_v11  ;;  %1697 = vrot.lane.b32.xlu0 %v1538_v20, %s4011_s24  ;;  %v636_v39 = vcombine.high %v7369_v4, %v7368_v28  ;;  %v253_v20 = vcombine.high %v6319_v47, %v6327_v15  ;;  %v7371_v34 = vld [vmem:[#allocation22_spill] sm:$0xff]  ;;  %v6489_v14 = vrot.slane %v1244_v43, %v4465_v42  ;;  %v7374_v4 = vld [vmem:[#allocation65_spill] sm:$0xff] }
 0x198   : > { %v3321_v30 = vsel %vm526_vm7, %v3320_v53, %v6299_v45  ;;  %v3307_v33 = vpop.permute.xlu1 %3306  ;;  %v620_v45 = vcombine.high %v7371_v34, %v7370_v3  ;;  %v7372_v53 = vld [vmem:[#allocation48_spill] sm:$0xff]  ;;  %v871_v2 = vcombine.low %v6477_v10, %v6460_v50  ;;  %v6498_v27 = vrot.slane %v1212_v25, %v4465_v42 }
 0x199   : > { %v6464_v11 = vpop.permute.xlu0 %3274  ;;  %v3322_v62 = vsel %vm528_vm8, %v3321_v30, %v3307_v33  ;;  %v604_v51 = vcombine.high %v7373_v48, %v7372_v53  ;;  %v6484_v47 = vrot.slane %v636_v39, %v4353_v29  ;;  %v6501_v6 = vrot.slane %v253_v20, %v4465_v42  ;;  %v7375_v39 = vld [vmem:[#allocation64_spill] sm:$0xff] }
 0x19a   : > { %493 = vrot.lane.b32.xlu1 %v454_v12, %s4007_s20  ;;  %3756 = vmatprep.subr.mxu0 %v3322_v62  ;;  %v6504_v28 = vrot.slane %v620_v45, %v4353_v29  ;;  %v1265_v25 = vcombine.low %v6498_v27, %v6489_v14  ;;  %v1128_v20 = vcombine.high %v6374_v36, %v6362_v18  ;;  %v7377_v53 = vld [vmem:[#allocation68_spill] sm:$0xff]  ;;  %v7381_v36 = vld [vmem:[#allocation55_spill] sm:$0xff] }
 0x19b   : > { %461 = vrot.lane.b32.xlu0 %v317_v19, %s4006_s19  ;;  %v734_v19 = vcombine.high %v6338_v46, %v6316_v0  ;;  %v6507_v43 = vrot.slane %v604_v51, %v4353_v29  ;;  %v6515_v0 = vrot.slane %v285_v17, %v4465_v42  ;;  %v715_v46 = vcombine.low %v6484_v47, %v6481_v40  ;;  %v7378_v51 = vld [vmem:[#allocation69_spill] sm:$0xff] }
 0x19c   : > { %v2102_v15 = vpop.permute.xlu1 %2101  ;;  %v325_v3 = vcombine.high %v6087_v1, %v6084_v60  ;;  %v341_v17 = vcombine.high %v6100_v55, %v6097_v5  ;;  %v357_v48 = vcombine.high %v7377_v53, %v6108_v52  ;;  %v373_v18 = vcombine.high %v7378_v51, %v6125_v63  ;;  %v7379_v5 = vld [vmem:[#allocation49_spill] sm:$0xff]  ;;  %v7380_v55 = vld [vmem:[#allocation56_spill] sm:$0xff]  ;;  %v7386_v53 = vld [vmem:[#allocation15_spill] sm:$0xff] }
 0x19d   : > { %v6493_v12 = vsel %vm518_vm3, %v6357_v35, %v2102_v15  ;;  %v2070_v49 = vpop.permute.xlu0 %2069  ;;  %v7376_v35 = vcombine.low %v7374_v4, %v7375_v39  ;;  %v683_v34 = vcombine.low %v6507_v43, %v6504_v28  ;;  %v318_v45 = vcombine.low %v6501_v6, %v6515_v0  ;;  %v7384_v4 = vld [vmem:[#allocation11_spill] sm:$0xff] }
 0x19e   : > { %916 = vrot.lane.b32.xlu1 %v871_v2, %s4009_s22  ;;  %v1539_v60 = vcombine.high %v6304_v57, %v6307_v31  ;;  %v1108_v1 = vcombine.high %v6244_v13, %v6241_v37  ;;  %v7382_v15 = vcombine.low %v7380_v55, %v7381_v36  ;;  %v6554_v52 = vrot.slane %v715_v46, %v4465_v42  ;;  %v7389_v55 = vld [vmem:[#allocation66_spill] sm:$0xff]  ;;  %v7390_v36 = vld [vmem:[#allocation35_spill] sm:$0xff] }
 0x19f   : > { %v2124_v30 = vsel %vm516_vm2, %v7376_v35, %v2070_v49  ;;  %884 = vrot.lane.b32.xlu0 %v734_v19, %s4008_s21  ;;  %v1076_v63 = vcombine.high %v6281_v41, %v6278_v21  ;;  %v7383_v19 = vld [vmem:[#allocation45_spill] sm:$0xff]  ;;  %v6563_v37 = vrot.slane %v325_v3, %v4353_v29  ;;  %v6566_v13 = vrot.slane %v341_v17, %v4353_v29 }
 0x1a0   : > { %v6520_v33 = vpop.permute.xlu1 %2501  ;;  %v3309_v2 = vsel %vm516_vm2, %v7382_v15, %v7379_v5  ;;  %v691_v35 = vrot.slane %v683_v34, %v4465_v42  ;;  %v6573_v21 = vrot.slane %v357_v48, %v4353_v29  ;;  %v6576_v41 = vrot.slane %v373_v18, %v4353_v29 }
 0x1a1   : > { %v6524_v62 = vpop.permute.xlu0 %2469  ;;  %v3310_v57 = vsel %vm518_vm3, %v3309_v2, %v7383_v19  ;;  %v6587_v34 = vrot.slane %v1108_v1, %v4465_v42  ;;  %v1090_v18 = vrot.slane %v1076_v63, %v4465_v42  ;;  %v7388_v1 = vld [vmem:[#allocation43_spill] sm:$0xff]  ;;  %v221_v15 = vcombine.high %v7390_v36, %v7389_v55  ;;  %v7392_v63 = vld [vmem:[#allocation36_spill] sm:$0xff] }
 0x1a2   : > { %1316 = vrot.lane.b32.xlu1 %v1265_v25, %s4011_s24  ;;  %v3311_v39 = vsel %vm520_vm4, %v3310_v57, %v7384_v4  ;;  %v455_v25 = vcombine.high %v6400_v9, %v6413_v38  ;;  %v735_v17 = vcombine.low %v691_v35, %v6554_v52  ;;  %v436_v38 = vcombine.low %v6573_v21, %v6576_v41  ;;  %v7391_v2 = vld [vmem:[#allocation67_spill] sm:$0xff] }
 0x1a3   : > { %1284 = vrot.lane.b32.xlu0 %v1128_v20, %s4010_s23  ;;  %v3312_v46 = vsel %vm522_vm5, %v3311_v39, %v6156_v56  ;;  %v237_v19 = vcombine.high %v7392_v63, %v7391_v2  ;;  %v1129_v4 = vcombine.low %v1090_v18, %v6587_v34  ;;  %v736_v36 = vcombine.high %v691_v35, %v6554_v52 }
 0x1a4   : > { %v6551_v49 = vpop.permute.xlu1 %2910  ;;  %v3313_v20 = vsel %vm524_vm6, %v3312_v46, %v6313_v8  ;;  %v404_v8 = vcombine.low %v6563_v37, %v6566_v13  ;;  %v1130_v52 = vcombine.high %v1090_v18, %v6587_v34  ;;  %v716_v35 = vcombine.high %v6484_v47, %v6481_v40  ;;  %v7399_v47 = vld [vmem:[#allocation23_spill] sm:$0xff]  ;;  %v7400_v18 = vld [vmem:[#allocation24_spill] sm:$0xff] }
 0x1a5   : > { %v6560_v31 = vpop.permute.xlu0 %2878  ;;  %v3314_v56 = vsel %vm526_vm7, %v3313_v20, %v6464_v11  ;;  %v7387_v11 = vld [vmem:[#allocation78_spill] sm:$0xff]  ;;  %v444_v20 = vrot.slane %v436_v38, %v4465_v42  ;;  %v1266_v38 = vcombine.high %v6498_v27, %v6489_v14  ;;  %v684_v34 = vcombine.high %v6507_v43, %v6504_v28 }
 0x1a6   : > { %465 = vrot.lane.b32.xlu1 %v318_v45, %s4007_s20  ;;  %v7385_v45 = vld [vmem:[#allocation16_spill] sm:$0xff]  ;;  %v205_v5 = vcombine.high %v7388_v1, %v7387_v11  ;;  %v7398_v27 = vld [vmem:[#allocation38_spill] sm:$0xff] }
 0x1a7   : > { %1701 = vrot.lane.b32.xlu0 %v1539_v60, %s4012_s25  ;;  %v2853_v48 = vcombine.low %v7386_v53, %v7385_v45  ;;  %v189_v60 = vcombine.high %v6251_v59, %v6254_v26  ;;  %v872_v59 = vcombine.high %v6477_v10, %v6460_v50  ;;  %v319_v26 = vcombine.high %v6501_v6, %v6515_v0  ;;  %v7393_v45 = vld [vmem:[#allocation8_spill] sm:$0xff] }
 0x1a8   : > { %v1706_v3 = vpop.permute.xlu1 %1705  ;;  %v6629_v50 = vrot.slane %v205_v5, %v4353_v29  ;;  %v6632_v10 = vrot.slane %v221_v15, %v4353_v29  ;;  %v6635_v6 = vrot.slane %v237_v19, %v4353_v29 }
 0x1a9   : > { %v3279_v51 = vpop.permute.xlu0 %3278  ;;  %v2924_v53 = vsel %vm516_vm2, %v2853_v48, %v7393_v45  ;;  %v7395_v48 = vld [vmem:[#allocation70_spill] sm:$0xff] }
 0x1aa   : > { %v3315_v9 = vsel %vm528_vm8, %v3314_v56, %v3279_v51  ;;  %888 = vrot.lane.b32.xlu1 %v735_v17, %s4009_s22  ;;  %v6623_v17 = vrot.slane %v189_v60, %v4353_v29  ;;  %v852_v51 = vcombine.high %v6384_v54, %v6381_v61  ;;  %v820_v29 = vcombine.high %v6406_v24, %v6403_v58  ;;  %v7396_v60 = vld [vmem:[#allocation79_spill] sm:$0xff]  ;;  %v7397_v24 = vld [vmem:[#allocation84_spill] sm:$0xff] }
 0x1ab   : > { %3757 = vmatpush1.msra.mxu0 %v3315_v9  ;;  %497 = vrot.lane.b32.xlu0 %v455_v25, %s4008_s21  ;;  %v412_v25 = vrot.slane %v404_v8, %v4465_v42  ;;  %v300_v14 = vcombine.low %v6632_v10, %v6635_v6  ;;  %v1668_v5 = vcombine.low %v7398_v27, %v7397_v24 }
 0x1ac   : > { %v6609_v57 = vpop.permute.xlu1 %2105  ;;  %v268_v54 = vcombine.low %v6623_v17, %v6629_v50  ;;  %v866_v2 = vrot.slane %v852_v51, %v4465_v42  ;;  %v834_v63 = vrot.slane %v820_v29, %v4465_v42  ;;  %v269_v28 = vcombine.high %v6623_v17, %v6629_v50  ;;  %v7402_v29 = vld [vmem:[#allocation71_spill] sm:$0xff] }
 0x1ad   : > { %v2074_v39 = vpop.permute.xlu0 %2073  ;;  %v456_v61 = vcombine.low %v412_v25, %v444_v20  ;;  %v308_v19 = vrot.slane %v300_v14, %v4465_v42  ;;  %v301_v43 = vcombine.high %v6632_v10, %v6635_v6 }
 0x1ae   : > { %v6617_v46 = vsel %vm518_vm3, %v2124_v30, %v2074_v39  ;;  %1288 = vrot.lane.b32.xlu1 %v1129_v4, %s4011_s24  ;;  %v7394_v30 = vld [vmem:[#allocation14_spill] sm:$0xff]  ;;  %v1739_v4 = vsel %vm516_vm2, %v1668_v5, %v1706_v3  ;;  %v873_v45 = vcombine.low %v834_v63, %v866_v2  ;;  %v437_v3 = vcombine.high %v6573_v21, %v6576_v41  ;;  %v7401_v41 = vld [vmem:[#allocation13_spill] sm:$0xff]  ;;  %v7404_v5 = vld [vmem:[#allocation28_spill] sm:$0xff] }
 0x1af   : > { %920 = vrot.lane.b32.xlu0 %v872_v59, %s4010_s23  ;;  %v2925_v0 = vsel %vm518_vm3, %v2924_v53, %v7394_v30  ;;  %v457_v53 = vcombine.high %v412_v25, %v444_v20  ;;  %v405_v30 = vcombine.high %v6563_v37, %v6566_v13  ;;  %v730_v25 = vrot.slane %v716_v35, %v4465_v42 }
 0x1b0   : > { %v6639_v56 = vpop.permute.xlu1 %2505  ;;  %v2926_v9 = vsel %vm520_vm4, %v2925_v0, %v7395_v48  ;;  %v2717_v0 = vcombine.low %v7400_v18, %v7399_v47  ;;  %v451_v13 = vrot.slane %v437_v3, %v4465_v42  ;;  %v698_v21 = vrot.slane %v684_v34, %v4465_v42  ;;  %v7411_v3 = vld [vmem:[#allocation61_spill] sm:$0xff]  ;;  %v7413_v18 = vld [vmem:[#allocation19_spill] sm:$0xff] }
 0x1b1   : > { %v6645_v8 = vpop.permute.xlu0 %2473  ;;  %v2927_v11 = vsel %vm522_vm5, %v2926_v9, %v7396_v60  ;;  %v419_v37 = vrot.slane %v405_v30, %v4465_v42  ;;  %v283_v10 = vrot.slane %v269_v28, %v4465_v42  ;;  %v315_v6 = vrot.slane %v301_v43, %v4465_v42  ;;  %v7410_v30 = vld [vmem:[#allocation37_spill] sm:$0xff] }
 0x1b2   : > { %469 = vrot.lane.b32.xlu1 %v319_v26, %s4008_s21  ;;  %v2928_v1 = vsel %vm524_vm6, %v2927_v11, %v6433_v7  ;;  %v2917_v20 = vsel %vm516_vm2, %v2717_v0, %v7401_v41  ;;  %v7412_v34 = vcombine.low %v7410_v30, %v7411_v3 }
 0x1b3   : > { %1320 = vrot.lane.b32.xlu0 %v1266_v38, %s4012_s25  ;;  %v2929_v58 = vsel %vm526_vm7, %v2928_v1, %v6551_v49  ;;  %v276_v49 = vrot.slane %v268_v54, %v4465_v42  ;;  %v874_v38 = vcombine.high %v834_v63, %v866_v2  ;;  %v2918_v60 = vsel %vm518_vm3, %v2917_v20, %v7402_v29  ;;  %v7407_v2 = vld [vmem:[#allocation76_spill] sm:$0xff] }
 0x1b4   : > { %v2915_v55 = vpop.permute.xlu1 %2914  ;;  %v737_v1 = vcombine.low %v698_v21, %v730_v25  ;;  %v458_v50 = vcombine.low %v419_v37, %v451_v13  ;;  %v459_v47 = vcombine.high %v419_v37, %v451_v13 }
 0x1b5   : > { %v2883_v15 = vpop.permute.xlu0 %2882  ;;  %v2930_v7 = vsel %vm528_vm8, %v2929_v58, %v2915_v55  ;;  %v320_v40 = vcombine.low %v276_v49, %v308_v19  ;;  %v321_v14 = vcombine.high %v276_v49, %v308_v19  ;;  %v7405_v55 = vld [vmem:[#allocation30_spill] sm:$0xff]  ;;  %v322_v49 = vcombine.low %v283_v10, %v315_v6 }
 0x1b6   : > { %3758 = vmatprep.subr.mxu0 %v2930_v7  ;;  %892 = vrot.lane.b32.xlu1 %v736_v36, %s4010_s23  ;;  %v1532_v36 = vcombine.low %v7405_v55, %v7404_v5  ;;  %v7406_v7 = vld [vmem:[#allocation77_spill] sm:$0xff] }
 0x1b7   : > { %501 = vrot.lane.b32.xlu0 %v456_v61, %s4009_s22  ;;  %v7403_v61 = vld [vmem:[#allocation80_spill] sm:$0xff]  ;;  %v7408_v63 = vcombine.low %v7406_v7, %v7407_v2 }
 0x1b8   : > { %v1710_v39 = vpop.permute.xlu1 %1709  ;;  %v2919_v17 = vsel %vm520_vm4, %v2918_v60, %v7403_v61  ;;  %v7415_v60 = vld [vmem:[#allocation18_spill] sm:$0xff] }
 0x1b9   : > { %v6678_v59 = vsel %vm518_vm3, %v1739_v4, %v1710_v39  ;;  %v1678_v26 = vpop.permute.xlu0 %1677  ;;  %v2920_v54 = vsel %vm522_vm5, %v2919_v17, %v6437_v23  ;;  %v4013_v39 = vmov 0.0  }
 0x1ba   : > { %1292 = vrot.lane.b32.xlu1 %v1130_v52, %s4012_s25  ;;  %v2921_v58 = vsel %vm524_vm6, %v2920_v54, %v6560_v31  ;;  %3804 = vmatprep.mubr.f32.mxu0 %v4013_v39  ;;  %v738_v52 = vcombine.high %v698_v21, %v730_v25 }
 0x1bb   : > { %924 = vrot.lane.b32.xlu0 %v873_v45, %s4011_s24  ;;  %v2922_v27 = vsel %vm526_vm7, %v2921_v58, %v2883_v15  ;;  %v1732_v15 = vsel %vm516_vm2, %v1532_v36, %v1678_v26  ;;  %v323_v45 = vcombine.high %v283_v10, %v315_v6 }
 0x1bc   : > { %v6690_v51 = vpop.permute.xlu1 %2109 }
 0x1bd   : > { %v6692_v48 = vpop.permute.xlu0 %2077 }
 0x1be   : > { %505 = vrot.lane.b32.xlu1 %v457_v53, %s4010_s23  ;;  %v7409_v53 = vld [vmem:[#allocation12_spill] sm:$0xff] }
 0x1bf   : > { %473 = vrot.lane.b32.xlu0 %v320_v40, %s4009_s22  ;;  %v2523_v40 = vsel %vm516_vm2, %v7412_v34, %v7409_v53  ;;  %v7421_v53 = vld [vmem:[#allocation50_spill] sm:$0xff] }
 0x1c0   : > { %v2510_v9 = vpop.permute.xlu1 %2509  ;;  %v2524_v26 = vsel %vm518_vm3, %v2523_v40, %v7413_v18  ;;  %v2126_v40 = vsel %vm520_vm4, %v6617_v46, %v6692_v48 }
 0x1c1   : > { %v2478_v11 = vpop.permute.xlu0 %2477  ;;  %v2525_v25 = vsel %vm520_vm4, %v2524_v26, %v6386_v22 }
 0x1c2   : > { %928 = vrot.lane.b32.xlu1 %v874_v38, %s4012_s25  ;;  %v2526_v43 = vsel %vm522_vm5, %v2525_v25, %v6520_v33  ;;  %v7414_v33 = vld [vmem:[#allocation59_spill] sm:$0xff] }
 0x1c3   : > { %896 = vrot.lane.b32.xlu0 %v737_v1, %s4011_s24  ;;  %v2527_v21 = vsel %vm524_vm6, %v2526_v43, %v6639_v56  ;;  %v7416_v1 = vcombine.low %v7414_v33, %v7415_v60 }
 0x1c4   : > { %v1297_v24 = vpop.permute.xlu1 %1296  ;;  %v2528_v37 = vsel %vm526_vm7, %v2527_v21, %v2510_v9  ;;  %v2518_v9 = vsel %vm520_vm4, %v6409_v16, %v6524_v62 }
 0x1c5   : > { %v1330_v42 = vsel %vm516_vm2, %v7408_v63, %v1297_v24  ;;  %v2887_v4 = vpop.permute.xlu0 %2886  ;;  %v2519_v6 = vsel %vm522_vm5, %v2518_v9, %v6645_v8  ;;  %v7417_v24 = vld [vmem:[#allocation54_spill] sm:$0xff] }
 0x1c6   : > { %v2923_v23 = vsel %vm528_vm8, %v2922_v27, %v2887_v4  ;;  %509 = vrot.lane.b32.xlu1 %v458_v50, %s4011_s24  ;;  %v2520_v54 = vsel %vm524_vm6, %v2519_v6, %v2478_v11  ;;  %v7418_v27 = vld [vmem:[#allocation53_spill] sm:$0xff]  ;;  %v2133_v11 = vsel %vm520_vm4, %v6493_v12, %v6609_v57 }
 0x1c7   : > { %3759 = vmatpush1.msra.mxu0 %v2923_v23  ;;  %477 = vrot.lane.b32.xlu0 %v321_v14, %s4010_s23  ;;  %v7419_v5 = vcombine.low %v7417_v24, %v7418_v27 }
 0x1c8   : > { %v6728_v31 = vpop.permute.xlu1 %1713 }
 0x1c9   : > { %v1682_v19 = vpop.permute.xlu0 %1681 }
 0x1ca   : > { %v6732_v35 = vsel %vm518_vm3, %v1732_v15, %v1682_v19  ;;  %481 = vrot.lane.b32.xlu1 %v322_v49, %s4011_s24 }
 0x1cb   : > { %900 = vrot.lane.b32.xlu0 %v738_v52, %s4012_s25 }
 0x1cc   : > { %v2114_v0 = vpop.permute.xlu1 %2113 }
 0x1cd   : > { %v2082_v28 = vpop.permute.xlu0 %2081 }
 0x1ce   : > { %485 = vrot.lane.b32.xlu1 %v323_v45, %s4012_s25  ;;  %v7420_v45 = vld [vmem:[#allocation4_spill] sm:$0xff] }
 0x1cf   : > { %513 = vrot.lane.b32.xlu0 %v459_v47, %s4012_s25  ;;  %v7422_v30 = vcombine.low %v7420_v45, %v7421_v53  ;;  %v2127_v47 = vsel %vm522_vm5, %v2126_v40, %v2082_v28 }
 0x1d0   : > { %v2514_v13 = vpop.permute.xlu1 %2513 }
 0x1d1   : > { %v2482_v41 = vpop.permute.xlu0 %2481  ;;  %v2529_v20 = vsel %vm528_vm8, %v2528_v37, %v2514_v13 }
 0x1d2   : > { %3760 = vmatprep.subr.mxu0 %v2529_v20  ;;  %v2521_v58 = vsel %vm526_vm7, %v2520_v54, %v2482_v41  ;;  %v1741_v41 = vsel %vm520_vm4, %v6678_v59, %v6728_v31 }
 0x1d4   : > { %v1301_v38 = vpop.permute.xlu1 %1300 }
 0x1d5   : > { %v6754_v22 = vsel %vm518_vm3, %v1330_v42, %v1301_v38  ;;  %v1269_v29 = vpop.permute.xlu0 %1268  ;;  %v2134_v42 = vsel %vm522_vm5, %v2133_v11, %v6690_v51 }
 0x1d6   : > { %v1323_v61 = vsel %vm516_vm2, %v7416_v1, %v1269_v29  ;;  %v2135_v4 = vsel %vm524_vm6, %v2134_v42, %v2114_v0 }
 0x1d8   : > { %v1718_v56 = vpop.permute.xlu1 %1717 }
 0x1d9   : > { %v1686_v17 = vpop.permute.xlu0 %1685  ;;  %v1742_v48 = vsel %vm522_vm5, %v1741_v41, %v1718_v56 }
 0x1da   : > { %v1734_v59 = vsel %vm520_vm4, %v6732_v35, %v1686_v17 }
 0x1dc   : > { %v2118_v50 = vpop.permute.xlu1 %2117 }
 0x1dd   : > { %v2086_v10 = vpop.permute.xlu0 %2085  ;;  %v2136_v39 = vsel %vm526_vm7, %v2135_v4, %v2118_v50 }
 0x1de   : > { %v2128_v18 = vsel %vm524_vm6, %v2127_v47, %v2086_v10 }
 0x1e0   : > { %v905_v14 = vpop.permute.xlu1 %904 }
 0x1e1   : > { %v6771_v55 = vsel %vm516_vm2, %v7419_v5, %v905_v14  ;;  %v2486_v36 = vpop.permute.xlu0 %2485 }
 0x1e2   : > { %v2522_v7 = vsel %vm528_vm8, %v2521_v58, %v2486_v36 }
 0x1e3   : > { %3761 = vmatpush1.msra.mxu0 %v2522_v7 }
 0x1e4   : > { %v1305_v2 = vpop.permute.xlu1 %1304 }
 0x1e5   : > { %v1273_v16 = vpop.permute.xlu0 %1272  ;;  %v1332_v7 = vsel %vm520_vm4, %v6754_v22, %v1305_v2 }
 0x1e6   : > { %v6775_v62 = vsel %vm518_vm3, %v1323_v61, %v1273_v16 }
 0x1e8   : > { %v1722_v8 = vpop.permute.xlu1 %1721 }
 0x1e9   : > { %v1690_v63 = vpop.permute.xlu0 %1689  ;;  %v1743_v28 = vsel %vm524_vm6, %v1742_v48, %v1722_v8 }
 0x1ea   : > { %v1735_v31 = vsel %vm522_vm5, %v1734_v59, %v1690_v63 }
 0x1ec   : > { %v2122_v23 = vpop.permute.xlu1 %2121 }
 0x1ed   : > { %v2090_v49 = vpop.permute.xlu0 %2089  ;;  %v2137_v15 = vsel %vm528_vm8, %v2136_v39, %v2122_v23 }
 0x1ee   : > { %3762 = vmatprep.subr.mxu0 %v2137_v15  ;;  %v2129_v0 = vsel %vm526_vm7, %v2128_v18, %v2090_v49  ;;  %v316_v18 = vcombine.low %v6424_v44, %v6427_v32 }
 0x1f0   : > { %v6785_v19 = vpop.permute.xlu1 %908 }
 0x1f1   : > { %v877_v52 = vpop.permute.xlu0 %876  ;;  %v939_v45 = vsel %vm518_vm3, %v6771_v55, %v6785_v19  ;;  %v7424_v55 = vld [vmem:[#allocation29_spill] sm:$0xff] }
 0x1f2   : > { %v6791_v12 = vsel %vm516_vm2, %v7422_v30, %v877_v52 }
 0x1f4   : > { %v1309_v57 = vpop.permute.xlu1 %1308 }
 0x1f5   : > { %v1277_v51 = vpop.permute.xlu0 %1276  ;;  %v1333_v35 = vsel %vm522_vm5, %v1332_v7, %v1309_v57 }
 0x1f6   : > { %v1325_v4 = vsel %vm520_vm4, %v6775_v62, %v1277_v51 }
 0x1f8   : > { %v1726_v3 = vpop.permute.xlu1 %1725 }
 0x1f9   : > { %v1694_v34 = vpop.permute.xlu0 %1693  ;;  %v1744_v20 = vsel %vm526_vm7, %v1743_v28, %v1726_v3 }
 0x1fa   : > { %v1736_v56 = vsel %vm524_vm6, %v1735_v31, %v1694_v34 }
 0x1fc   : > { %v6798_v26 = vpop.permute.xlu1 %489 }
 0x1fd   : > { %v2094_v25 = vpop.permute.xlu0 %2093 }
 0x1fe   : > { %v2130_v43 = vsel %vm528_vm8, %v2129_v0, %v2094_v25  ;;  %v7423_v0 = vld [vmem:[#allocation27_spill] sm:$0xff] }
 0x1ff   : > { %3763 = vmatpush1.msra.mxu0 %v2130_v43  ;;  %v452_v19 = vcombine.low %v7424_v55, %v7423_v0 }
 0x200   : > { %v913_v21 = vpop.permute.xlu1 %912 }
 0x201   : > { %v881_v37 = vpop.permute.xlu0 %880  ;;  %v940_v30 = vsel %vm520_vm4, %v939_v45, %v913_v21  ;;  %v530_v48 = vsel %vm516_vm2, %v452_v19, %v6798_v26 }
 0x202   : > { %v932_v43 = vsel %vm518_vm3, %v6791_v12, %v881_v37 }
 0x204   : > { %v1313_v13 = vpop.permute.xlu1 %1312 }
 0x205   : > { %v1281_v46 = vpop.permute.xlu0 %1280  ;;  %v1334_v17 = vsel %vm524_vm6, %v1333_v35, %v1313_v13 }
 0x206   : > { %v1326_v23 = vsel %vm522_vm5, %v1325_v4, %v1281_v46 }
 0x208   : > { %v1730_v38 = vpop.permute.xlu1 %1729 }
 0x209   : > { %v1698_v29 = vpop.permute.xlu0 %1697  ;;  %v1745_v33 = vsel %vm528_vm8, %v1744_v20, %v1730_v38 }
 0x20a   : > { %3764 = vmatprep.subr.mxu0 %v1745_v33  ;;  %v1737_v54 = vsel %vm526_vm7, %v1736_v56, %v1698_v29 }
 0x20c   : > { %v494_v60 = vpop.permute.xlu1 %493 }
 0x20d   : > { %v462_v1 = vpop.permute.xlu0 %461  ;;  %v531_v20 = vsel %vm518_vm3, %v530_v48, %v494_v60 }
 0x20e   : > { %v517_v41 = vsel %vm516_vm2, %v316_v18, %v462_v1 }
 0x210   : > { %v917_v61 = vpop.permute.xlu1 %916 }
 0x211   : > { %v885_v50 = vpop.permute.xlu0 %884  ;;  %v941_v57 = vsel %vm522_vm5, %v940_v30, %v917_v61 }
 0x212   : > { %v933_v13 = vsel %vm520_vm4, %v932_v43, %v885_v50 }
 0x214   : > { %v1317_v10 = vpop.permute.xlu1 %1316 }
 0x215   : > { %v1285_v9 = vpop.permute.xlu0 %1284  ;;  %v1335_v8 = vsel %vm526_vm7, %v1334_v17, %v1317_v10 }
 0x216   : > { %v1327_v22 = vsel %vm524_vm6, %v1326_v23, %v1285_v9 }
 0x218   : > { %v466_v6 = vpop.permute.xlu1 %465 }
 0x219   : > { %v1702_v14 = vpop.permute.xlu0 %1701  ;;  %v519_v28 = vsel %vm518_vm3, %v517_v41, %v466_v6  ;;  %v3717_v6 = vld [vmem:[%s6878_s1] sm:$0xff] }
 0x21a   : > { %v1738_v58 = vsel %vm528_vm8, %v1737_v54, %v1702_v14 }
 0x21b   : > { %3765 = vmatpush1.msra.mxu0 %v1738_v58 }
 0x21c   : > { %v889_v24 = vpop.permute.xlu1 %888 }
 0x21d   : > { %v498_v27 = vpop.permute.xlu0 %497  ;;  %v934_v46 = vsel %vm522_vm5, %v933_v13, %v889_v24 }
 0x21e   : > { %v532_v29 = vsel %vm520_vm4, %v531_v20, %v498_v27 }
 0x220   : > { %v1289_v5 = vpop.permute.xlu1 %1288 }
 0x221   : > { %v921_v36 = vpop.permute.xlu0 %920  ;;  %v1328_v2 = vsel %vm526_vm7, %v1327_v22, %v1289_v5 }
 0x222   : > { %v942_v51 = vsel %vm524_vm6, %v941_v57, %v921_v36 }
 0x224   : > { %v470_v16 = vpop.permute.xlu1 %469 }
 0x225   : > { %v1321_v11 = vpop.permute.xlu0 %1320  ;;  %v521_v38 = vsel %vm520_vm4, %v519_v28, %v470_v16 }
 0x226   : > { %v1336_v63 = vsel %vm528_vm8, %v1335_v8, %v1321_v11 }
 0x227   : > { %3766 = vmatprep.subr.mxu0 %v1336_v63 }
 0x228   : > { %v893_v42 = vpop.permute.xlu1 %892 }
 0x229   : > { %v502_v39 = vpop.permute.xlu0 %501  ;;  %v935_v44 = vsel %vm524_vm6, %v934_v46, %v893_v42 }
 0x22a   : > { %v533_v26 = vsel %vm522_vm5, %v532_v29, %v502_v39 }
 0x22c   : > { %v1293_v49 = vpop.permute.xlu1 %1292 }
 0x22d   : > { %v925_v15 = vpop.permute.xlu0 %924  ;;  %v1329_v52 = vsel %vm528_vm8, %v1328_v2, %v1293_v49 }
 0x22e   : > { %3767 = vmatpush1.msra.mxu0 %v1329_v52  ;;  %v943_v3 = vsel %vm526_vm7, %v942_v51, %v925_v15 }
 0x230   : > { %v506_v53 = vpop.permute.xlu1 %505 }
 0x231   : > { %v474_v62 = vpop.permute.xlu0 %473  ;;  %v534_v50 = vsel %vm524_vm6, %v533_v26, %v506_v53 }
 0x232   : > { %v523_v33 = vsel %vm522_vm5, %v521_v38, %v474_v62 }
 0x234   : > { %v929_v34 = vpop.permute.xlu1 %928 }
 0x235   : > { %v897_v40 = vpop.permute.xlu0 %896  ;;  %v944_v47 = vsel %vm528_vm8, %v943_v3, %v929_v34 }
 0x236   : > { %3768 = vmatprep.subr.mxu0 %v944_v47  ;;  %v936_v12 = vsel %vm526_vm7, %v935_v44, %v897_v40 }
 0x238   : > { %v510_v25 = vpop.permute.xlu1 %509 }
 0x239   : > { %v478_v21 = vpop.permute.xlu0 %477  ;;  %v535_v9 = vsel %vm526_vm7, %v534_v50, %v510_v25 }
 0x23a   : > { %v525_v61 = vsel %vm524_vm6, %v523_v33, %v478_v21 }
 0x23c   : > { %v482_v32 = vpop.permute.xlu1 %481 }
 0x23d   : > { %v901_v37 = vpop.permute.xlu0 %900  ;;  %v527_v60 = vsel %vm526_vm7, %v525_v61, %v482_v32 }
 0x23e   : > { %v937_v1 = vsel %vm528_vm8, %v936_v12, %v901_v37 }
 0x23f   : > { %3769 = vmatpush1.msra.mxu0 %v937_v1 }
 0x240   : > { %v486_v10 = vpop.permute.xlu1 %485 }
 0x241   : > { %v514_v59 = vpop.permute.xlu0 %513  ;;  %v529_v31 = vsel %vm528_vm8, %v527_v60, %v486_v10 }
 0x242   : > { %v536_v56 = vsel %vm528_vm8, %v535_v9, %v514_v59 }
 0x243   : > { %3770 = vmatprep.subr.mxu0 %v536_v56 }
 0x244   : > { %3771 = vmatpush1.msra.mxu0 %v529_v31 }
 0x245   : > { %3906 = vmatmul.mubr.msk.f32.vlgmr.msra.gmra.mxu0 %vm3736_vm9, %v3717_v6 }
 0x305   : > { %v3806_v54 = vpop.f32.mrf.mxu0 }
 0x307   : > { %v3808_v14 = vpop.f32.mrf.mxu0 }
 0x308   : > { %v3811_v58 = vadd.f32 %v3808_v14, %v3806_v54 }
 0x30a   : > { %3812 = vadd.xlane.f32.xlu0 %v3811_v58 }
 0x393   : > { %v3813_v24 = vpop.xlane.xlu0 %3812 }
 0x394   : > { %v3814_v27 = vmul.f32 0.00390625, %v3813_v24  ;;  %3818 = vst.msk [vmem:[%s161_s3] sm:$0xff] %vm3817_vm10, %v3813_v24 }
 0x396   : > { %v3815_v5 = vsub.f32 %v3806_v54, %v3814_v27  ;;  %v3816_v36 = vsub.f32 %v3808_v14, %v3814_v27 }
 0x398   : > { %v3819_v7 = vmul.f32 %v3815_v5, %v3815_v5  ;;  %v3820_v35 = vmul.f32 %v3816_v36, %v3816_v36 }
 0x39a   : > { %v3821_v17 = vadd.f32 %v3820_v35, %v3819_v7 }
 0x39c   : > { %3822 = vadd.xlane.f32.xlu1 %v3821_v17 }
 0x425   : > { %v3823_v16 = vpop.xlane.xlu1 %3822 }
 0x426   : > { %3825 = vst.msk [vmem:[%s161_s3] sm:$0xff] %vm3824_vm11, %v3823_v16 }
 0x427 PF: > { %s12_s11 = sadd.s32 1, %s4000_s11   ;;  %s7425_s9 = smov %s3996_s10 }
 0x428   : > { %p9_p5 = scmp.ge.s32.totalorder %s12_s11, 4   ;;  %s7426_s10 = smov %s7428_s12 }
 0x42a   :  { %11 = sbr.rel (!%p9_p5) target bundleno = 2 (0x2), region = 59 }

</bundles_post_ra>
